<compile_context>
chip_gen: v7x
topology: tpu7x:2x2x1
jax: 0.10.0
libtpu: 0.0.40
codegen_flags: <defaults>
</compile_context>

<pallas_src>
import numpy as np
import jax
import jax.numpy as jnp
from jax.experimental import pallas as pl
from jax.experimental.pallas import tpu as pltpu

KERNEL_SIZE = 11
SIGMA = 1.5
DATA_RANGE = 1.0
K1, K2 = 0.01, 0.03
C1 = (K1 * DATA_RANGE) ** 2
C2 = (K2 * DATA_RANGE) ** 2

# Planes smaller than this (in either dim) use the VPU shifted-slice path; the
# MXU matmuls would be >90% padding there (K = W tiny, N = Wv lanes empty).
_MXU_MIN_DIM = 64


def _gaussian_1d(kernel_size=KERNEL_SIZE, sigma=SIGMA):
    # Matches torchmetrics _gaussian(): dist = (1-k)/2 ... (k-1)/2
    dist = np.arange((1 - kernel_size) / 2.0, (1 + kernel_size) / 2.0, 1.0,
                     dtype=np.float64)
    g = np.exp(-((dist / sigma) ** 2) / 2.0)
    g = g / g.sum()
    return g.astype(np.float32)


GAUSS_1D = _gaussian_1d()
_TAPS = [float(v) for v in GAUSS_1D]  # compile-time scalars for the VPU path


def _valid_toeplitz(n_in, taps):
    """(n_out, n_in) M such that (M @ v)[i] = sum_k taps[k] * v[i+k]."""
    k = taps.shape[0]
    n_out = n_in - k + 1
    m = np.zeros((n_out, n_in), np.float32)
    for i in range(n_out):
        m[i, i:i + k] = taps
    return m


def _ssim_block_sum(mu_x, mu_y, e_xx, e_yy, e_xy):
    """Pointwise SSIM map from filtered moments; returns its total sum (1,1)."""
    mu_xx = mu_x * mu_x
    mu_yy = mu_y * mu_y
    mu_xy = mu_x * mu_y
    s_xx = e_xx - mu_xx
    s_yy = e_yy - mu_yy
    s_xy = e_xy - mu_xy

    num = (2.0 * mu_xy + C1) * (2.0 * s_xy + C2)
    den = (mu_xx + mu_yy + C1) * (s_xx + s_yy + C2)

    # EUP reciprocal + one Newton-Raphson step: keeps ~f32 accuracy while
    # moving the divides off the VALU.  den >= C1*C2 > 0, so no hazard.
    r = pl.reciprocal(den, approx=True)
    r = r * (2.0 - den * r)
    ssim_map = num * r                                     # (B, ., .)
    return jnp.sum(jnp.sum(ssim_map, axis=0), keepdims=True)   # (1, 1)


def _make_kernel_vpu(B, H, W):
    """Small-plane path: separable 11-tap filter as shifted-slice FMAs (VPU)."""
    Hv = H - (KERNEL_SIZE - 1)
    Wv = W - (KERNEL_SIZE - 1)

    def gfilter(z):                                        # (B, H, W) f32
        # Horizontal VALID pass (lane-axis shifted slices).
        acc = _TAPS[0] * z[:, :, 0:Wv]
        for k in range(1, KERNEL_SIZE):
            acc = acc + _TAPS[k] * z[:, :, k:k + Wv]       # (B, H, Wv)
        # Vertical VALID pass (sublane-axis shifted slices).
        out = _TAPS[0] * acc[:, 0:Hv, :]
        for k in range(1, KERNEL_SIZE):
            out = out + _TAPS[k] * acc[:, k:k + Hv, :]     # (B, Hv, Wv)
        return out

    def kernel(x_ref, y_ref, o_ref):
        x = x_ref[...].astype(jnp.float32)                 # (B, H, W)
        y = y_ref[...].astype(jnp.float32)
        o_ref[...] = _ssim_block_sum(gfilter(x), gfilter(y), gfilter(x * x),
                                     gfilter(y * y), gfilter(x * y))

    return kernel


def _make_kernel_mxu(B, H, W):
    """Large-plane path: each gaussian pass is one tall 2D matmul (MXU)."""
    Hv = H - (KERNEL_SIZE - 1)
    Wv = W - (KERNEL_SIZE - 1)

    def kernel(x_ref, y_ref, gh_ref, gvt_ref, o_ref):
        x = x_ref[...].astype(jnp.float32)                 # (B, H, W)
        y = y_ref[...].astype(jnp.float32)
        gh = gh_ref[...]                                   # (W, Wv)
        gvt = gvt_ref[...]                                 # (H, Hv)

        def gfilter(z):
            # Horizontal pass: one tall matmul, batch folded into sublanes.
            t = jnp.dot(z.reshape(B * H, W), gh,
                        preferred_element_type=jnp.float32).reshape(B, H, Wv)
            # Vertical pass: single transpose, then another tall matmul.
            t = jnp.transpose(t, (0, 2, 1)).reshape(B * Wv, H)
            f = jnp.dot(t, gvt, preferred_element_type=jnp.float32)
            # Stays in transposed (B, Wv, Hv) layout; the SSIM map is only
            # reduced, so spatial layout is irrelevant (and consistent across
            # all five filtered quantities).
            return f.reshape(B, Wv, Hv)

        o_ref[...] = _ssim_block_sum(gfilter(x), gfilter(y), gfilter(x * x),
                                     gfilter(y * y), gfilter(x * y))

    return kernel


def _vmem_capacity_bytes():
    try:
        return int(pltpu.get_tpu_info().vmem_capacity_bytes)
    except Exception:
        return 64 * 1024 * 1024   # conservative default (v7x per-core VMEM)


def _pick_block(NC, H, W, budget_bytes):
    """Largest divisor of NC whose working set fits the budget, capped at NC//2
    so two-TensorCore chips (v7x) see >= 2 parallel grid steps."""
    Hv, Wv = H - (KERNEL_SIZE - 1), W - (KERNEL_SIZE - 1)
    # Rough per-plane f32 working set: x/y in f32, the three products,
    # per-filter horizontal intermediates, five filtered moments, pointwise
    # SSIM temporaries, plus double-buffered input DMA copies.
    per_plane = (4 * (6 * H * W + 3 * H * Wv + 12 * Hv * Wv)
                 + 2 * 2 * 4 * H * W)
    cap = max(1, budget_bytes // max(per_plane, 1))
    if NC >= 2:
        cap = min(cap, max(1, NC // 2))
    b = int(min(NC, cap))
    while NC % b:
        b -= 1
    return b


def ssim_loss(img1, img2):
    """1 - mean SSIM, matching SSIMLoss(data_range=1.0).forward(img1, img2)."""
    N, C, H, W = img1.shape
    NC = N * C
    assert H >= KERNEL_SIZE and W >= KERNEL_SIZE, "spatial dims must be >= 11"
    Hv, Wv = H - (KERNEL_SIZE - 1), W - (KERNEL_SIZE - 1)

    # Keep the incoming dtype for the HBM->VMEM DMA; the kernel casts to f32.
    x = img1.reshape(NC, H, W)
    y = img2.reshape(NC, H, W)

    vmem_phys = _vmem_capacity_bytes()
    vmem_limit = int(min(vmem_phys // 2, 64 * 1024 * 1024))
    budget = int(min(vmem_phys // 4, 32 * 1024 * 1024))
    B = _pick_block(NC, H, W, budget)
    num_blocks = NC // B

    # TODO(synk): for very large planes, halo-tile H (10-row overlap, per-tile
    # vertical weights) so the per-step working set fits v7x's 64 MiB VMEM and
    # the grid gains another parallel axis; full planes per step are fine for
    # the shapes exercised here.
    use_mxu = min(H, W) >= _MXU_MIN_DIM

    plane_specs = [pl.BlockSpec((B, H, W), lambda i: (i, 0, 0)),
                   pl.BlockSpec((B, H, W), lambda i: (i, 0, 0))]
    pointwise_flops = NC * (3 * H * W + 16 * Hv * Wv)

    if use_mxu:
        kernel = _make_kernel_mxu(B, H, W)
        gh = jnp.asarray(_valid_toeplitz(W, GAUSS_1D).T)    # (W, Wv)
        gvt = jnp.asarray(_valid_toeplitz(H, GAUSS_1D).T)   # (H, Hv)
        operands = (x, y, gh, gvt)
        in_specs = plane_specs + [
            # Grid-invariant weights: resident and single-buffered (VMEM
            # headroom on v7x; they never change so pipelining buys nothing).
            pl.BlockSpec((W, Wv), lambda i: (0, 0),
                         pipeline_mode=pl.Buffered(1)),
            pl.BlockSpec((H, Hv), lambda i: (0, 0),
                         pipeline_mode=pl.Buffered(1)),
        ]
        flops = 5 * NC * 2 * (H * W * Wv + Wv * H * Hv) + pointwise_flops
        const_bytes = (W * Wv + H * Hv) * 4
    else:
        kernel = _make_kernel_vpu(B, H, W)
        operands = (x, y)
        in_specs = plane_specs
        flops = 5 * NC * 2 * KERNEL_SIZE * (H * Wv + Hv * Wv) + pointwise_flops
        const_bytes = 0

    cost = pl.CostEstimate(
        flops=int(flops),
        transcendentals=int(NC * Hv * Wv),
        bytes_accessed=int(2 * NC * H * W * x.dtype.itemsize + const_bytes
                           + num_blocks * 4),
    )

    plane_sums = pl.pallas_call(
        kernel,
        out_shape=jax.ShapeDtypeStruct((num_blocks, 1, 1), jnp.float32),
        grid_spec=pltpu.PrefetchScalarGridSpec(
            num_scalar_prefetch=0,
            grid=(num_blocks,),
            in_specs=in_specs,
            out_specs=pl.BlockSpec((None, 1, 1), lambda i: (i, 0, 0)),
        ),
        compiler_params=pltpu.CompilerParams(
            dimension_semantics=("parallel",),
            vmem_limit_bytes=vmem_limit),
        cost_estimate=cost,
    )(*operands)

    # Per-sample mean over (C, Hv, Wv) then batch mean == global mean here
    # (all samples have identical element counts).
    mean_ssim = jnp.sum(plane_sums) / (NC * Hv * Wv)
    return 1.0 - mean_ssim


def ssim_loss_ref(img1, img2):
    """Pure-JAX reference (depthwise conv via lax) for validation."""
    N, C, H, W = img1.shape
    g2d = jnp.asarray(np.outer(GAUSS_1D, GAUSS_1D), jnp.float32)
    kern = jnp.tile(g2d[None, None], (C, 1, 1, 1))  # (C, 1, 11, 11)

    def filt(x):
        return jax.lax.conv_general_dilated(
            x.astype(jnp.float32), kern, (1, 1), "VALID",
            feature_group_count=C,
            dimension_numbers=("NCHW", "OIHW", "NCHW"))

    mu1, mu2 = filt(img1), filt(img2)
    mu1_sq, mu2_sq, mu12 = mu1 * mu1, mu2 * mu2, mu1 * mu2
    s1 = filt(img1 * img1) - mu1_sq
    s2 = filt(img2 * img2) - mu2_sq
    s12 = filt(img1 * img2) - mu12
    ssim_map = ((2 * mu12 + C1) * (2 * s12 + C2)) / (
        (mu1_sq + mu2_sq + C1) * (s1 + s2 + C2))
    per_sample = ssim_map.reshape(N, -1).mean(-1)
    return 1.0 - per_sample.mean()


if __name__ == "__main__":
    key = jax.random.PRNGKey(0)
    k1, k2 = jax.random.split(key)
    shape = (2, 4, 16, 16)  # N, C, H, W
    img1 = jax.random.uniform(k1, shape, dtype=jnp.float32)
    img2 = jnp.clip(
        img1 + 0.05 * jax.random.normal(k2, shape, dtype=jnp.float32), 0.0, 1.0)

    loss = jax.block_until_ready(ssim_loss(img1, img2))
    ref = jax.block_until_ready(ssim_loss_ref(img1, img2))

    assert jnp.isfinite(loss), loss
    assert jnp.allclose(loss, ref, atol=5e-5, rtol=1e-4), (loss, ref)
    print("KERNEL_OK")
</pallas_src>

<mosaic_0001>
module attributes {stable_mosaic.version = 11 : i64} {
  func.func @kernel(%arg0: i32, %arg1: memref<4x16x16xf32, #tpu.memory_space<vmem>>, %arg2: memref<4x16x16xf32, #tpu.memory_space<vmem>>, %arg3: memref<1x1x1xf32, #tpu.memory_space<vmem>>) attributes {dimension_semantics = [#tpu.dimension_semantics<parallel>], iteration_bounds = array<i64: 2>, scalar_prefetch = 0 : i64, scratch_operands = 0 : i64, tpu.core_type = #tpu.core_type<tc>, window_params = [{transform_indices = @transform_0, window_bounds = array<i64: 4, 16, 16>}, {transform_indices = @transform_1, window_bounds = array<i64: 4, 16, 16>}, {transform_indices = @transform_2, window_bounds = array<i64: 1, 1, 1>}]} {
    %c0 = arith.constant 0 : index
    %c0_0 = arith.constant 0 : index
    %c0_1 = arith.constant 0 : index
    %0 = vector.load %arg1[%c0, %c0_0, %c0_1] : memref<4x16x16xf32, #tpu.memory_space<vmem>>, vector<4x16x16xf32>
    %c0_2 = arith.constant 0 : index
    %c0_3 = arith.constant 0 : index
    %c0_4 = arith.constant 0 : index
    %1 = vector.load %arg2[%c0_2, %c0_3, %c0_4] : memref<4x16x16xf32, #tpu.memory_space<vmem>>, vector<4x16x16xf32>
    %2 = vector.extract_strided_slice %0 {offsets = [0, 0, 0], sizes = [4, 16, 6], strides = [1, 1, 1]} : vector<4x16x16xf32> to vector<4x16x6xf32>
    %cst = arith.constant 0.00102838012 : f32
    %3 = vector.broadcast %cst : f32 to vector<4x16x6xf32>
    %4 = arith.mulf %3, %2 : vector<4x16x6xf32>
    %5 = vector.extract_strided_slice %0 {offsets = [0, 0, 1], sizes = [4, 16, 6], strides = [1, 1, 1]} : vector<4x16x16xf32> to vector<4x16x6xf32>
    %cst_5 = arith.constant 0.00759875821 : f32
    %6 = vector.broadcast %cst_5 : f32 to vector<4x16x6xf32>
    %7 = arith.mulf %6, %5 : vector<4x16x6xf32>
    %8 = arith.addf %4, %7 : vector<4x16x6xf32>
    %9 = vector.extract_strided_slice %0 {offsets = [0, 0, 2], sizes = [4, 16, 6], strides = [1, 1, 1]} : vector<4x16x16xf32> to vector<4x16x6xf32>
    %cst_6 = arith.constant 0.0360007733 : f32
    %10 = vector.broadcast %cst_6 : f32 to vector<4x16x6xf32>
    %11 = arith.mulf %10, %9 : vector<4x16x6xf32>
    %12 = arith.addf %8, %11 : vector<4x16x6xf32>
    %13 = vector.extract_strided_slice %0 {offsets = [0, 0, 3], sizes = [4, 16, 6], strides = [1, 1, 1]} : vector<4x16x16xf32> to vector<4x16x6xf32>
    %cst_7 = arith.constant 0.109360687 : f32
    %14 = vector.broadcast %cst_7 : f32 to vector<4x16x6xf32>
    %15 = arith.mulf %14, %13 : vector<4x16x6xf32>
    %16 = arith.addf %12, %15 : vector<4x16x6xf32>
    %17 = vector.extract_strided_slice %0 {offsets = [0, 0, 4], sizes = [4, 16, 6], strides = [1, 1, 1]} : vector<4x16x16xf32> to vector<4x16x6xf32>
    %cst_8 = arith.constant 0.213005543 : f32
    %18 = vector.broadcast %cst_8 : f32 to vector<4x16x6xf32>
    %19 = arith.mulf %18, %17 : vector<4x16x6xf32>
    %20 = arith.addf %16, %19 : vector<4x16x6xf32>
    %21 = vector.extract_strided_slice %0 {offsets = [0, 0, 5], sizes = [4, 16, 6], strides = [1, 1, 1]} : vector<4x16x16xf32> to vector<4x16x6xf32>
    %cst_9 = arith.constant 0.266011715 : f32
    %22 = vector.broadcast %cst_9 : f32 to vector<4x16x6xf32>
    %23 = arith.mulf %22, %21 : vector<4x16x6xf32>
    %24 = arith.addf %20, %23 : vector<4x16x6xf32>
    %25 = vector.extract_strided_slice %0 {offsets = [0, 0, 6], sizes = [4, 16, 6], strides = [1, 1, 1]} : vector<4x16x16xf32> to vector<4x16x6xf32>
    %cst_10 = arith.constant 0.213005543 : f32
    %26 = vector.broadcast %cst_10 : f32 to vector<4x16x6xf32>
    %27 = arith.mulf %26, %25 : vector<4x16x6xf32>
    %28 = arith.addf %24, %27 : vector<4x16x6xf32>
    %29 = vector.extract_strided_slice %0 {offsets = [0, 0, 7], sizes = [4, 16, 6], strides = [1, 1, 1]} : vector<4x16x16xf32> to vector<4x16x6xf32>
    %cst_11 = arith.constant 0.109360687 : f32
    %30 = vector.broadcast %cst_11 : f32 to vector<4x16x6xf32>
    %31 = arith.mulf %30, %29 : vector<4x16x6xf32>
    %32 = arith.addf %28, %31 : vector<4x16x6xf32>
    %33 = vector.extract_strided_slice %0 {offsets = [0, 0, 8], sizes = [4, 16, 6], strides = [1, 1, 1]} : vector<4x16x16xf32> to vector<4x16x6xf32>
    %cst_12 = arith.constant 0.0360007733 : f32
    %34 = vector.broadcast %cst_12 : f32 to vector<4x16x6xf32>
    %35 = arith.mulf %34, %33 : vector<4x16x6xf32>
    %36 = arith.addf %32, %35 : vector<4x16x6xf32>
    %37 = vector.extract_strided_slice %0 {offsets = [0, 0, 9], sizes = [4, 16, 6], strides = [1, 1, 1]} : vector<4x16x16xf32> to vector<4x16x6xf32>
    %cst_13 = arith.constant 0.00759875821 : f32
    %38 = vector.broadcast %cst_13 : f32 to vector<4x16x6xf32>
    %39 = arith.mulf %38, %37 : vector<4x16x6xf32>
    %40 = arith.addf %36, %39 : vector<4x16x6xf32>
    %41 = vector.extract_strided_slice %0 {offsets = [0, 0, 10], sizes = [4, 16, 6], strides = [1, 1, 1]} : vector<4x16x16xf32> to vector<4x16x6xf32>
    %cst_14 = arith.constant 0.00102838012 : f32
    %42 = vector.broadcast %cst_14 : f32 to vector<4x16x6xf32>
    %43 = arith.mulf %42, %41 : vector<4x16x6xf32>
    %44 = arith.addf %40, %43 : vector<4x16x6xf32>
    %45 = vector.extract_strided_slice %44 {offsets = [0, 0, 0], sizes = [4, 6, 6], strides = [1, 1, 1]} : vector<4x16x6xf32> to vector<4x6x6xf32>
    %cst_15 = arith.constant 0.00102838012 : f32
    %46 = vector.broadcast %cst_15 : f32 to vector<4x6x6xf32>
    %47 = arith.mulf %46, %45 : vector<4x6x6xf32>
    %48 = vector.extract_strided_slice %44 {offsets = [0, 1, 0], sizes = [4, 6, 6], strides = [1, 1, 1]} : vector<4x16x6xf32> to vector<4x6x6xf32>
    %cst_16 = arith.constant 0.00759875821 : f32
    %49 = vector.broadcast %cst_16 : f32 to vector<4x6x6xf32>
    %50 = arith.mulf %49, %48 : vector<4x6x6xf32>
    %51 = arith.addf %47, %50 : vector<4x6x6xf32>
    %52 = vector.extract_strided_slice %44 {offsets = [0, 2, 0], sizes = [4, 6, 6], strides = [1, 1, 1]} : vector<4x16x6xf32> to vector<4x6x6xf32>
    %cst_17 = arith.constant 0.0360007733 : f32
    %53 = vector.broadcast %cst_17 : f32 to vector<4x6x6xf32>
    %54 = arith.mulf %53, %52 : vector<4x6x6xf32>
    %55 = arith.addf %51, %54 : vector<4x6x6xf32>
    %56 = vector.extract_strided_slice %44 {offsets = [0, 3, 0], sizes = [4, 6, 6], strides = [1, 1, 1]} : vector<4x16x6xf32> to vector<4x6x6xf32>
    %cst_18 = arith.constant 0.109360687 : f32
    %57 = vector.broadcast %cst_18 : f32 to vector<4x6x6xf32>
    %58 = arith.mulf %57, %56 : vector<4x6x6xf32>
    %59 = arith.addf %55, %58 : vector<4x6x6xf32>
    %60 = vector.extract_strided_slice %44 {offsets = [0, 4, 0], sizes = [4, 6, 6], strides = [1, 1, 1]} : vector<4x16x6xf32> to vector<4x6x6xf32>
    %cst_19 = arith.constant 0.213005543 : f32
    %61 = vector.broadcast %cst_19 : f32 to vector<4x6x6xf32>
    %62 = arith.mulf %61, %60 : vector<4x6x6xf32>
    %63 = arith.addf %59, %62 : vector<4x6x6xf32>
    %64 = vector.extract_strided_slice %44 {offsets = [0, 5, 0], sizes = [4, 6, 6], strides = [1, 1, 1]} : vector<4x16x6xf32> to vector<4x6x6xf32>
    %cst_20 = arith.constant 0.266011715 : f32
    %65 = vector.broadcast %cst_20 : f32 to vector<4x6x6xf32>
    %66 = arith.mulf %65, %64 : vector<4x6x6xf32>
    %67 = arith.addf %63, %66 : vector<4x6x6xf32>
    %68 = vector.extract_strided_slice %44 {offsets = [0, 6, 0], sizes = [4, 6, 6], strides = [1, 1, 1]} : vector<4x16x6xf32> to vector<4x6x6xf32>
    %cst_21 = arith.constant 0.213005543 : f32
    %69 = vector.broadcast %cst_21 : f32 to vector<4x6x6xf32>
    %70 = arith.mulf %69, %68 : vector<4x6x6xf32>
    %71 = arith.addf %67, %70 : vector<4x6x6xf32>
    %72 = vector.extract_strided_slice %44 {offsets = [0, 7, 0], sizes = [4, 6, 6], strides = [1, 1, 1]} : vector<4x16x6xf32> to vector<4x6x6xf32>
    %cst_22 = arith.constant 0.109360687 : f32
    %73 = vector.broadcast %cst_22 : f32 to vector<4x6x6xf32>
    %74 = arith.mulf %73, %72 : vector<4x6x6xf32>
    %75 = arith.addf %71, %74 : vector<4x6x6xf32>
    %76 = vector.extract_strided_slice %44 {offsets = [0, 8, 0], sizes = [4, 6, 6], strides = [1, 1, 1]} : vector<4x16x6xf32> to vector<4x6x6xf32>
    %cst_23 = arith.constant 0.0360007733 : f32
    %77 = vector.broadcast %cst_23 : f32 to vector<4x6x6xf32>
    %78 = arith.mulf %77, %76 : vector<4x6x6xf32>
    %79 = arith.addf %75, %78 : vector<4x6x6xf32>
    %80 = vector.extract_strided_slice %44 {offsets = [0, 9, 0], sizes = [4, 6, 6], strides = [1, 1, 1]} : vector<4x16x6xf32> to vector<4x6x6xf32>
    %cst_24 = arith.constant 0.00759875821 : f32
    %81 = vector.broadcast %cst_24 : f32 to vector<4x6x6xf32>
    %82 = arith.mulf %81, %80 : vector<4x6x6xf32>
    %83 = arith.addf %79, %82 : vector<4x6x6xf32>
    %84 = vector.extract_strided_slice %44 {offsets = [0, 10, 0], sizes = [4, 6, 6], strides = [1, 1, 1]} : vector<4x16x6xf32> to vector<4x6x6xf32>
    %cst_25 = arith.constant 0.00102838012 : f32
    %85 = vector.broadcast %cst_25 : f32 to vector<4x6x6xf32>
    %86 = arith.mulf %85, %84 : vector<4x6x6xf32>
    %87 = arith.addf %83, %86 : vector<4x6x6xf32>
    %88 = vector.extract_strided_slice %1 {offsets = [0, 0, 0], sizes = [4, 16, 6], strides = [1, 1, 1]} : vector<4x16x16xf32> to vector<4x16x6xf32>
    %cst_26 = arith.constant 0.00102838012 : f32
    %89 = vector.broadcast %cst_26 : f32 to vector<4x16x6xf32>
    %90 = arith.mulf %89, %88 : vector<4x16x6xf32>
    %91 = vector.extract_strided_slice %1 {offsets = [0, 0, 1], sizes = [4, 16, 6], strides = [1, 1, 1]} : vector<4x16x16xf32> to vector<4x16x6xf32>
    %cst_27 = arith.constant 0.00759875821 : f32
    %92 = vector.broadcast %cst_27 : f32 to vector<4x16x6xf32>
    %93 = arith.mulf %92, %91 : vector<4x16x6xf32>
    %94 = arith.addf %90, %93 : vector<4x16x6xf32>
    %95 = vector.extract_strided_slice %1 {offsets = [0, 0, 2], sizes = [4, 16, 6], strides = [1, 1, 1]} : vector<4x16x16xf32> to vector<4x16x6xf32>
    %cst_28 = arith.constant 0.0360007733 : f32
    %96 = vector.broadcast %cst_28 : f32 to vector<4x16x6xf32>
    %97 = arith.mulf %96, %95 : vector<4x16x6xf32>
    %98 = arith.addf %94, %97 : vector<4x16x6xf32>
    %99 = vector.extract_strided_slice %1 {offsets = [0, 0, 3], sizes = [4, 16, 6], strides = [1, 1, 1]} : vector<4x16x16xf32> to vector<4x16x6xf32>
    %cst_29 = arith.constant 0.109360687 : f32
    %100 = vector.broadcast %cst_29 : f32 to vector<4x16x6xf32>
    %101 = arith.mulf %100, %99 : vector<4x16x6xf32>
    %102 = arith.addf %98, %101 : vector<4x16x6xf32>
    %103 = vector.extract_strided_slice %1 {offsets = [0, 0, 4], sizes = [4, 16, 6], strides = [1, 1, 1]} : vector<4x16x16xf32> to vector<4x16x6xf32>
    %cst_30 = arith.constant 0.213005543 : f32
    %104 = vector.broadcast %cst_30 : f32 to vector<4x16x6xf32>
    %105 = arith.mulf %104, %103 : vector<4x16x6xf32>
    %106 = arith.addf %102, %105 : vector<4x16x6xf32>
    %107 = vector.extract_strided_slice %1 {offsets = [0, 0, 5], sizes = [4, 16, 6], strides = [1, 1, 1]} : vector<4x16x16xf32> to vector<4x16x6xf32>
    %cst_31 = arith.constant 0.266011715 : f32
    %108 = vector.broadcast %cst_31 : f32 to vector<4x16x6xf32>
    %109 = arith.mulf %108, %107 : vector<4x16x6xf32>
    %110 = arith.addf %106, %109 : vector<4x16x6xf32>
    %111 = vector.extract_strided_slice %1 {offsets = [0, 0, 6], sizes = [4, 16, 6], strides = [1, 1, 1]} : vector<4x16x16xf32> to vector<4x16x6xf32>
    %cst_32 = arith.constant 0.213005543 : f32
    %112 = vector.broadcast %cst_32 : f32 to vector<4x16x6xf32>
    %113 = arith.mulf %112, %111 : vector<4x16x6xf32>
    %114 = arith.addf %110, %113 : vector<4x16x6xf32>
    %115 = vector.extract_strided_slice %1 {offsets = [0, 0, 7], sizes = [4, 16, 6], strides = [1, 1, 1]} : vector<4x16x16xf32> to vector<4x16x6xf32>
    %cst_33 = arith.constant 0.109360687 : f32
    %116 = vector.broadcast %cst_33 : f32 to vector<4x16x6xf32>
    %117 = arith.mulf %116, %115 : vector<4x16x6xf32>
    %118 = arith.addf %114, %117 : vector<4x16x6xf32>
    %119 = vector.extract_strided_slice %1 {offsets = [0, 0, 8], sizes = [4, 16, 6], strides = [1, 1, 1]} : vector<4x16x16xf32> to vector<4x16x6xf32>
    %cst_34 = arith.constant 0.0360007733 : f32
    %120 = vector.broadcast %cst_34 : f32 to vector<4x16x6xf32>
    %121 = arith.mulf %120, %119 : vector<4x16x6xf32>
    %122 = arith.addf %118, %121 : vector<4x16x6xf32>
    %123 = vector.extract_strided_slice %1 {offsets = [0, 0, 9], sizes = [4, 16, 6], strides = [1, 1, 1]} : vector<4x16x16xf32> to vector<4x16x6xf32>
    %cst_35 = arith.constant 0.00759875821 : f32
    %124 = vector.broadcast %cst_35 : f32 to vector<4x16x6xf32>
    %125 = arith.mulf %124, %123 : vector<4x16x6xf32>
    %126 = arith.addf %122, %125 : vector<4x16x6xf32>
    %127 = vector.extract_strided_slice %1 {offsets = [0, 0, 10], sizes = [4, 16, 6], strides = [1, 1, 1]} : vector<4x16x16xf32> to vector<4x16x6xf32>
    %cst_36 = arith.constant 0.00102838012 : f32
    %128 = vector.broadcast %cst_36 : f32 to vector<4x16x6xf32>
    %129 = arith.mulf %128, %127 : vector<4x16x6xf32>
    %130 = arith.addf %126, %129 : vector<4x16x6xf32>
    %131 = vector.extract_strided_slice %130 {offsets = [0, 0, 0], sizes = [4, 6, 6], strides = [1, 1, 1]} : vector<4x16x6xf32> to vector<4x6x6xf32>
    %cst_37 = arith.constant 0.00102838012 : f32
    %132 = vector.broadcast %cst_37 : f32 to vector<4x6x6xf32>
    %133 = arith.mulf %132, %131 : vector<4x6x6xf32>
    %134 = vector.extract_strided_slice %130 {offsets = [0, 1, 0], sizes = [4, 6, 6], strides = [1, 1, 1]} : vector<4x16x6xf32> to vector<4x6x6xf32>
    %cst_38 = arith.constant 0.00759875821 : f32
    %135 = vector.broadcast %cst_38 : f32 to vector<4x6x6xf32>
    %136 = arith.mulf %135, %134 : vector<4x6x6xf32>
    %137 = arith.addf %133, %136 : vector<4x6x6xf32>
    %138 = vector.extract_strided_slice %130 {offsets = [0, 2, 0], sizes = [4, 6, 6], strides = [1, 1, 1]} : vector<4x16x6xf32> to vector<4x6x6xf32>
    %cst_39 = arith.constant 0.0360007733 : f32
    %139 = vector.broadcast %cst_39 : f32 to vector<4x6x6xf32>
    %140 = arith.mulf %139, %138 : vector<4x6x6xf32>
    %141 = arith.addf %137, %140 : vector<4x6x6xf32>
    %142 = vector.extract_strided_slice %130 {offsets = [0, 3, 0], sizes = [4, 6, 6], strides = [1, 1, 1]} : vector<4x16x6xf32> to vector<4x6x6xf32>
    %cst_40 = arith.constant 0.109360687 : f32
    %143 = vector.broadcast %cst_40 : f32 to vector<4x6x6xf32>
    %144 = arith.mulf %143, %142 : vector<4x6x6xf32>
    %145 = arith.addf %141, %144 : vector<4x6x6xf32>
    %146 = vector.extract_strided_slice %130 {offsets = [0, 4, 0], sizes = [4, 6, 6], strides = [1, 1, 1]} : vector<4x16x6xf32> to vector<4x6x6xf32>
    %cst_41 = arith.constant 0.213005543 : f32
    %147 = vector.broadcast %cst_41 : f32 to vector<4x6x6xf32>
    %148 = arith.mulf %147, %146 : vector<4x6x6xf32>
    %149 = arith.addf %145, %148 : vector<4x6x6xf32>
    %150 = vector.extract_strided_slice %130 {offsets = [0, 5, 0], sizes = [4, 6, 6], strides = [1, 1, 1]} : vector<4x16x6xf32> to vector<4x6x6xf32>
    %cst_42 = arith.constant 0.266011715 : f32
    %151 = vector.broadcast %cst_42 : f32 to vector<4x6x6xf32>
    %152 = arith.mulf %151, %150 : vector<4x6x6xf32>
    %153 = arith.addf %149, %152 : vector<4x6x6xf32>
    %154 = vector.extract_strided_slice %130 {offsets = [0, 6, 0], sizes = [4, 6, 6], strides = [1, 1, 1]} : vector<4x16x6xf32> to vector<4x6x6xf32>
    %cst_43 = arith.constant 0.213005543 : f32
    %155 = vector.broadcast %cst_43 : f32 to vector<4x6x6xf32>
    %156 = arith.mulf %155, %154 : vector<4x6x6xf32>
    %157 = arith.addf %153, %156 : vector<4x6x6xf32>
    %158 = vector.extract_strided_slice %130 {offsets = [0, 7, 0], sizes = [4, 6, 6], strides = [1, 1, 1]} : vector<4x16x6xf32> to vector<4x6x6xf32>
    %cst_44 = arith.constant 0.109360687 : f32
    %159 = vector.broadcast %cst_44 : f32 to vector<4x6x6xf32>
    %160 = arith.mulf %159, %158 : vector<4x6x6xf32>
    %161 = arith.addf %157, %160 : vector<4x6x6xf32>
    %162 = vector.extract_strided_slice %130 {offsets = [0, 8, 0], sizes = [4, 6, 6], strides = [1, 1, 1]} : vector<4x16x6xf32> to vector<4x6x6xf32>
    %cst_45 = arith.constant 0.0360007733 : f32
    %163 = vector.broadcast %cst_45 : f32 to vector<4x6x6xf32>
    %164 = arith.mulf %163, %162 : vector<4x6x6xf32>
    %165 = arith.addf %161, %164 : vector<4x6x6xf32>
    %166 = vector.extract_strided_slice %130 {offsets = [0, 9, 0], sizes = [4, 6, 6], strides = [1, 1, 1]} : vector<4x16x6xf32> to vector<4x6x6xf32>
    %cst_46 = arith.constant 0.00759875821 : f32
    %167 = vector.broadcast %cst_46 : f32 to vector<4x6x6xf32>
    %168 = arith.mulf %167, %166 : vector<4x6x6xf32>
    %169 = arith.addf %165, %168 : vector<4x6x6xf32>
    %170 = vector.extract_strided_slice %130 {offsets = [0, 10, 0], sizes = [4, 6, 6], strides = [1, 1, 1]} : vector<4x16x6xf32> to vector<4x6x6xf32>
    %cst_47 = arith.constant 0.00102838012 : f32
    %171 = vector.broadcast %cst_47 : f32 to vector<4x6x6xf32>
    %172 = arith.mulf %171, %170 : vector<4x6x6xf32>
    %173 = arith.addf %169, %172 : vector<4x6x6xf32>
    %174 = arith.mulf %0, %0 : vector<4x16x16xf32>
    %175 = vector.extract_strided_slice %174 {offsets = [0, 0, 0], sizes = [4, 16, 6], strides = [1, 1, 1]} : vector<4x16x16xf32> to vector<4x16x6xf32>
    %cst_48 = arith.constant 0.00102838012 : f32
    %176 = vector.broadcast %cst_48 : f32 to vector<4x16x6xf32>
    %177 = arith.mulf %176, %175 : vector<4x16x6xf32>
    %178 = vector.extract_strided_slice %174 {offsets = [0, 0, 1], sizes = [4, 16, 6], strides = [1, 1, 1]} : vector<4x16x16xf32> to vector<4x16x6xf32>
    %cst_49 = arith.constant 0.00759875821 : f32
    %179 = vector.broadcast %cst_49 : f32 to vector<4x16x6xf32>
    %180 = arith.mulf %179, %178 : vector<4x16x6xf32>
    %181 = arith.addf %177, %180 : vector<4x16x6xf32>
    %182 = vector.extract_strided_slice %174 {offsets = [0, 0, 2], sizes = [4, 16, 6], strides = [1, 1, 1]} : vector<4x16x16xf32> to vector<4x16x6xf32>
    %cst_50 = arith.constant 0.0360007733 : f32
    %183 = vector.broadcast %cst_50 : f32 to vector<4x16x6xf32>
    %184 = arith.mulf %183, %182 : vector<4x16x6xf32>
    %185 = arith.addf %181, %184 : vector<4x16x6xf32>
    %186 = vector.extract_strided_slice %174 {offsets = [0, 0, 3], sizes = [4, 16, 6], strides = [1, 1, 1]} : vector<4x16x16xf32> to vector<4x16x6xf32>
    %cst_51 = arith.constant 0.109360687 : f32
    %187 = vector.broadcast %cst_51 : f32 to vector<4x16x6xf32>
    %188 = arith.mulf %187, %186 : vector<4x16x6xf32>
    %189 = arith.addf %185, %188 : vector<4x16x6xf32>
    %190 = vector.extract_strided_slice %174 {offsets = [0, 0, 4], sizes = [4, 16, 6], strides = [1, 1, 1]} : vector<4x16x16xf32> to vector<4x16x6xf32>
    %cst_52 = arith.constant 0.213005543 : f32
    %191 = vector.broadcast %cst_52 : f32 to vector<4x16x6xf32>
    %192 = arith.mulf %191, %190 : vector<4x16x6xf32>
    %193 = arith.addf %189, %192 : vector<4x16x6xf32>
    %194 = vector.extract_strided_slice %174 {offsets = [0, 0, 5], sizes = [4, 16, 6], strides = [1, 1, 1]} : vector<4x16x16xf32> to vector<4x16x6xf32>
    %cst_53 = arith.constant 0.266011715 : f32
    %195 = vector.broadcast %cst_53 : f32 to vector<4x16x6xf32>
    %196 = arith.mulf %195, %194 : vector<4x16x6xf32>
    %197 = arith.addf %193, %196 : vector<4x16x6xf32>
    %198 = vector.extract_strided_slice %174 {offsets = [0, 0, 6], sizes = [4, 16, 6], strides = [1, 1, 1]} : vector<4x16x16xf32> to vector<4x16x6xf32>
    %cst_54 = arith.constant 0.213005543 : f32
    %199 = vector.broadcast %cst_54 : f32 to vector<4x16x6xf32>
    %200 = arith.mulf %199, %198 : vector<4x16x6xf32>
    %201 = arith.addf %197, %200 : vector<4x16x6xf32>
    %202 = vector.extract_strided_slice %174 {offsets = [0, 0, 7], sizes = [4, 16, 6], strides = [1, 1, 1]} : vector<4x16x16xf32> to vector<4x16x6xf32>
    %cst_55 = arith.constant 0.109360687 : f32
    %203 = vector.broadcast %cst_55 : f32 to vector<4x16x6xf32>
    %204 = arith.mulf %203, %202 : vector<4x16x6xf32>
    %205 = arith.addf %201, %204 : vector<4x16x6xf32>
    %206 = vector.extract_strided_slice %174 {offsets = [0, 0, 8], sizes = [4, 16, 6], strides = [1, 1, 1]} : vector<4x16x16xf32> to vector<4x16x6xf32>
    %cst_56 = arith.constant 0.0360007733 : f32
    %207 = vector.broadcast %cst_56 : f32 to vector<4x16x6xf32>
    %208 = arith.mulf %207, %206 : vector<4x16x6xf32>
    %209 = arith.addf %205, %208 : vector<4x16x6xf32>
    %210 = vector.extract_strided_slice %174 {offsets = [0, 0, 9], sizes = [4, 16, 6], strides = [1, 1, 1]} : vector<4x16x16xf32> to vector<4x16x6xf32>
    %cst_57 = arith.constant 0.00759875821 : f32
    %211 = vector.broadcast %cst_57 : f32 to vector<4x16x6xf32>
    %212 = arith.mulf %211, %210 : vector<4x16x6xf32>
    %213 = arith.addf %209, %212 : vector<4x16x6xf32>
    %214 = vector.extract_strided_slice %174 {offsets = [0, 0, 10], sizes = [4, 16, 6], strides = [1, 1, 1]} : vector<4x16x16xf32> to vector<4x16x6xf32>
    %cst_58 = arith.constant 0.00102838012 : f32
    %215 = vector.broadcast %cst_58 : f32 to vector<4x16x6xf32>
    %216 = arith.mulf %215, %214 : vector<4x16x6xf32>
    %217 = arith.addf %213, %216 : vector<4x16x6xf32>
    %218 = vector.extract_strided_slice %217 {offsets = [0, 0, 0], sizes = [4, 6, 6], strides = [1, 1, 1]} : vector<4x16x6xf32> to vector<4x6x6xf32>
    %cst_59 = arith.constant 0.00102838012 : f32
    %219 = vector.broadcast %cst_59 : f32 to vector<4x6x6xf32>
    %220 = arith.mulf %219, %218 : vector<4x6x6xf32>
    %221 = vector.extract_strided_slice %217 {offsets = [0, 1, 0], sizes = [4, 6, 6], strides = [1, 1, 1]} : vector<4x16x6xf32> to vector<4x6x6xf32>
    %cst_60 = arith.constant 0.00759875821 : f32
    %222 = vector.broadcast %cst_60 : f32 to vector<4x6x6xf32>
    %223 = arith.mulf %222, %221 : vector<4x6x6xf32>
    %224 = arith.addf %220, %223 : vector<4x6x6xf32>
    %225 = vector.extract_strided_slice %217 {offsets = [0, 2, 0], sizes = [4, 6, 6], strides = [1, 1, 1]} : vector<4x16x6xf32> to vector<4x6x6xf32>
    %cst_61 = arith.constant 0.0360007733 : f32
    %226 = vector.broadcast %cst_61 : f32 to vector<4x6x6xf32>
    %227 = arith.mulf %226, %225 : vector<4x6x6xf32>
    %228 = arith.addf %224, %227 : vector<4x6x6xf32>
    %229 = vector.extract_strided_slice %217 {offsets = [0, 3, 0], sizes = [4, 6, 6], strides = [1, 1, 1]} : vector<4x16x6xf32> to vector<4x6x6xf32>
    %cst_62 = arith.constant 0.109360687 : f32
    %230 = vector.broadcast %cst_62 : f32 to vector<4x6x6xf32>
    %231 = arith.mulf %230, %229 : vector<4x6x6xf32>
    %232 = arith.addf %228, %231 : vector<4x6x6xf32>
    %233 = vector.extract_strided_slice %217 {offsets = [0, 4, 0], sizes = [4, 6, 6], strides = [1, 1, 1]} : vector<4x16x6xf32> to vector<4x6x6xf32>
    %cst_63 = arith.constant 0.213005543 : f32
    %234 = vector.broadcast %cst_63 : f32 to vector<4x6x6xf32>
    %235 = arith.mulf %234, %233 : vector<4x6x6xf32>
    %236 = arith.addf %232, %235 : vector<4x6x6xf32>
    %237 = vector.extract_strided_slice %217 {offsets = [0, 5, 0], sizes = [4, 6, 6], strides = [1, 1, 1]} : vector<4x16x6xf32> to vector<4x6x6xf32>
    %cst_64 = arith.constant 0.266011715 : f32
    %238 = vector.broadcast %cst_64 : f32 to vector<4x6x6xf32>
    %239 = arith.mulf %238, %237 : vector<4x6x6xf32>
    %240 = arith.addf %236, %239 : vector<4x6x6xf32>
    %241 = vector.extract_strided_slice %217 {offsets = [0, 6, 0], sizes = [4, 6, 6], strides = [1, 1, 1]} : vector<4x16x6xf32> to vector<4x6x6xf32>
    %cst_65 = arith.constant 0.213005543 : f32
    %242 = vector.broadcast %cst_65 : f32 to vector<4x6x6xf32>
    %243 = arith.mulf %242, %241 : vector<4x6x6xf32>
    %244 = arith.addf %240, %243 : vector<4x6x6xf32>
    %245 = vector.extract_strided_slice %217 {offsets = [0, 7, 0], sizes = [4, 6, 6], strides = [1, 1, 1]} : vector<4x16x6xf32> to vector<4x6x6xf32>
    %cst_66 = arith.constant 0.109360687 : f32
    %246 = vector.broadcast %cst_66 : f32 to vector<4x6x6xf32>
    %247 = arith.mulf %246, %245 : vector<4x6x6xf32>
    %248 = arith.addf %244, %247 : vector<4x6x6xf32>
    %249 = vector.extract_strided_slice %217 {offsets = [0, 8, 0], sizes = [4, 6, 6], strides = [1, 1, 1]} : vector<4x16x6xf32> to vector<4x6x6xf32>
    %cst_67 = arith.constant 0.0360007733 : f32
    %250 = vector.broadcast %cst_67 : f32 to vector<4x6x6xf32>
    %251 = arith.mulf %250, %249 : vector<4x6x6xf32>
    %252 = arith.addf %248, %251 : vector<4x6x6xf32>
    %253 = vector.extract_strided_slice %217 {offsets = [0, 9, 0], sizes = [4, 6, 6], strides = [1, 1, 1]} : vector<4x16x6xf32> to vector<4x6x6xf32>
    %cst_68 = arith.constant 0.00759875821 : f32
    %254 = vector.broadcast %cst_68 : f32 to vector<4x6x6xf32>
    %255 = arith.mulf %254, %253 : vector<4x6x6xf32>
    %256 = arith.addf %252, %255 : vector<4x6x6xf32>
    %257 = vector.extract_strided_slice %217 {offsets = [0, 10, 0], sizes = [4, 6, 6], strides = [1, 1, 1]} : vector<4x16x6xf32> to vector<4x6x6xf32>
    %cst_69 = arith.constant 0.00102838012 : f32
    %258 = vector.broadcast %cst_69 : f32 to vector<4x6x6xf32>
    %259 = arith.mulf %258, %257 : vector<4x6x6xf32>
    %260 = arith.addf %256, %259 : vector<4x6x6xf32>
    %261 = arith.mulf %1, %1 : vector<4x16x16xf32>
    %262 = vector.extract_strided_slice %261 {offsets = [0, 0, 0], sizes = [4, 16, 6], strides = [1, 1, 1]} : vector<4x16x16xf32> to vector<4x16x6xf32>
    %cst_70 = arith.constant 0.00102838012 : f32
    %263 = vector.broadcast %cst_70 : f32 to vector<4x16x6xf32>
    %264 = arith.mulf %263, %262 : vector<4x16x6xf32>
    %265 = vector.extract_strided_slice %261 {offsets = [0, 0, 1], sizes = [4, 16, 6], strides = [1, 1, 1]} : vector<4x16x16xf32> to vector<4x16x6xf32>
    %cst_71 = arith.constant 0.00759875821 : f32
    %266 = vector.broadcast %cst_71 : f32 to vector<4x16x6xf32>
    %267 = arith.mulf %266, %265 : vector<4x16x6xf32>
    %268 = arith.addf %264, %267 : vector<4x16x6xf32>
    %269 = vector.extract_strided_slice %261 {offsets = [0, 0, 2], sizes = [4, 16, 6], strides = [1, 1, 1]} : vector<4x16x16xf32> to vector<4x16x6xf32>
    %cst_72 = arith.constant 0.0360007733 : f32
    %270 = vector.broadcast %cst_72 : f32 to vector<4x16x6xf32>
    %271 = arith.mulf %270, %269 : vector<4x16x6xf32>
    %272 = arith.addf %268, %271 : vector<4x16x6xf32>
    %273 = vector.extract_strided_slice %261 {offsets = [0, 0, 3], sizes = [4, 16, 6], strides = [1, 1, 1]} : vector<4x16x16xf32> to vector<4x16x6xf32>
    %cst_73 = arith.constant 0.109360687 : f32
    %274 = vector.broadcast %cst_73 : f32 to vector<4x16x6xf32>
    %275 = arith.mulf %274, %273 : vector<4x16x6xf32>
    %276 = arith.addf %272, %275 : vector<4x16x6xf32>
    %277 = vector.extract_strided_slice %261 {offsets = [0, 0, 4], sizes = [4, 16, 6], strides = [1, 1, 1]} : vector<4x16x16xf32> to vector<4x16x6xf32>
    %cst_74 = arith.constant 0.213005543 : f32
    %278 = vector.broadcast %cst_74 : f32 to vector<4x16x6xf32>
    %279 = arith.mulf %278, %277 : vector<4x16x6xf32>
    %280 = arith.addf %276, %279 : vector<4x16x6xf32>
    %281 = vector.extract_strided_slice %261 {offsets = [0, 0, 5], sizes = [4, 16, 6], strides = [1, 1, 1]} : vector<4x16x16xf32> to vector<4x16x6xf32>
    %cst_75 = arith.constant 0.266011715 : f32
    %282 = vector.broadcast %cst_75 : f32 to vector<4x16x6xf32>
    %283 = arith.mulf %282, %281 : vector<4x16x6xf32>
    %284 = arith.addf %280, %283 : vector<4x16x6xf32>
    %285 = vector.extract_strided_slice %261 {offsets = [0, 0, 6], sizes = [4, 16, 6], strides = [1, 1, 1]} : vector<4x16x16xf32> to vector<4x16x6xf32>
    %cst_76 = arith.constant 0.213005543 : f32
    %286 = vector.broadcast %cst_76 : f32 to vector<4x16x6xf32>
    %287 = arith.mulf %286, %285 : vector<4x16x6xf32>
    %288 = arith.addf %284, %287 : vector<4x16x6xf32>
    %289 = vector.extract_strided_slice %261 {offsets = [0, 0, 7], sizes = [4, 16, 6], strides = [1, 1, 1]} : vector<4x16x16xf32> to vector<4x16x6xf32>
    %cst_77 = arith.constant 0.109360687 : f32
    %290 = vector.broadcast %cst_77 : f32 to vector<4x16x6xf32>
    %291 = arith.mulf %290, %289 : vector<4x16x6xf32>
    %292 = arith.addf %288, %291 : vector<4x16x6xf32>
    %293 = vector.extract_strided_slice %261 {offsets = [0, 0, 8], sizes = [4, 16, 6], strides = [1, 1, 1]} : vector<4x16x16xf32> to vector<4x16x6xf32>
    %cst_78 = arith.constant 0.0360007733 : f32
    %294 = vector.broadcast %cst_78 : f32 to vector<4x16x6xf32>
    %295 = arith.mulf %294, %293 : vector<4x16x6xf32>
    %296 = arith.addf %292, %295 : vector<4x16x6xf32>
    %297 = vector.extract_strided_slice %261 {offsets = [0, 0, 9], sizes = [4, 16, 6], strides = [1, 1, 1]} : vector<4x16x16xf32> to vector<4x16x6xf32>
    %cst_79 = arith.constant 0.00759875821 : f32
    %298 = vector.broadcast %cst_79 : f32 to vector<4x16x6xf32>
    %299 = arith.mulf %298, %297 : vector<4x16x6xf32>
    %300 = arith.addf %296, %299 : vector<4x16x6xf32>
    %301 = vector.extract_strided_slice %261 {offsets = [0, 0, 10], sizes = [4, 16, 6], strides = [1, 1, 1]} : vector<4x16x16xf32> to vector<4x16x6xf32>
    %cst_80 = arith.constant 0.00102838012 : f32
    %302 = vector.broadcast %cst_80 : f32 to vector<4x16x6xf32>
    %303 = arith.mulf %302, %301 : vector<4x16x6xf32>
    %304 = arith.addf %300, %303 : vector<4x16x6xf32>
    %305 = vector.extract_strided_slice %304 {offsets = [0, 0, 0], sizes = [4, 6, 6], strides = [1, 1, 1]} : vector<4x16x6xf32> to vector<4x6x6xf32>
    %cst_81 = arith.constant 0.00102838012 : f32
    %306 = vector.broadcast %cst_81 : f32 to vector<4x6x6xf32>
    %307 = arith.mulf %306, %305 : vector<4x6x6xf32>
    %308 = vector.extract_strided_slice %304 {offsets = [0, 1, 0], sizes = [4, 6, 6], strides = [1, 1, 1]} : vector<4x16x6xf32> to vector<4x6x6xf32>
    %cst_82 = arith.constant 0.00759875821 : f32
    %309 = vector.broadcast %cst_82 : f32 to vector<4x6x6xf32>
    %310 = arith.mulf %309, %308 : vector<4x6x6xf32>
    %311 = arith.addf %307, %310 : vector<4x6x6xf32>
    %312 = vector.extract_strided_slice %304 {offsets = [0, 2, 0], sizes = [4, 6, 6], strides = [1, 1, 1]} : vector<4x16x6xf32> to vector<4x6x6xf32>
    %cst_83 = arith.constant 0.0360007733 : f32
    %313 = vector.broadcast %cst_83 : f32 to vector<4x6x6xf32>
    %314 = arith.mulf %313, %312 : vector<4x6x6xf32>
    %315 = arith.addf %311, %314 : vector<4x6x6xf32>
    %316 = vector.extract_strided_slice %304 {offsets = [0, 3, 0], sizes = [4, 6, 6], strides = [1, 1, 1]} : vector<4x16x6xf32> to vector<4x6x6xf32>
    %cst_84 = arith.constant 0.109360687 : f32
    %317 = vector.broadcast %cst_84 : f32 to vector<4x6x6xf32>
    %318 = arith.mulf %317, %316 : vector<4x6x6xf32>
    %319 = arith.addf %315, %318 : vector<4x6x6xf32>
    %320 = vector.extract_strided_slice %304 {offsets = [0, 4, 0], sizes = [4, 6, 6], strides = [1, 1, 1]} : vector<4x16x6xf32> to vector<4x6x6xf32>
    %cst_85 = arith.constant 0.213005543 : f32
    %321 = vector.broadcast %cst_85 : f32 to vector<4x6x6xf32>
    %322 = arith.mulf %321, %320 : vector<4x6x6xf32>
    %323 = arith.addf %319, %322 : vector<4x6x6xf32>
    %324 = vector.extract_strided_slice %304 {offsets = [0, 5, 0], sizes = [4, 6, 6], strides = [1, 1, 1]} : vector<4x16x6xf32> to vector<4x6x6xf32>
    %cst_86 = arith.constant 0.266011715 : f32
    %325 = vector.broadcast %cst_86 : f32 to vector<4x6x6xf32>
    %326 = arith.mulf %325, %324 : vector<4x6x6xf32>
    %327 = arith.addf %323, %326 : vector<4x6x6xf32>
    %328 = vector.extract_strided_slice %304 {offsets = [0, 6, 0], sizes = [4, 6, 6], strides = [1, 1, 1]} : vector<4x16x6xf32> to vector<4x6x6xf32>
    %cst_87 = arith.constant 0.213005543 : f32
    %329 = vector.broadcast %cst_87 : f32 to vector<4x6x6xf32>
    %330 = arith.mulf %329, %328 : vector<4x6x6xf32>
    %331 = arith.addf %327, %330 : vector<4x6x6xf32>
    %332 = vector.extract_strided_slice %304 {offsets = [0, 7, 0], sizes = [4, 6, 6], strides = [1, 1, 1]} : vector<4x16x6xf32> to vector<4x6x6xf32>
    %cst_88 = arith.constant 0.109360687 : f32
    %333 = vector.broadcast %cst_88 : f32 to vector<4x6x6xf32>
    %334 = arith.mulf %333, %332 : vector<4x6x6xf32>
    %335 = arith.addf %331, %334 : vector<4x6x6xf32>
    %336 = vector.extract_strided_slice %304 {offsets = [0, 8, 0], sizes = [4, 6, 6], strides = [1, 1, 1]} : vector<4x16x6xf32> to vector<4x6x6xf32>
    %cst_89 = arith.constant 0.0360007733 : f32
    %337 = vector.broadcast %cst_89 : f32 to vector<4x6x6xf32>
    %338 = arith.mulf %337, %336 : vector<4x6x6xf32>
    %339 = arith.addf %335, %338 : vector<4x6x6xf32>
    %340 = vector.extract_strided_slice %304 {offsets = [0, 9, 0], sizes = [4, 6, 6], strides = [1, 1, 1]} : vector<4x16x6xf32> to vector<4x6x6xf32>
    %cst_90 = arith.constant 0.00759875821 : f32
    %341 = vector.broadcast %cst_90 : f32 to vector<4x6x6xf32>
    %342 = arith.mulf %341, %340 : vector<4x6x6xf32>
    %343 = arith.addf %339, %342 : vector<4x6x6xf32>
    %344 = vector.extract_strided_slice %304 {offsets = [0, 10, 0], sizes = [4, 6, 6], strides = [1, 1, 1]} : vector<4x16x6xf32> to vector<4x6x6xf32>
    %cst_91 = arith.constant 0.00102838012 : f32
    %345 = vector.broadcast %cst_91 : f32 to vector<4x6x6xf32>
    %346 = arith.mulf %345, %344 : vector<4x6x6xf32>
    %347 = arith.addf %343, %346 : vector<4x6x6xf32>
    %348 = arith.mulf %0, %1 : vector<4x16x16xf32>
    %349 = vector.extract_strided_slice %348 {offsets = [0, 0, 0], sizes = [4, 16, 6], strides = [1, 1, 1]} : vector<4x16x16xf32> to vector<4x16x6xf32>
    %cst_92 = arith.constant 0.00102838012 : f32
    %350 = vector.broadcast %cst_92 : f32 to vector<4x16x6xf32>
    %351 = arith.mulf %350, %349 : vector<4x16x6xf32>
    %352 = vector.extract_strided_slice %348 {offsets = [0, 0, 1], sizes = [4, 16, 6], strides = [1, 1, 1]} : vector<4x16x16xf32> to vector<4x16x6xf32>
    %cst_93 = arith.constant 0.00759875821 : f32
    %353 = vector.broadcast %cst_93 : f32 to vector<4x16x6xf32>
    %354 = arith.mulf %353, %352 : vector<4x16x6xf32>
    %355 = arith.addf %351, %354 : vector<4x16x6xf32>
    %356 = vector.extract_strided_slice %348 {offsets = [0, 0, 2], sizes = [4, 16, 6], strides = [1, 1, 1]} : vector<4x16x16xf32> to vector<4x16x6xf32>
    %cst_94 = arith.constant 0.0360007733 : f32
    %357 = vector.broadcast %cst_94 : f32 to vector<4x16x6xf32>
    %358 = arith.mulf %357, %356 : vector<4x16x6xf32>
    %359 = arith.addf %355, %358 : vector<4x16x6xf32>
    %360 = vector.extract_strided_slice %348 {offsets = [0, 0, 3], sizes = [4, 16, 6], strides = [1, 1, 1]} : vector<4x16x16xf32> to vector<4x16x6xf32>
    %cst_95 = arith.constant 0.109360687 : f32
    %361 = vector.broadcast %cst_95 : f32 to vector<4x16x6xf32>
    %362 = arith.mulf %361, %360 : vector<4x16x6xf32>
    %363 = arith.addf %359, %362 : vector<4x16x6xf32>
    %364 = vector.extract_strided_slice %348 {offsets = [0, 0, 4], sizes = [4, 16, 6], strides = [1, 1, 1]} : vector<4x16x16xf32> to vector<4x16x6xf32>
    %cst_96 = arith.constant 0.213005543 : f32
    %365 = vector.broadcast %cst_96 : f32 to vector<4x16x6xf32>
    %366 = arith.mulf %365, %364 : vector<4x16x6xf32>
    %367 = arith.addf %363, %366 : vector<4x16x6xf32>
    %368 = vector.extract_strided_slice %348 {offsets = [0, 0, 5], sizes = [4, 16, 6], strides = [1, 1, 1]} : vector<4x16x16xf32> to vector<4x16x6xf32>
    %cst_97 = arith.constant 0.266011715 : f32
    %369 = vector.broadcast %cst_97 : f32 to vector<4x16x6xf32>
    %370 = arith.mulf %369, %368 : vector<4x16x6xf32>
    %371 = arith.addf %367, %370 : vector<4x16x6xf32>
    %372 = vector.extract_strided_slice %348 {offsets = [0, 0, 6], sizes = [4, 16, 6], strides = [1, 1, 1]} : vector<4x16x16xf32> to vector<4x16x6xf32>
    %cst_98 = arith.constant 0.213005543 : f32
    %373 = vector.broadcast %cst_98 : f32 to vector<4x16x6xf32>
    %374 = arith.mulf %373, %372 : vector<4x16x6xf32>
    %375 = arith.addf %371, %374 : vector<4x16x6xf32>
    %376 = vector.extract_strided_slice %348 {offsets = [0, 0, 7], sizes = [4, 16, 6], strides = [1, 1, 1]} : vector<4x16x16xf32> to vector<4x16x6xf32>
    %cst_99 = arith.constant 0.109360687 : f32
    %377 = vector.broadcast %cst_99 : f32 to vector<4x16x6xf32>
    %378 = arith.mulf %377, %376 : vector<4x16x6xf32>
    %379 = arith.addf %375, %378 : vector<4x16x6xf32>
    %380 = vector.extract_strided_slice %348 {offsets = [0, 0, 8], sizes = [4, 16, 6], strides = [1, 1, 1]} : vector<4x16x16xf32> to vector<4x16x6xf32>
    %cst_100 = arith.constant 0.0360007733 : f32
    %381 = vector.broadcast %cst_100 : f32 to vector<4x16x6xf32>
    %382 = arith.mulf %381, %380 : vector<4x16x6xf32>
    %383 = arith.addf %379, %382 : vector<4x16x6xf32>
    %384 = vector.extract_strided_slice %348 {offsets = [0, 0, 9], sizes = [4, 16, 6], strides = [1, 1, 1]} : vector<4x16x16xf32> to vector<4x16x6xf32>
    %cst_101 = arith.constant 0.00759875821 : f32
    %385 = vector.broadcast %cst_101 : f32 to vector<4x16x6xf32>
    %386 = arith.mulf %385, %384 : vector<4x16x6xf32>
    %387 = arith.addf %383, %386 : vector<4x16x6xf32>
    %388 = vector.extract_strided_slice %348 {offsets = [0, 0, 10], sizes = [4, 16, 6], strides = [1, 1, 1]} : vector<4x16x16xf32> to vector<4x16x6xf32>
    %cst_102 = arith.constant 0.00102838012 : f32
    %389 = vector.broadcast %cst_102 : f32 to vector<4x16x6xf32>
    %390 = arith.mulf %389, %388 : vector<4x16x6xf32>
    %391 = arith.addf %387, %390 : vector<4x16x6xf32>
    %392 = vector.extract_strided_slice %391 {offsets = [0, 0, 0], sizes = [4, 6, 6], strides = [1, 1, 1]} : vector<4x16x6xf32> to vector<4x6x6xf32>
    %cst_103 = arith.constant 0.00102838012 : f32
    %393 = vector.broadcast %cst_103 : f32 to vector<4x6x6xf32>
    %394 = arith.mulf %393, %392 : vector<4x6x6xf32>
    %395 = vector.extract_strided_slice %391 {offsets = [0, 1, 0], sizes = [4, 6, 6], strides = [1, 1, 1]} : vector<4x16x6xf32> to vector<4x6x6xf32>
    %cst_104 = arith.constant 0.00759875821 : f32
    %396 = vector.broadcast %cst_104 : f32 to vector<4x6x6xf32>
    %397 = arith.mulf %396, %395 : vector<4x6x6xf32>
    %398 = arith.addf %394, %397 : vector<4x6x6xf32>
    %399 = vector.extract_strided_slice %391 {offsets = [0, 2, 0], sizes = [4, 6, 6], strides = [1, 1, 1]} : vector<4x16x6xf32> to vector<4x6x6xf32>
    %cst_105 = arith.constant 0.0360007733 : f32
    %400 = vector.broadcast %cst_105 : f32 to vector<4x6x6xf32>
    %401 = arith.mulf %400, %399 : vector<4x6x6xf32>
    %402 = arith.addf %398, %401 : vector<4x6x6xf32>
    %403 = vector.extract_strided_slice %391 {offsets = [0, 3, 0], sizes = [4, 6, 6], strides = [1, 1, 1]} : vector<4x16x6xf32> to vector<4x6x6xf32>
    %cst_106 = arith.constant 0.109360687 : f32
    %404 = vector.broadcast %cst_106 : f32 to vector<4x6x6xf32>
    %405 = arith.mulf %404, %403 : vector<4x6x6xf32>
    %406 = arith.addf %402, %405 : vector<4x6x6xf32>
    %407 = vector.extract_strided_slice %391 {offsets = [0, 4, 0], sizes = [4, 6, 6], strides = [1, 1, 1]} : vector<4x16x6xf32> to vector<4x6x6xf32>
    %cst_107 = arith.constant 0.213005543 : f32
    %408 = vector.broadcast %cst_107 : f32 to vector<4x6x6xf32>
    %409 = arith.mulf %408, %407 : vector<4x6x6xf32>
    %410 = arith.addf %406, %409 : vector<4x6x6xf32>
    %411 = vector.extract_strided_slice %391 {offsets = [0, 5, 0], sizes = [4, 6, 6], strides = [1, 1, 1]} : vector<4x16x6xf32> to vector<4x6x6xf32>
    %cst_108 = arith.constant 0.266011715 : f32
    %412 = vector.broadcast %cst_108 : f32 to vector<4x6x6xf32>
    %413 = arith.mulf %412, %411 : vector<4x6x6xf32>
    %414 = arith.addf %410, %413 : vector<4x6x6xf32>
    %415 = vector.extract_strided_slice %391 {offsets = [0, 6, 0], sizes = [4, 6, 6], strides = [1, 1, 1]} : vector<4x16x6xf32> to vector<4x6x6xf32>
    %cst_109 = arith.constant 0.213005543 : f32
    %416 = vector.broadcast %cst_109 : f32 to vector<4x6x6xf32>
    %417 = arith.mulf %416, %415 : vector<4x6x6xf32>
    %418 = arith.addf %414, %417 : vector<4x6x6xf32>
    %419 = vector.extract_strided_slice %391 {offsets = [0, 7, 0], sizes = [4, 6, 6], strides = [1, 1, 1]} : vector<4x16x6xf32> to vector<4x6x6xf32>
    %cst_110 = arith.constant 0.109360687 : f32
    %420 = vector.broadcast %cst_110 : f32 to vector<4x6x6xf32>
    %421 = arith.mulf %420, %419 : vector<4x6x6xf32>
    %422 = arith.addf %418, %421 : vector<4x6x6xf32>
    %423 = vector.extract_strided_slice %391 {offsets = [0, 8, 0], sizes = [4, 6, 6], strides = [1, 1, 1]} : vector<4x16x6xf32> to vector<4x6x6xf32>
    %cst_111 = arith.constant 0.0360007733 : f32
    %424 = vector.broadcast %cst_111 : f32 to vector<4x6x6xf32>
    %425 = arith.mulf %424, %423 : vector<4x6x6xf32>
    %426 = arith.addf %422, %425 : vector<4x6x6xf32>
    %427 = vector.extract_strided_slice %391 {offsets = [0, 9, 0], sizes = [4, 6, 6], strides = [1, 1, 1]} : vector<4x16x6xf32> to vector<4x6x6xf32>
    %cst_112 = arith.constant 0.00759875821 : f32
    %428 = vector.broadcast %cst_112 : f32 to vector<4x6x6xf32>
    %429 = arith.mulf %428, %427 : vector<4x6x6xf32>
    %430 = arith.addf %426, %429 : vector<4x6x6xf32>
    %431 = vector.extract_strided_slice %391 {offsets = [0, 10, 0], sizes = [4, 6, 6], strides = [1, 1, 1]} : vector<4x16x6xf32> to vector<4x6x6xf32>
    %cst_113 = arith.constant 0.00102838012 : f32
    %432 = vector.broadcast %cst_113 : f32 to vector<4x6x6xf32>
    %433 = arith.mulf %432, %431 : vector<4x6x6xf32>
    %434 = arith.addf %430, %433 : vector<4x6x6xf32>
    %435 = arith.mulf %87, %87 : vector<4x6x6xf32>
    %436 = arith.mulf %173, %173 : vector<4x6x6xf32>
    %437 = arith.mulf %87, %173 : vector<4x6x6xf32>
    %438 = arith.subf %260, %435 : vector<4x6x6xf32>
    %439 = arith.subf %347, %436 : vector<4x6x6xf32>
    %440 = arith.subf %434, %437 : vector<4x6x6xf32>
    %cst_114 = arith.constant 2.000000e+00 : f32
    %441 = vector.broadcast %cst_114 : f32 to vector<4x6x6xf32>
    %442 = arith.mulf %441, %437 : vector<4x6x6xf32>
    %cst_115 = arith.constant 9.99999974E-5 : f32
    %443 = vector.broadcast %cst_115 : f32 to vector<4x6x6xf32>
    %444 = arith.addf %442, %443 : vector<4x6x6xf32>
    %cst_116 = arith.constant 2.000000e+00 : f32
    %445 = vector.broadcast %cst_116 : f32 to vector<4x6x6xf32>
    %446 = arith.mulf %445, %440 : vector<4x6x6xf32>
    %cst_117 = arith.constant 8.99999984E-4 : f32
    %447 = vector.broadcast %cst_117 : f32 to vector<4x6x6xf32>
    %448 = arith.addf %446, %447 : vector<4x6x6xf32>
    %449 = arith.mulf %444, %448 : vector<4x6x6xf32>
    %450 = arith.addf %435, %436 : vector<4x6x6xf32>
    %cst_118 = arith.constant 9.99999974E-5 : f32
    %451 = vector.broadcast %cst_118 : f32 to vector<4x6x6xf32>
    %452 = arith.addf %450, %451 : vector<4x6x6xf32>
    %453 = arith.addf %438, %439 : vector<4x6x6xf32>
    %cst_119 = arith.constant 8.99999984E-4 : f32
    %454 = vector.broadcast %cst_119 : f32 to vector<4x6x6xf32>
    %455 = arith.addf %453, %454 : vector<4x6x6xf32>
    %456 = arith.mulf %452, %455 : vector<4x6x6xf32>
    %457 = tpu.reciprocal %456 {approx = true} : vector<4x6x6xf32> -> vector<4x6x6xf32>
    %458 = arith.mulf %456, %457 : vector<4x6x6xf32>
    %cst_120 = arith.constant 2.000000e+00 : f32
    %459 = vector.broadcast %cst_120 : f32 to vector<4x6x6xf32>
    %460 = arith.subf %459, %458 : vector<4x6x6xf32>
    %461 = arith.mulf %457, %460 : vector<4x6x6xf32>
    %462 = arith.mulf %449, %461 : vector<4x6x6xf32>
    %cst_121 = arith.constant dense<0.000000e+00> : vector<6x6xf32>
    %463 = vector.multi_reduction <add>, %462, %cst_121 [0] : vector<4x6x6xf32> to vector<6x6xf32>
    %464 = vector.shape_cast %463 : vector<6x6xf32> to vector<1x6x6xf32>
    %cst_122 = arith.constant dense<0.000000e+00> : vector<1xf32>
    %465 = vector.multi_reduction <add>, %464, %cst_122 [1, 2] : vector<1x6x6xf32> to vector<1xf32>
    %466 = vector.shape_cast %465 : vector<1xf32> to vector<1x1x1xf32>
    %467 = vector.extract %466[0, 0, 0] : f32 from vector<1x1x1xf32>
    %468 = vector.broadcast %467 : f32 to vector<1x1xf32>
    %c0_123 = arith.constant 0 : index
    %c0_124 = arith.constant 0 : index
    %c0_125 = arith.constant 0 : index
    %469 = vector.load %arg3[%c0_123, %c0_124, %c0_125] : memref<1x1x1xf32, #tpu.memory_space<vmem>>, vector<1x1x1xf32>
    %470 = vector.shape_cast %469 : vector<1x1x1xf32> to vector<1x1xf32>
    %471 = vector.shape_cast %468 : vector<1x1xf32> to vector<1x1x1xf32>
    tpu.vector_store %arg3[%c0_123, %c0_124, %c0_125], %471 {strides = array<i32>} : memref<1x1x1xf32, #tpu.memory_space<vmem>>, vector<1x1x1xf32>,
    return
  }
  func.func @transform_0(%arg0: i32) -> (i32, i32, i32) {
    %c0_i32 = arith.constant 0 : i32
    %c0_i32_0 = arith.constant 0 : i32
    %c0_i32_1 = arith.constant 0 : i32
    return %arg0, %c0_i32, %c0_i32_0 : i32, i32, i32
  }
  func.func @transform_1(%arg0: i32) -> (i32, i32, i32) {
    %c0_i32 = arith.constant 0 : i32
    %c0_i32_0 = arith.constant 0 : i32
    %c0_i32_1 = arith.constant 0 : i32
    return %arg0, %c0_i32, %c0_i32_0 : i32, i32, i32
  }
  func.func @transform_2(%arg0: i32) -> (i32, i32, i32) {
    %c0_i32 = arith.constant 0 : i32
    %c0_i32_0 = arith.constant 0 : i32
    %c0_i32_1 = arith.constant 0 : i32
    return %arg0, %c0_i32, %c0_i32_0 : i32, i32, i32
  }
}

</mosaic_0001>

<bundles_post_ra>
// kernel: tpu_custom_call.1
= control target key start
LH: loop header
LB: loop body
LE: loop exit
PB: predicated region body
PF: predicated region fallthrough
CT: control target
= control target key end

     0   :  { %7 = vsyncpa [#allocation3], 0  ;;  %s7132_s0 = inlined_call_operand.hbm [shape: f32[8,16,16], index: 0, kind: input, shape index: {}]   ;;  %s7133_s1 = inlined_call_operand.hbm [shape: f32[8,16,16], index: 1, kind: input, shape index: {}]   ;;  %s7134_s2 = inlined_call_operand.vmem [shape: f32[2,1,1], index: 2, kind: output, shape index: {}]  }
   0x1   :  { %9 = vsyncpa [#allocation3 + $0x1], 0 }
   0x2   :  { %10 = vsyncpa [#allocation5], 0 }
   0x3   :  { %12 = vsyncpa [#allocation5 + $0x1], 0  ;;  %s3955_s9 = smov 0   ;;  %s3957_s10 = smov 0  }
   0x4   :  { %s3959_s11 = smov 0   ;;  %s3961_s12 = smov 0  }
   0x5 LB: > { %s3974_s13 = sadd.s32 4294967295, %s3924_s12   ;;  %s3977_s14 = sadd.s32 1, %s3924_s12   ;;  %s3924_s12 = sphi %s3961_s12, %s7789_s12   ;;  %s3920_s11 = sphi %s3959_s11, %s7788_s11   ;;  %s3916_s10 = sphi %s3957_s10, %s7787_s10   ;;  %s3912_s9 = sphi %s3955_s9, %s7786_s9  }
   0x6   : > { %s22_s15 = ssub.s32 %s3924_s12, %s3977_s14  ;;  %s25_s16 = sadd.s32 1, %s3920_s11 }
   0x7   : > { %p23_p0 = scmp.eq.s32.totalorder %s22_s15, 0  ;;  %p32_p1 = scmp.ne.s32.totalorder %s3920_s11, %s3916_s10 }
   0x8   : > { %p33_p2 = scmp.eq.s32.totalorder %s3924_s12, 0  ;;  %p38_p3 = scmp.ne.s32.totalorder %s3916_s10, %s3912_s9 }
   0x9   : > { %s3987_s17 = scalar_select %p23_p0, %s3920_s11, %s25_s16  }
   0xa   : > { %p34_p4 = por %p33_p2, %p32_p1  ;;  %p39_p5 = scmp.eq.s32.totalorder %s3974_s13, 0 }
   0xb   : > { %p3749_p6 = scmp.lt.s32.totalorder %s3924_s12, 2  ;;  %s3996_s19 = sand.u32 1, %s3920_s11  }
   0xc   : > { %p3991_p7 = por %p39_p5, %p38_p3  ;;  %s3719_s20 = sshll.u32 %s3996_s19, 6 }
   0xd   : > { %s3733_s21 = sshll.u32 %s3924_s12, 10  ;;  %s118_s25 = scalar_lea.vmem [#allocation2], %s3719_s20 }
   0xe   : > { %s7289_s18 = scalar_select %p3991_p7, 1, 0 }
   0xf   : > { %s4005_s24 = scalar_lea.hbm %s7132_s0, %s3733_s21  ;;  %s126_s26 = sshll.u32 %s118_s25, 4  ;;  %s4009_s26 = int_to_ptr.vmem [resolvable:$true] %s126_s26 }
  0x10   : > { %p4011_p8 = pnand %p3749_p6, %p34_p4  ;;  %s115_s28 = scalar_lea.sflag [#allocation3], %s3996_s19 }
  0x11   : > { %s3826_s29 = scalar_lea.hbm %s4005_s24, 1024  ;;  %s3831_s4 = scalar_lea.hbm %s7132_s0, 2048 }
  0x12   : > { %p3827_p10 = scmp.ne.s32.totalorder %s4005_s24, %s3826_s29  ;;  %p3828_p11 = pneg %p4011_p8 }
  0x13   : > { %p3832_p0 = scmp.lt.u32.totalorder %s4005_s24, %s7132_s0  ;;  %p3833_p1 = scmp.lt.u32.totalorder %s3831_s4, %s3826_s29 }
  0x14   : > { %p3829_p12 = pnand %p3828_p11, %p3827_p10  ;;  %p3835_p3 = scmp.lt.u32.totalorder %s3826_s29, %s4005_s24 }
  0x15   : > { %p3834_p2 = por %p3833_p1, %p3832_p0 }
  0x16   : > { %p3830_p13 = pneg %p3829_p12 }
  0x17   : > { %p3836_p4 = por %p3835_p3, %p3834_p2 }
  0x19   : > { %p3837_p5 = pnand %p3836_p4, %p3830_p13 }
  0x1b   : > { %3840 = shalt.err (!%p3837_p5)
}
  0x1c   : > { %s3841_s7 = scalar_lea.vmem %s4009_s26, 1024  ;;  %s3926_s8 = smov [#allocation2]  }
  0x1d   : > { %p3842_p6 = scmp.ne.s32.totalorder %s4009_s26, %s3841_s7  ;;  %s3846_s9 = sshll.u32 %s3926_s8, 4  ;;  %s3847_s9 = int_to_ptr.vmem [resolvable:$false] %s3846_s9 }
  0x1e   : > { %s3848_s15 = scalar_lea.vmem %s3847_s9, 2048  ;;  %p3849_p9 = scmp.lt.s32.totalorder %s4009_s26, %s3847_s9 }
  0x1f   : > { %p3844_p10 = pnand %p3842_p6, %p3828_p11  ;;  %p3850_p0 = scmp.lt.s32.totalorder %s3848_s15, %s3841_s7 }
  0x21   : > { %p3845_p12 = pneg %p3844_p10  ;;  %p3851_p1 = por %p3850_p0, %p3849_p9 }
  0x23   : > { %p3852_p2 = pnand %p3851_p1, %p3845_p12 }
  0x25   : > { %3855 = shalt.err (!%p3852_p2)
}
  0x26   : > { %s3927_s16 = smov 128   ;;  %s3928_s22 = smov 8  }
  0x27   : > { %3745 = dma.hbm_to_vmem [thread:$0]  (!%p4011_p8), %s4005_s24, 1024, %s4009_s26, %s115_s28, %s3927_s16, %s3927_s16, %s3928_s22  }
  0x28   : > { %p156_p9 = scmp.lt.s32.totalorder %s3924_s12, 3  ;;  %s4053_s29 = scalar_lea.hbm %s7133_s1, %s3733_s21 }
  0x29   : > { %p7291_p13 = scmp.ge.s32.totalorder %s3924_s12, 1  ;;  %s140_s3 = scalar_lea.vmem [#allocation4], %s3719_s20 }
  0x2a   : > { %s148_s4 = sshll.u32 %s140_s3, 4  ;;  %s137_s24 = scalar_lea.sflag [#allocation5], %s3996_s19  ;;  %s4063_s4 = int_to_ptr.vmem [resolvable:$true] %s148_s4 }
  0x2b   : > { %p4057_p3 = pnand %p7291_p13, %p156_p9  ;;  %s3856_s26 = scalar_lea.hbm %s4053_s29, 1024 }
  0x2c   : > { %p3857_p4 = scmp.ne.s32.totalorder %s4053_s29, %s3856_s26  ;;  %s3861_s28 = scalar_lea.hbm %s7133_s1, 2048 }
  0x2d   : > { %p3862_p10 = scmp.lt.u32.totalorder %s4053_s29, %s7133_s1  ;;  %p3863_p12 = scmp.lt.u32.totalorder %s3861_s28, %s3856_s26 }
  0x2e   : > { %p3859_p5 = pnand %p3857_p4, %p3828_p11  ;;  %p3865_p1 = scmp.lt.u32.totalorder %s3856_s26, %s4053_s29 }
  0x2f   : > { %p3864_p0 = por %p3863_p12, %p3862_p10 }
  0x30   : > { %p3860_p6 = pneg %p3859_p5 }
  0x31   : > { %p3866_p2 = por %p3865_p1, %p3864_p0 }
  0x33   : > { %p3867_p9 = pnand %p3866_p2, %p3860_p6 }
  0x35   : > { %3870 = shalt.err (!%p3867_p9)
}
  0x36   : > { %s3871_s20 = scalar_lea.vmem %s4063_s4, 1024  ;;  %s3929_s7 = smov [#allocation4]  }
  0x37   : > { %p3872_p13 = scmp.ne.s32.totalorder %s4063_s4, %s3871_s20  ;;  %s3876_s8 = sshll.u32 %s3929_s7, 4  ;;  %s3877_s8 = int_to_ptr.vmem [resolvable:$false] %s3876_s8 }
  0x38   : > { %s3878_s9 = scalar_lea.vmem %s3877_s8, 2048  ;;  %p3879_p7 = scmp.lt.s32.totalorder %s4063_s4, %s3877_s8 }
  0x39   : > { %p3874_p4 = pnand %p3872_p13, %p3828_p11  ;;  %p3880_p10 = scmp.lt.s32.totalorder %s3878_s9, %s3871_s20 }
  0x3b   : > { %p3875_p5 = pneg %p3874_p4  ;;  %p3881_p12 = por %p3880_p10, %p3879_p7 }
  0x3d   : > { %p3882_p0 = pnand %p3881_p12, %p3875_p5 }
  0x3f   : > { %3885 = shalt.err (!%p3882_p0)
}
  0x40   : > { %3748 = dma.hbm_to_vmem [thread:$0]  (!%p4011_p8), %s4053_s29, 1024, %s4063_s4, %s137_s24, %s3927_s16, %s3927_s16, %s3928_s22  }
  0x41   : > { %160 = sbr.rel (%p4057_p3) target bundleno = 1246 (0x4de), region = 28 }
  0x48   : > { %s162_s15 = sand.u32 1, %s3916_s10   ;;  %p7293_p7 = scmp.ne.s32.totalorder %s7289_s18, 0 }
  0x49   : > { %s3728_s23 = sshll.u32 %s162_s15, 6  ;;  %s163_s25 = scalar_lea.sflag [#allocation3], %s162_s15 }
  0x4a   : > { %s4097_s3 = scalar_lea.vmem [#allocation2], %s3728_s23 }
  0x4b   : > { %3903 = dma.done.wait (%p7293_p7), %s163_s25, 1024  }
  0x4c   : > { %3905 = vsyncadd (%p7293_p7), %s163_s25, 4294966272  ;;  %s172_s19 = scalar_lea.sflag [#allocation5], %s162_s15  ;;  %s4103_s27 = scalar_lea.vmem [#allocation4], %s3728_s23 }
  0x4d   : > { %3907 = dma.done.wait (%p7293_p7), %s172_s19, 1024  }
  0x4e   : > { %3909 = vsyncadd (%p7293_p7), %s172_s19, 4294966272  ;;  %v4110_v0 = vld [vmem:[%s4097_s3 + $0x10] sm:$0xff]  ;;  %v4113_v1 = vld [vmem:[%s4097_s3] sm:$0xff]  ;;  %s3930_s18 = smov 127   ;;  %s3931_s16 = smov 126   ;;  %vm696_vm0 = vcmask 1044480  }
  0x4f   : > { %v4116_v2 = vld [vmem:[%s4097_s3 + $0x18] sm:$0xff]  ;;  %v4119_v3 = vmul.f32 0.007598758, %v4110_v0  ;;  %v4122_v4 = vmul.f32 0.007598758, %v4113_v1  ;;  %v4125_v5 = vld [vmem:[%s4097_s3 + $0x8] sm:$0xff] }
  0x50   : > { %v4132_v6 = vmul.f32 0.007598758, %v4116_v2  ;;  %v4135_v7 = vmul.f32 0.007598758, %v4125_v5  ;;  %v4138_v8 = vld [vmem:[%s4097_s3 + $0x28] sm:$0xff]  ;;  %v4141_v9 = vld [vmem:[%s4097_s3 + $0x20] sm:$0xff] }
  0x51   : > { %248 = vrot.lane.b32.xlu1 %v4119_v3, %s3930_s18  ;;  %244 = vrot.lane.b32.xlu0 %v4122_v4, %s3930_s18  ;;  %v4148_v10 = vmul.f32 0.007598758, %v4138_v8  ;;  %v4151_v11 = vmul.f32 0.007598758, %v4141_v9  ;;  %v4154_v12 = vld [vmem:[%s4097_s3 + $0x38] sm:$0xff]  ;;  %v4157_v13 = vld [vmem:[%s4097_s3 + $0x30] sm:$0xff] }
  0x52   : > { %v4164_v14 = vmul.f32 0.007598758, %v4154_v12  ;;  %v4167_v15 = vmul.f32 0.007598758, %v4157_v13  ;;  %v4174_v16 = vmul.f32 0.036000773, %v4125_v5 }
  0x53   : > { %v4177_v17 = vmul.f32 0.036000773, %v4113_v1  ;;  %v4184_v18 = vmul.f32 0.036000773, %v4116_v2  ;;  %v4187_v19 = vmul.f32 0.036000773, %v4110_v0 }
  0x54   : > { %v4194_v20 = vmul.f32 0.036000773, %v4138_v8  ;;  %v4197_v21 = vmul.f32 0.036000773, %v4141_v9  ;;  %v4204_v22 = vmul.f32 0.036000773, %v4154_v12 }
  0x55   : > { %250 = vrot.lane.b32.xlu1 %v4132_v6, %s3930_s18  ;;  %246 = vrot.lane.b32.xlu0 %v4135_v7, %s3930_s18  ;;  %v4207_v23 = vmul.f32 0.036000773, %v4157_v13  ;;  %v325_v24 = vmul.f32 0.10936069, %v4125_v5  ;;  %v324_v25 = vmul.f32 0.10936069, %v4113_v1 }
  0x56   : > { %s3932_s22 = smov 125   ;;  %v327_v26 = vmul.f32 0.10936069, %v4116_v2  ;;  %v326_v27 = vmul.f32 0.10936069, %v4110_v0  ;;  %s3933_s29 = smov 124  }
  0x57   : > { %v329_v28 = vmul.f32 0.10936069, %v4138_v8  ;;  %v328_v29 = vmul.f32 0.10936069, %v4141_v9  ;;  %v331_v30 = vmul.f32 0.10936069, %v4154_v12 }
  0x58   : > { %v330_v31 = vmul.f32 0.10936069, %v4157_v13  ;;  %v373_v32 = vmul.f32 0.21300554, %v4125_v5  ;;  %v372_v33 = vmul.f32 0.21300554, %v4113_v1 }
  0x59   : > { %254 = vrot.lane.b32.xlu1 %v4148_v10, %s3930_s18  ;;  %252 = vrot.lane.b32.xlu0 %v4151_v11, %s3930_s18  ;;  %v375_v34 = vmul.f32 0.21300554, %v4116_v2  ;;  %v374_v35 = vmul.f32 0.21300554, %v4110_v0  ;;  %v377_v36 = vmul.f32 0.21300554, %v4138_v8 }
  0x5a   : > { %v376_v37 = vmul.f32 0.21300554, %v4141_v9  ;;  %v379_v38 = vmul.f32 0.21300554, %v4154_v12  ;;  %v378_v39 = vmul.f32 0.21300554, %v4157_v13 }
  0x5b   : > { %v421_v40 = vmul.f32 0.26601171, %v4125_v5  ;;  %v420_v41 = vmul.f32 0.26601171, %v4113_v1  ;;  %s3934_s30 = smov 123   ;;  %s3935_s4 = smov 122  }
  0x5c   : > { %v423_v42 = vmul.f32 0.26601171, %v4116_v2  ;;  %v422_v43 = vmul.f32 0.26601171, %v4110_v0  ;;  %v425_v44 = vmul.f32 0.26601171, %v4138_v8 }
  0x5d   : > { %258 = vrot.lane.b32.xlu1 %v4164_v14, %s3930_s18  ;;  %256 = vrot.lane.b32.xlu0 %v4167_v15, %s3930_s18  ;;  %v424_v45 = vmul.f32 0.26601171, %v4141_v9  ;;  %v427_v46 = vmul.f32 0.26601171, %v4154_v12  ;;  %v426_v47 = vmul.f32 0.26601171, %v4157_v13 }
  0x5e   : > { %s3936_s24 = smov 121   ;;  %s3937_s26 = smov 120   ;;  %v4338_v62 = vmul.f32 0.0010283801, %v4113_v1  ;;  %v4341_v63 = vmul.f32 0.0010283801, %v4125_v5 }
  0x5f   : > { %s3938_s12 = smov 119   ;;  %s3939_s21 = smov 118   ;;  %v4355_v1 = vmul.f32 0.0010283801, %v4116_v2  ;;  %vm733_vm1 = vcmask 1043456   ;;  %vm770_vm2 = vcmask 1042432  }
  0x60   : > { %vm791_vm3 = vcmask 1041408   ;;  %vm812_vm4 = vcmask 1040384   ;;  %vm3613_vm5 = vcmask 46080   ;;  %p201_p8 = scmp.lt.s32.totalorder %s3974_s13, 1  ;;  %vm3632_vm6 = vcmask 0  }
  0x61   : > { %294 = vrot.lane.b32.xlu1 %v4174_v16, %s3931_s16  ;;  %292 = vrot.lane.b32.xlu0 %v4177_v17, %s3931_s16 }
  0x62   : > { %s7791_s13 = smov (!%p201_p8, %s3974_s13), 1 }
  0x63   : > { %s203_s6 = scalar_lea.vmem %s7134_s2, %s7791_s13 }
  0x65   : > { %298 = vrot.lane.b32.xlu1 %v4184_v18, %s3931_s16  ;;  %296 = vrot.lane.b32.xlu0 %v4187_v19, %s3931_s16 }
  0x69   : > { %302 = vrot.lane.b32.xlu1 %v4194_v20, %s3931_s16  ;;  %300 = vrot.lane.b32.xlu0 %v4197_v21, %s3931_s16 }
  0x6d   : > { %306 = vrot.lane.b32.xlu1 %v4204_v22, %s3931_s16  ;;  %304 = vrot.lane.b32.xlu0 %v4207_v23, %s3931_s16 }
  0x71   : > { %342 = vrot.lane.b32.xlu1 %v325_v24, %s3932_s22  ;;  %340 = vrot.lane.b32.xlu0 %v324_v25, %s3932_s22 }
  0x75   : > { %346 = vrot.lane.b32.xlu1 %v327_v26, %s3932_s22  ;;  %344 = vrot.lane.b32.xlu0 %v326_v27, %s3932_s22 }
  0x79   : > { %350 = vrot.lane.b32.xlu1 %v329_v28, %s3932_s22  ;;  %348 = vrot.lane.b32.xlu0 %v328_v29, %s3932_s22 }
  0x7d   : > { %354 = vrot.lane.b32.xlu1 %v331_v30, %s3932_s22  ;;  %352 = vrot.lane.b32.xlu0 %v330_v31, %s3932_s22 }
  0x81   : > { %390 = vrot.lane.b32.xlu1 %v373_v32, %s3933_s29  ;;  %388 = vrot.lane.b32.xlu0 %v372_v33, %s3933_s29 }
  0x85   : > { %394 = vrot.lane.b32.xlu1 %v375_v34, %s3933_s29  ;;  %392 = vrot.lane.b32.xlu0 %v374_v35, %s3933_s29 }
  0x89   : > { %398 = vrot.lane.b32.xlu1 %v377_v36, %s3933_s29  ;;  %396 = vrot.lane.b32.xlu0 %v376_v37, %s3933_s29 }
  0x8d   : > { %402 = vrot.lane.b32.xlu1 %v379_v38, %s3933_s29  ;;  %400 = vrot.lane.b32.xlu0 %v378_v39, %s3933_s29 }
  0x91   : > { %438 = vrot.lane.b32.xlu1 %v421_v40, %s3934_s30  ;;  %436 = vrot.lane.b32.xlu0 %v420_v41, %s3934_s30 }
  0x95   : > { %442 = vrot.lane.b32.xlu1 %v423_v42, %s3934_s30  ;;  %440 = vrot.lane.b32.xlu0 %v422_v43, %s3934_s30 }
  0x99   : > { %446 = vrot.lane.b32.xlu1 %v425_v44, %s3934_s30  ;;  %444 = vrot.lane.b32.xlu0 %v424_v45, %s3934_s30 }
  0x9d   : > { %450 = vrot.lane.b32.xlu1 %v427_v46, %s3934_s30  ;;  %448 = vrot.lane.b32.xlu0 %v426_v47, %s3934_s30 }
  0xa1   : > { %470 = vrot.lane.b32.xlu1 %v373_v32, %s3935_s4  ;;  %468 = vrot.lane.b32.xlu0 %v372_v33, %s3935_s4 }
  0xa5   : > { %474 = vrot.lane.b32.xlu1 %v375_v34, %s3935_s4  ;;  %472 = vrot.lane.b32.xlu0 %v374_v35, %s3935_s4 }
  0xa9   : > { %478 = vrot.lane.b32.xlu1 %v377_v36, %s3935_s4  ;;  %476 = vrot.lane.b32.xlu0 %v376_v37, %s3935_s4 }
  0xad   : > { %482 = vrot.lane.b32.xlu1 %v379_v38, %s3935_s4  ;;  %480 = vrot.lane.b32.xlu0 %v378_v39, %s3935_s4 }
  0xb1   : > { %502 = vrot.lane.b32.xlu1 %v325_v24, %s3936_s24  ;;  %500 = vrot.lane.b32.xlu0 %v324_v25, %s3936_s24  ;;  %v4426_v24 = vld [vmem:[%s4103_s27 + $0x28] sm:$0xff]  ;;  %v4429_v25 = vld [vmem:[%s4103_s27 + $0x20] sm:$0xff] }
  0xb2   : > { %7303 = vst [vmem:[#allocation17_spill] sm:$0xff] %v4426_v24  ;;  %7304 = vst [vmem:[#allocation18_spill] sm:$0xff] %v4429_v25  ;;  %v4502_v46 = vmul.f32 0.036000773, %v4426_v24  ;;  %v4505_v47 = vmul.f32 0.036000773, %v4429_v25 }
  0xb4   : > { %7319 = vst [vmem:[#allocation33_spill] sm:$0xff] %v4502_v46  ;;  %7320 = vst [vmem:[#allocation34_spill] sm:$0xff] %v4505_v47 }
  0xb5   : > { %506 = vrot.lane.b32.xlu1 %v327_v26, %s3936_s24  ;;  %504 = vrot.lane.b32.xlu0 %v326_v27, %s3936_s24 }
  0xb9   : > { %510 = vrot.lane.b32.xlu1 %v329_v28, %s3936_s24  ;;  %508 = vrot.lane.b32.xlu0 %v328_v29, %s3936_s24  ;;  %v4440_v28 = vmul.f32 0.007598758, %v4426_v24  ;;  %v4443_v29 = vmul.f32 0.007598758, %v4429_v25 }
  0xbb   : > { %7305 = vst [vmem:[#allocation19_spill] sm:$0xff] %v4440_v28  ;;  %7306 = vst [vmem:[#allocation20_spill] sm:$0xff] %v4443_v29 }
  0xbd   : > { %514 = vrot.lane.b32.xlu1 %v331_v30, %s3936_s24  ;;  %512 = vrot.lane.b32.xlu0 %v330_v31, %s3936_s24  ;;  %v4446_v30 = vld [vmem:[%s4103_s27 + $0x38] sm:$0xff]  ;;  %v4449_v31 = vld [vmem:[%s4103_s27 + $0x30] sm:$0xff] }
  0xbe   : > { %7307 = vst [vmem:[#allocation21_spill] sm:$0xff] %v4446_v30  ;;  %7308 = vst [vmem:[#allocation22_spill] sm:$0xff] %v4449_v31  ;;  %v4460_v34 = vmul.f32 0.007598758, %v4446_v30  ;;  %v4463_v35 = vmul.f32 0.007598758, %v4449_v31 }
  0xc0   : > { %7309 = vst [vmem:[#allocation23_spill] sm:$0xff] %v4460_v34  ;;  %7310 = vst [vmem:[#allocation24_spill] sm:$0xff] %v4463_v35 }
  0xc1   : > { %534 = vrot.lane.b32.xlu1 %v4174_v16, %s3937_s26  ;;  %532 = vrot.lane.b32.xlu0 %v4177_v17, %s3937_s26 }
  0xc3   : > { %v4281_v48 = vpop.permute.xlu1 %248  ;;  %v4283_v49 = vpop.permute.xlu0 %244 }
  0xc5   : > { %538 = vrot.lane.b32.xlu1 %v4184_v18, %s3937_s26  ;;  %536 = vrot.lane.b32.xlu0 %v4187_v19, %s3937_s26  ;;  %v4406_v19 = vld [vmem:[%s4103_s27 + $0x18] sm:$0xff] }
  0xc6   : > { %7298 = vst [vmem:[#allocation12_spill] sm:$0xff] %v4406_v19  ;;  %v4488_v42 = vmul.f32 0.036000773, %v4406_v19 }
  0xc7   : > { %v4289_v50 = vpop.permute.xlu1 %250  ;;  %v4291_v51 = vpop.permute.xlu0 %246 }
  0xc8   : > { %7317 = vst [vmem:[#allocation31_spill] sm:$0xff] %v4488_v42 }
  0xc9   : > { %542 = vrot.lane.b32.xlu1 %v4194_v20, %s3937_s26  ;;  %540 = vrot.lane.b32.xlu0 %v4197_v21, %s3937_s26 }
  0xcb   : > { %v4297_v52 = vpop.permute.xlu1 %254  ;;  %v4299_v53 = vpop.permute.xlu0 %252 }
  0xcd   : > { %546 = vrot.lane.b32.xlu1 %v4204_v22, %s3937_s26  ;;  %544 = vrot.lane.b32.xlu0 %v4207_v23, %s3937_s26  ;;  %v4420_v22 = vmul.f32 0.007598758, %v4406_v19 }
  0xcf   : > { %v4305_v54 = vpop.permute.xlu1 %258  ;;  %v4307_v55 = vpop.permute.xlu0 %256  ;;  %7301 = vst [vmem:[#allocation15_spill] sm:$0xff] %v4420_v22 }
  0xd1   : > { %566 = vrot.lane.b32.xlu1 %v4135_v7, %s3938_s12  ;;  %564 = vrot.lane.b32.xlu0 %v4122_v4, %s3938_s12 }
  0xd3   : > { %v4313_v56 = vpop.permute.xlu1 %294  ;;  %v4315_v57 = vpop.permute.xlu0 %292 }
  0xd5   : > { %570 = vrot.lane.b32.xlu1 %v4132_v6, %s3938_s12  ;;  %568 = vrot.lane.b32.xlu0 %v4119_v3, %s3938_s12  ;;  %v4352_v6 = vmul.f32 0.0010283801, %v4110_v0  ;;  %v4369_v0 = vmul.f32 0.0010283801, %v4141_v9  ;;  %v4389_v9 = vmul.f32 0.0010283801, %v4157_v13 }
  0xd6   : > { %v4409_v13 = vld [vmem:[%s4103_s27 + $0x10] sm:$0xff] }
  0xd7   : > { %v4321_v58 = vpop.permute.xlu1 %298  ;;  %v4323_v59 = vpop.permute.xlu0 %296  ;;  %7299 = vst [vmem:[#allocation13_spill] sm:$0xff] %v4409_v13  ;;  %v4423_v23 = vmul.f32 0.007598758, %v4409_v13  ;;  %v4491_v43 = vmul.f32 0.036000773, %v4409_v13 }
  0xd9   : > { %574 = vrot.lane.b32.xlu1 %v4148_v10, %s3938_s12  ;;  %572 = vrot.lane.b32.xlu0 %v4151_v11, %s3938_s12  ;;  %v4366_v10 = vmul.f32 0.0010283801, %v4138_v8  ;;  %v4386_v8 = vmul.f32 0.0010283801, %v4154_v12  ;;  %7302 = vst [vmem:[#allocation16_spill] sm:$0xff] %v4423_v23  ;;  %7318 = vst [vmem:[#allocation32_spill] sm:$0xff] %v4491_v43 }
  0xdb   : > { %v4329_v60 = vpop.permute.xlu1 %302  ;;  %v4331_v61 = vpop.permute.xlu0 %300 }
  0xdd   : > { %578 = vrot.lane.b32.xlu1 %v4164_v14, %s3938_s12  ;;  %576 = vrot.lane.b32.xlu0 %v4167_v15, %s3938_s12  ;;  %v4380_v14 = vld [vmem:[%s4103_s27 + $0x8] sm:$0xff]  ;;  %v4383_v15 = vld [vmem:[%s4103_s27] sm:$0xff] }
  0xde   : > { %7294 = vst [vmem:[#allocation8_spill] sm:$0xff] %v4380_v14  ;;  %7295 = vst [vmem:[#allocation9_spill] sm:$0xff] %v4383_v15  ;;  %v4400_v18 = vmul.f32 0.007598758, %v4380_v14  ;;  %v4403_v12 = vmul.f32 0.007598758, %v4383_v15 }
  0xdf   : > { %v4343_v3 = vpop.permute.xlu1 %306  ;;  %v4345_v4 = vpop.permute.xlu0 %304  ;;  %v4474_v38 = vmul.f32 0.036000773, %v4380_v14  ;;  %v4477_v39 = vmul.f32 0.036000773, %v4383_v15 }
  0xe0   : > { %7296 = vst [vmem:[#allocation10_spill] sm:$0xff] %v4400_v18  ;;  %7297 = vst [vmem:[#allocation11_spill] sm:$0xff] %v4403_v12 }
  0xe1   : > { %606 = vrot.lane.b32.xlu1 %v4341_v63, %s3939_s21  ;;  %604 = vrot.lane.b32.xlu0 %v4338_v62, %s3939_s21  ;;  %7313 = vst [vmem:[#allocation27_spill] sm:$0xff] %v4474_v38  ;;  %7314 = vst [vmem:[#allocation28_spill] sm:$0xff] %v4477_v39 }
  0xe3   : > { %v4357_v5 = vpop.permute.xlu1 %342  ;;  %v4359_v7 = vpop.permute.xlu0 %340 }
  0xe5   : > { %610 = vrot.lane.b32.xlu1 %v4355_v1, %s3939_s21  ;;  %608 = vrot.lane.b32.xlu0 %v4352_v6, %s3939_s21 }
  0xe7   : > { %v4371_v2 = vpop.permute.xlu1 %346  ;;  %v4373_v11 = vpop.permute.xlu0 %344 }
  0xe9   : > { %614 = vrot.lane.b32.xlu1 %v4366_v10, %s3939_s21  ;;  %612 = vrot.lane.b32.xlu0 %v4369_v0, %s3939_s21 }
  0xeb   : > { %v4391_v16 = vpop.permute.xlu1 %350  ;;  %v4393_v17 = vpop.permute.xlu0 %348 }
  0xed   : > { %618 = vrot.lane.b32.xlu1 %v4386_v8, %s3939_s21  ;;  %616 = vrot.lane.b32.xlu0 %v4389_v9, %s3939_s21 }
  0xef   : > { %v4411_v20 = vpop.permute.xlu1 %354  ;;  %v4413_v21 = vpop.permute.xlu0 %352 }
  0xf0   : > { %7300 = vst [vmem:[#allocation14_spill] sm:$0xff] %v4413_v21 }
  0xf1   : > { %907 = vrot.lane.b32.xlu1 %v4400_v18, %s3930_s18  ;;  %905 = vrot.lane.b32.xlu0 %v4403_v12, %s3930_s18  ;;  %v4530_v12 = vmul.f32 0.10936069, %v4380_v14  ;;  %v4533_v18 = vmul.f32 0.10936069, %v4383_v15 }
  0xf3   : > { %v4431_v26 = vpop.permute.xlu1 %390  ;;  %v4433_v27 = vpop.permute.xlu0 %388  ;;  %7327 = vst [vmem:[#allocation41_spill] sm:$0xff] %v4530_v12  ;;  %7328 = vst [vmem:[#allocation42_spill] sm:$0xff] %v4533_v18 }
  0xf5   : > { %911 = vrot.lane.b32.xlu1 %v4420_v22, %s3930_s18  ;;  %909 = vrot.lane.b32.xlu0 %v4423_v23, %s3930_s18 }
  0xf7   : > { %v4451_v32 = vpop.permute.xlu1 %394  ;;  %v4453_v33 = vpop.permute.xlu0 %392 }
  0xf9   : > { %915 = vrot.lane.b32.xlu1 %v4440_v28, %s3930_s18  ;;  %913 = vrot.lane.b32.xlu0 %v4443_v29, %s3930_s18  ;;  %v4516_v29 = vmul.f32 0.036000773, %v4446_v30  ;;  %v4519_v28 = vmul.f32 0.036000773, %v4449_v31 }
  0xfb   : > { %v4465_v36 = vpop.permute.xlu1 %398  ;;  %v4467_v37 = vpop.permute.xlu0 %396  ;;  %7323 = vst [vmem:[#allocation37_spill] sm:$0xff] %v4516_v29  ;;  %7324 = vst [vmem:[#allocation38_spill] sm:$0xff] %v4519_v28 }
  0xfc   : > { %7311 = vst [vmem:[#allocation25_spill] sm:$0xff] %v4465_v36  ;;  %7312 = vst [vmem:[#allocation26_spill] sm:$0xff] %v4467_v37 }
  0xfd   : > { %919 = vrot.lane.b32.xlu1 %v4460_v34, %s3930_s18  ;;  %917 = vrot.lane.b32.xlu0 %v4463_v35, %s3930_s18 }
  0xff   : > { %v4479_v40 = vpop.permute.xlu1 %402  ;;  %v4481_v41 = vpop.permute.xlu0 %400 }
 0x100   : > { %7315 = vst [vmem:[#allocation29_spill] sm:$0xff] %v4479_v40  ;;  %7316 = vst [vmem:[#allocation30_spill] sm:$0xff] %v4481_v41  ;;  %v4613_v40 = vmul.f32 0.21300554, %v4449_v31 }
 0x101   : > { %955 = vrot.lane.b32.xlu1 %v4474_v38, %s3931_s16  ;;  %953 = vrot.lane.b32.xlu0 %v4477_v39, %s3931_s16  ;;  %v4558_v39 = vmul.f32 0.10936069, %v4426_v24  ;;  %v4561_v38 = vmul.f32 0.10936069, %v4429_v25 }
 0x103   : > { %v4493_v44 = vpop.permute.xlu1 %438  ;;  %v4495_v45 = vpop.permute.xlu0 %436  ;;  %7333 = vst [vmem:[#allocation47_spill] sm:$0xff] %v4558_v39  ;;  %7334 = vst [vmem:[#allocation48_spill] sm:$0xff] %v4561_v38 }
 0x105   : > { %959 = vrot.lane.b32.xlu1 %v4488_v42, %s3931_s16  ;;  %957 = vrot.lane.b32.xlu0 %v4491_v43, %s3931_s16 }
 0x107   : > { %v4507_v35 = vpop.permute.xlu1 %442  ;;  %v4509_v34 = vpop.permute.xlu0 %440 }
 0x108   : > { %7321 = vst [vmem:[#allocation35_spill] sm:$0xff] %v4507_v35  ;;  %7322 = vst [vmem:[#allocation36_spill] sm:$0xff] %v4509_v34 }
 0x109   : > { %963 = vrot.lane.b32.xlu1 %v4502_v46, %s3931_s16  ;;  %961 = vrot.lane.b32.xlu0 %v4505_v47, %s3931_s16 }
 0x10b   : > { %v4521_v23 = vpop.permute.xlu1 %446  ;;  %v4523_v22 = vpop.permute.xlu0 %444 }
 0x10c   : > { %7325 = vst [vmem:[#allocation39_spill] sm:$0xff] %v4521_v23  ;;  %7326 = vst [vmem:[#allocation40_spill] sm:$0xff] %v4523_v22 }
 0x10d   : > { %967 = vrot.lane.b32.xlu1 %v4516_v29, %s3931_s16  ;;  %965 = vrot.lane.b32.xlu0 %v4519_v28, %s3931_s16  ;;  %v4544_v29 = vmul.f32 0.10936069, %v4406_v19  ;;  %v4547_v28 = vmul.f32 0.10936069, %v4409_v13 }
 0x10f   : > { %v4535_v47 = vpop.permute.xlu1 %450  ;;  %v4537_v46 = vpop.permute.xlu0 %448  ;;  %7331 = vst [vmem:[#allocation45_spill] sm:$0xff] %v4544_v29  ;;  %7332 = vst [vmem:[#allocation46_spill] sm:$0xff] %v4547_v28 }
 0x110   : > { %7329 = vst [vmem:[#allocation43_spill] sm:$0xff] %v4535_v47  ;;  %7330 = vst [vmem:[#allocation44_spill] sm:$0xff] %v4537_v46 }
 0x111   : > { %1003 = vrot.lane.b32.xlu1 %v4530_v12, %s3932_s22  ;;  %1001 = vrot.lane.b32.xlu0 %v4533_v18, %s3932_s22 }
 0x113   : > { %v4549_v43 = vpop.permute.xlu1 %470  ;;  %v4551_v42 = vpop.permute.xlu0 %468 }
 0x115   : > { %1007 = vrot.lane.b32.xlu1 %v4544_v29, %s3932_s22  ;;  %1005 = vrot.lane.b32.xlu0 %v4547_v28, %s3932_s22  ;;  %v4572_v29 = vmul.f32 0.10936069, %v4446_v30  ;;  %v4575_v28 = vmul.f32 0.10936069, %v4449_v31 }
 0x117   : > { %v4563_v46 = vpop.permute.xlu1 %474  ;;  %v4565_v47 = vpop.permute.xlu0 %472  ;;  %7337 = vst [vmem:[#allocation51_spill] sm:$0xff] %v4572_v29  ;;  %7338 = vst [vmem:[#allocation52_spill] sm:$0xff] %v4575_v28 }
 0x118   : > { %7335 = vst [vmem:[#allocation49_spill] sm:$0xff] %v4563_v46  ;;  %7336 = vst [vmem:[#allocation50_spill] sm:$0xff] %v4565_v47  ;;  %v4610_v46 = vmul.f32 0.21300554, %v4446_v30 }
 0x119   : > { %1011 = vrot.lane.b32.xlu1 %v4558_v39, %s3932_s22  ;;  %1009 = vrot.lane.b32.xlu0 %v4561_v38, %s3932_s22  ;;  %v1034_v39 = vmul.f32 0.21300554, %v4380_v14  ;;  %v1033_v38 = vmul.f32 0.21300554, %v4383_v15 }
 0x11b   : > { %v4577_v41 = vpop.permute.xlu1 %478  ;;  %v4579_v22 = vpop.permute.xlu0 %476 }
 0x11c   : > { %7339 = vst [vmem:[#allocation53_spill] sm:$0xff] %v4577_v41  ;;  %7340 = vst [vmem:[#allocation54_spill] sm:$0xff] %v4579_v22  ;;  %v1036_v22 = vmul.f32 0.21300554, %v4406_v19  ;;  %v1035_v41 = vmul.f32 0.21300554, %v4409_v13 }
 0x11d   : > { %1015 = vrot.lane.b32.xlu1 %v4572_v29, %s3932_s22  ;;  %1013 = vrot.lane.b32.xlu0 %v4575_v28, %s3932_s22  ;;  %v1038_v28 = vmul.f32 0.21300554, %v4426_v24 }
 0x11f   : > { %v4587_v23 = vpop.permute.xlu1 %482  ;;  %v4589_v18 = vpop.permute.xlu0 %480 }
 0x120   : > { %7341 = vst [vmem:[#allocation55_spill] sm:$0xff] %v4587_v23  ;;  %7342 = vst [vmem:[#allocation56_spill] sm:$0xff] %v4589_v18  ;;  %v1037_v18 = vmul.f32 0.21300554, %v4429_v25 }
 0x121   : > { %1051 = vrot.lane.b32.xlu1 %v1034_v39, %s3933_s29  ;;  %1049 = vrot.lane.b32.xlu0 %v1033_v38, %s3933_s29 }
 0x123   : > { %v4595_v29 = vpop.permute.xlu1 %502  ;;  %v4597_v12 = vpop.permute.xlu0 %500 }
 0x124   : > { %7343 = vst [vmem:[#allocation57_spill] sm:$0xff] %v4597_v12 }
 0x125   : > { %1055 = vrot.lane.b32.xlu1 %v1036_v22, %s3933_s29  ;;  %1053 = vrot.lane.b32.xlu0 %v1035_v41, %s3933_s29 }
 0x127   : > { %v4603_v23 = vpop.permute.xlu1 %506  ;;  %v4605_v47 = vpop.permute.xlu0 %504 }
 0x128   : > { %7344 = vst [vmem:[#allocation58_spill] sm:$0xff] %v4603_v23  ;;  %7345 = vst [vmem:[#allocation59_spill] sm:$0xff] %v4605_v47  ;;  %v1082_v47 = vmul.f32 0.26601171, %v4380_v14  ;;  %v1081_v23 = vmul.f32 0.26601171, %v4383_v15 }
 0x129   : > { %1059 = vrot.lane.b32.xlu1 %v1038_v28, %s3933_s29  ;;  %1057 = vrot.lane.b32.xlu0 %v1037_v18, %s3933_s29  ;;  %v1086_v15 = vmul.f32 0.26601171, %v4426_v24  ;;  %v1085_v14 = vmul.f32 0.26601171, %v4429_v25 }
 0x12b   : > { %v4615_v12 = vpop.permute.xlu1 %510  ;;  %v4617_v37 = vpop.permute.xlu0 %508 }
 0x12c   : > { %7346 = vst [vmem:[#allocation60_spill] sm:$0xff] %v4615_v12  ;;  %7347 = vst [vmem:[#allocation61_spill] sm:$0xff] %v4617_v37  ;;  %v1084_v37 = vmul.f32 0.26601171, %v4406_v19  ;;  %v1083_v12 = vmul.f32 0.26601171, %v4409_v13 }
 0x12d   : > { %1063 = vrot.lane.b32.xlu1 %v4610_v46, %s3933_s29  ;;  %1061 = vrot.lane.b32.xlu0 %v4613_v40, %s3933_s29  ;;  %v1087_v19 = vmul.f32 0.26601171, %v4449_v31 }
 0x12f   : > { %v4625_v36 = vpop.permute.xlu1 %514  ;;  %v4627_v34 = vpop.permute.xlu0 %512 }
 0x130   : > { %7348 = vst [vmem:[#allocation62_spill] sm:$0xff] %v4627_v34 }
 0x131   : > { %1099 = vrot.lane.b32.xlu1 %v1082_v47, %s3934_s30  ;;  %1097 = vrot.lane.b32.xlu0 %v1081_v23, %s3934_s30  ;;  %v1088_v23 = vmul.f32 0.26601171, %v4446_v30  ;;  %v268_v30 = vadd.f32 %v4283_v49, %v4338_v62  ;;  %v273_v62 = vadd.f32 %v4297_v52, %v4366_v10  ;;  %v274_v52 = vadd.f32 %v4307_v55, %v4389_v9 }
 0x133   : > { %v4633_v35 = vpop.permute.xlu1 %534  ;;  %v4635_v21 = vpop.permute.xlu0 %532  ;;  %v322_v55 = vadd.f32 %v4345_v4, %v274_v52 }
 0x135   : > { %1103 = vrot.lane.b32.xlu1 %v1084_v37, %s3934_s30  ;;  %1101 = vrot.lane.b32.xlu0 %v1083_v12, %s3934_s30 }
 0x137   : > { %v4641_v34 = vpop.permute.xlu1 %538  ;;  %v4643_v47 = vpop.permute.xlu0 %536 }
 0x139   : > { %1107 = vrot.lane.b32.xlu1 %v1086_v15, %s3934_s30  ;;  %1105 = vrot.lane.b32.xlu0 %v1085_v14, %s3934_s30  ;;  %v269_v14 = vadd.f32 %v4291_v51, %v4341_v63  ;;  %v271_v51 = vadd.f32 %v4289_v50, %v4355_v1  ;;  %v275_v50 = vadd.f32 %v4305_v54, %v4386_v8 }
 0x13b   : > { %v4649_v13 = vpop.permute.xlu1 %542  ;;  %v4651_v37 = vpop.permute.xlu0 %540  ;;  %v323_v54 = vadd.f32 %v4343_v3, %v275_v50  ;;  %v7363_v50 = vld [vmem:[#allocation43_spill] sm:$0xff] }
 0x13d   : > { %1111 = vrot.lane.b32.xlu1 %v1088_v23, %s3934_s30  ;;  %1109 = vrot.lane.b32.xlu0 %v1087_v19, %s3934_s30  ;;  %v317_v23 = vadd.f32 %v4313_v56, %v269_v14  ;;  %v316_v19 = vadd.f32 %v4315_v57, %v268_v30  ;;  %v319_v57 = vadd.f32 %v4321_v58, %v271_v51  ;;  %v7351_v30 = vld [vmem:[#allocation36_spill] sm:$0xff]  ;;  %v7360_v51 = vld [vmem:[#allocation39_spill] sm:$0xff] }
 0x13e   : > { %v321_v58 = vadd.f32 %v4329_v60, %v273_v62  ;;  %v371_v4 = vadd.f32 %v4411_v20, %v323_v54  ;;  %v7366_v54 = vld [vmem:[#allocation53_spill] sm:$0xff] }
 0x13f   : > { %v4655_v12 = vpop.permute.xlu1 %546  ;;  %v4657_v25 = vpop.permute.xlu0 %544  ;;  %v364_v49 = vadd.f32 %v4359_v7, %v316_v19 }
 0x141   : > { %1131 = vrot.lane.b32.xlu1 %v1034_v39, %s3935_s4  ;;  %1129 = vrot.lane.b32.xlu0 %v1033_v38, %s3935_s4  ;;  %v365_v39 = vadd.f32 %v4357_v5, %v317_v23  ;;  %v270_v38 = vadd.f32 %v4281_v48, %v4352_v6  ;;  %v272_v48 = vadd.f32 %v4299_v53, %v4369_v0  ;;  %v7357_v23 = vld [vmem:[#allocation50_spill] sm:$0xff] }
 0x142   : > { %v412_v6 = vadd.f32 %v4433_v27, %v364_v49  ;;  %v7350_v27 = vld [vmem:[#allocation35_spill] sm:$0xff] }
 0x143   : > { %v567_v15 = vpop.permute.xlu1 %566  ;;  %v4663_v31 = vpop.permute.xlu0 %564  ;;  %v413_v56 = vadd.f32 %v4431_v26, %v365_v39  ;;  %v318_v5 = vadd.f32 %v4323_v59, %v270_v38  ;;  %v367_v59 = vadd.f32 %v4371_v2, %v319_v57  ;;  %v320_v53 = vadd.f32 %v4331_v61, %v272_v48  ;;  %v7358_v39 = vld [vmem:[#allocation41_spill] sm:$0xff]  ;;  %v7359_v38 = vld [vmem:[#allocation42_spill] sm:$0xff] }
 0x144   : > { %v460_v0 = vadd.f32 %v4495_v45, %v412_v6  ;;  %v369_v61 = vadd.f32 %v4391_v16, %v321_v58  ;;  %v7355_v45 = vld [vmem:[#allocation29_spill] sm:$0xff]  ;;  %v7365_v58 = vld [vmem:[#allocation59_spill] sm:$0xff] }
 0x145   : > { %1135 = vrot.lane.b32.xlu1 %v1036_v22, %s3935_s4  ;;  %1133 = vrot.lane.b32.xlu0 %v1035_v41, %s3935_s4  ;;  %v461_v1 = vadd.f32 %v4493_v44, %v413_v56  ;;  %v366_v7 = vadd.f32 %v4373_v11, %v318_v5  ;;  %v415_v60 = vadd.f32 %v4451_v32, %v367_v59  ;;  %v7349_v22 = vld [vmem:[#allocation14_spill] sm:$0xff]  ;;  %v7354_v44 = vld [vmem:[#allocation57_spill] sm:$0xff]  ;;  %v7361_v56 = vld [vmem:[#allocation40_spill] sm:$0xff] }
 0x146   : > { %v368_v3 = vadd.f32 %v4393_v17, %v320_v53  ;;  %v492_v11 = vadd.f32 %v4551_v42, %v460_v0  ;;  %v370_v26 = vadd.f32 %v7349_v22, %v322_v55  ;;  %v419_v20 = vadd.f32 %v7355_v45, %v371_v4 }
 0x147   : > { %v4676_v63 = vpop.permute.xlu1 %570  ;;  %v4678_v24 = vpop.permute.xlu0 %568  ;;  %v493_v8 = vadd.f32 %v4549_v43, %v461_v1  ;;  %v414_v2 = vadd.f32 %v4453_v33, %v366_v7  ;;  %v7353_v43 = vld [vmem:[#allocation26_spill] sm:$0xff] }
 0x148   : > { %v416_v17 = vadd.f32 %v7353_v43, %v368_v3  ;;  %v524_v42 = vadd.f32 %v7354_v44, %v492_v11  ;;  %v467_v6 = vadd.f32 %v7363_v50, %v419_v20  ;;  %v7364_v1 = vld [vmem:[#allocation58_spill] sm:$0xff]  ;;  %v7369_v11 = vld [vmem:[#allocation45_spill] sm:$0xff] }
 0x149   : > { %1139 = vrot.lane.b32.xlu1 %v1038_v28, %s3935_s4  ;;  %1137 = vrot.lane.b32.xlu0 %v1037_v18, %s3935_s4  ;;  %v525_v9 = vadd.f32 %v4595_v29, %v493_v8  ;;  %v463_v28 = vadd.f32 %v7350_v27, %v415_v60  ;;  %v462_v32 = vadd.f32 %v7351_v30, %v414_v2  ;;  %v7367_v8 = vld [vmem:[#allocation54_spill] sm:$0xff]  ;;  %v7371_v27 = vld [vmem:[#allocation44_spill] sm:$0xff] }
 0x14a   : > { %v464_v62 = vadd.f32 %v7361_v56, %v416_v17  ;;  %v556_v57 = vadd.f32 %v4635_v21, %v524_v42  ;;  %v7368_v21 = vld [vmem:[#allocation55_spill] sm:$0xff] }
 0x14b   : > { %v4699_v10 = vpop.permute.xlu1 %574  ;;  %v4701_v18 = vpop.permute.xlu0 %572  ;;  %v557_v29 = vadd.f32 %v4633_v35, %v525_v9  ;;  %v494_v19 = vadd.f32 %v7357_v23, %v462_v32  ;;  %v7362_v35 = vld [vmem:[#allocation30_spill] sm:$0xff] }
 0x14c   : > { %v418_v48 = vadd.f32 %v7362_v35, %v370_v26  ;;  %v496_v55 = vadd.f32 %v7367_v8, %v464_v62  ;;  %v588_v60 = vadd.f32 %v4663_v31, %v556_v57  ;;  %v7370_v9 = vld [vmem:[#allocation46_spill] sm:$0xff] }
 0x14d   : > { %1143 = vrot.lane.b32.xlu1 %v4610_v46, %s3935_s4  ;;  %1141 = vrot.lane.b32.xlu0 %v4613_v40, %s3935_s4  ;;  %v7352_v40 = vld [vmem:[#allocation25_spill] sm:$0xff]  ;;  %v589_v5 = vadd.f32 %v567_v15, %v557_v29  ;;  %v526_v59 = vadd.f32 %v7365_v58, %v494_v19  ;;  %v499_v15 = vadd.f32 %v7368_v21, %v467_v6 }
 0x14e   : > { %v417_v16 = vadd.f32 %v7352_v40, %v369_v61  ;;  %v7356_v46 = vld [vmem:[#allocation49_spill] sm:$0xff] }
 0x14f   : > { %v4722_v33 = vpop.permute.xlu1 %578  ;;  %v4724_v41 = vpop.permute.xlu0 %576  ;;  %v495_v14 = vadd.f32 %v7356_v46, %v463_v28  ;;  %v558_v3 = vadd.f32 %v4643_v47, %v526_v59  ;;  %v466_v28 = vadd.f32 %v7371_v27, %v418_v48  ;;  %v7373_v40 = vld [vmem:[#allocation61_spill] sm:$0xff]  ;;  %v531_v43 = vadd.f32 %v4625_v36, %v499_v15  ;;  %v7374_v46 = vld [vmem:[#allocation47_spill] sm:$0xff]  ;;  %v7378_v15 = vld [vmem:[#allocation56_spill] sm:$0xff] }
 0x150   : > { %v465_v49 = vadd.f32 %v7360_v51, %v417_v16  ;;  %v528_v16 = vadd.f32 %v7373_v40, %v496_v55 }
 0x151   : > { %1163 = vrot.lane.b32.xlu1 %v7358_v39, %s3936_s24  ;;  %1161 = vrot.lane.b32.xlu0 %v7359_v38, %s3936_s24  ;;  %v527_v52 = vadd.f32 %v7364_v1, %v495_v14  ;;  %v590_v44 = vadd.f32 %v4678_v24, %v558_v3  ;;  %v7375_v14 = vld [vmem:[#allocation48_spill] sm:$0xff] }
 0x152   : > { %v497_v0 = vadd.f32 %v7366_v54, %v465_v49  ;;  %v560_v54 = vadd.f32 %v4651_v37, %v528_v16 }
 0x153   : > { %v607_v7 = vpop.permute.xlu1 %606  ;;  %v605_v53 = vpop.permute.xlu0 %604  ;;  %v559_v61 = vadd.f32 %v4641_v34, %v527_v52  ;;  %v7372_v34 = vld [vmem:[#allocation60_spill] sm:$0xff]  ;;  %v7376_v52 = vld [vmem:[#allocation51_spill] sm:$0xff] }
 0x154   : > { %v4747_v2 = vadd.f32 %v607_v7, %v589_v5  ;;  %v628_v26 = vadd.f32 %v605_v53, %v588_v60  ;;  %v529_v30 = vadd.f32 %v7372_v34, %v497_v0 }
 0x155   : > { %1167 = vrot.lane.b32.xlu1 %v7369_v11, %s3936_s24  ;;  %1165 = vrot.lane.b32.xlu0 %v7370_v9, %s3936_s24  ;;  %v591_v17 = vadd.f32 %v4676_v63, %v559_v61  ;;  %v498_v61 = vadd.f32 %v7378_v15, %v466_v28  ;;  %v563_v11 = vadd.f32 %v4655_v12, %v531_v43  ;;  %v7387_v15 = vld [vmem:[#allocation9_spill] sm:$0xff] }
 0x156   : > { %v4757_v4 = vmul.f32 0.10936069, %v4747_v2  ;;  %v718_v31 = vmul.f32 0.21300554, %v4747_v2  ;;  %v755_v22 = vmul.f32 0.26601171, %v4747_v2  ;;  %v561_v63 = vadd.f32 %v4649_v13, %v529_v30 }
 0x157   : > { %v611_v47 = vpop.permute.xlu1 %610  ;;  %v609_v32 = vpop.permute.xlu0 %608  ;;  %v640_v23 = vmul.f32 0.007598758, %v628_v26  ;;  %v660_v19 = vmul.f32 0.036000773, %v628_v26  ;;  %v4772_v39 = vmul.f32 0.10936069, %v628_v26 }
 0x158   : > { %v698_v42 = vrot.slane %v4757_v4, 3  ;;  %v735_v29 = vrot.slane %v718_v31, 4  ;;  %v772_v45 = vrot.slane %v755_v22, 5  ;;  %v793_v20 = vrot.slane %v718_v31, 6  ;;  %v7377_v13 = vld [vmem:[#allocation52_spill] sm:$0xff]  ;;  %v7379_v22 = vld [vmem:[#allocation27_spill] sm:$0xff] }
 0x159   : > { %1171 = vrot.lane.b32.xlu1 %v7374_v46, %s3936_s24  ;;  %1169 = vrot.lane.b32.xlu0 %v7375_v14, %s3936_s24  ;;  %v4774_v36 = vadd.f32 %v611_v47, %v591_v17  ;;  %v636_v24 = vmul.f32 0.0010283801, %v628_v26  ;;  %v717_v38 = vmul.f32 0.21300554, %v628_v26  ;;  %v754_v51 = vmul.f32 0.26601171, %v628_v26 }
 0x15a   : > { %v648_v62 = vrot.slane %v640_v23, 1  ;;  %v668_v57 = vrot.slane %v660_v19, 2  ;;  %v697_v5 = vrot.slane %v4772_v39, 3  ;;  %v630_v35 = vadd.f32 %v609_v32, %v590_v44  ;;  %v7380_v26 = vld [vmem:[#allocation28_spill] sm:$0xff]  ;;  %v7381_v46 = vld [vmem:[#allocation31_spill] sm:$0xff] }
 0x15b   : > { %v615_v49 = vpop.permute.xlu1 %614  ;;  %v613_v56 = vpop.permute.xlu0 %612  ;;  %v734_v48 = vrot.slane %v717_v38, 4  ;;  %v771_v50 = vrot.slane %v754_v51, 5  ;;  %v792_v6 = vrot.slane %v717_v38, 6  ;;  %v4779_v1 = vmul.f32 0.10936069, %v4774_v36  ;;  %v7382_v14 = vld [vmem:[#allocation32_spill] sm:$0xff] }
 0x15c   : > { %v656_v58 = vadd.f32 %v648_v62, %v636_v24  ;;  %v699_v59 = vsel %vm696_vm0, %v697_v5, %v698_v42  ;;  %v720_v7 = vmul.f32 0.21300554, %v4774_v36  ;;  %v757_v53 = vmul.f32 0.26601171, %v4774_v36  ;;  %v7383_v5 = vld [vmem:[#allocation62_spill] sm:$0xff] }
 0x15d   : > { %1175 = vrot.lane.b32.xlu1 %v7376_v52, %s3936_s24  ;;  %1173 = vrot.lane.b32.xlu0 %v7377_v13, %s3936_s24  ;;  %v736_v0 = vsel %vm733_vm1, %v734_v48, %v735_v29  ;;  %v773_v8 = vsel %vm770_vm2, %v771_v50, %v772_v45  ;;  %v4792_v55 = vsel %vm791_vm3, %v792_v6, %v793_v20  ;;  %v701_v37 = vrot.slane %v4779_v1, 3 }
 0x15e   : > { %v676_v3 = vadd.f32 %v668_v57, %v656_v58  ;;  %v593_v9 = vadd.f32 %v4699_v10, %v561_v63  ;;  %v592_v31 = vadd.f32 %v4701_v18, %v560_v54  ;;  %v738_v34 = vrot.slane %v720_v7, 4 }
 0x15f   : > { %v619_v60 = vpop.permute.xlu1 %618  ;;  %v4794_v21 = vpop.permute.xlu0 %616  ;;  %v775_v30 = vrot.slane %v757_v53, 5  ;;  %v641_v47 = vmul.f32 0.007598758, %v630_v35  ;;  %v796_v28 = vrot.slane %v720_v7, 6  ;;  %v661_v32 = vmul.f32 0.036000773, %v630_v35 }
 0x160   : > { %v713_v27 = vadd.f32 %v699_v59, %v676_v3  ;;  %v4805_v40 = vmul.f32 0.10936069, %v630_v35  ;;  %v4807_v12 = vadd.f32 %v615_v49, %v593_v9  ;;  %v637_v43 = vmul.f32 0.0010283801, %v630_v35  ;;  %v7384_v59 = vld [vmem:[#allocation33_spill] sm:$0xff]  ;;  %v7385_v7 = vld [vmem:[#allocation34_spill] sm:$0xff] }
 0x161   : > { %1195 = vrot.lane.b32.xlu1 %v7379_v22, %s3937_s26  ;;  %1193 = vrot.lane.b32.xlu0 %v7380_v26, %s3937_s26  ;;  %v649_v17 = vrot.slane %v641_v47, 1  ;;  %v719_v44 = vmul.f32 0.21300554, %v630_v35  ;;  %v669_v42 = vrot.slane %v661_v32, 2  ;;  %v756_v45 = vmul.f32 0.26601171, %v630_v35 }
 0x162   : > { %v750_v16 = vadd.f32 %v736_v0, %v713_v27  ;;  %v700_v29 = vrot.slane %v4805_v40, 3  ;;  %v632_v20 = vadd.f32 %v613_v56, %v592_v31  ;;  %v4822_v49 = vmul.f32 0.10936069, %v4807_v12  ;;  %v7386_v0 = vld [vmem:[#allocation8_spill] sm:$0xff]  ;;  %v7388_v32 = vld [vmem:[#allocation37_spill] sm:$0xff] }
 0x163   : > { %v4809_v10 = vpop.permute.xlu1 %907  ;;  %v4811_v18 = vpop.permute.xlu0 %905  ;;  %v657_v19 = vadd.f32 %v649_v17, %v637_v43  ;;  %v737_v63 = vrot.slane %v719_v44, 4  ;;  %v795_v24 = vrot.slane %v719_v44, 6  ;;  %v774_v51 = vrot.slane %v756_v45, 5 }
 0x164   : > { %v4818_v23 = vadd.f32 %v773_v8, %v750_v16  ;;  %v702_v38 = vsel %vm696_vm0, %v700_v29, %v701_v37  ;;  %v4825_v62 = vmul.f32 0.21300554, %v4807_v12  ;;  %v530_v35 = vadd.f32 %v7383_v5, %v498_v61 }
 0x165   : > { %1199 = vrot.lane.b32.xlu1 %v7381_v46, %s3937_s26  ;;  %1197 = vrot.lane.b32.xlu0 %v7382_v14, %s3937_s26  ;;  %v677_v48 = vadd.f32 %v669_v42, %v657_v19  ;;  %v739_v50 = vsel %vm733_vm1, %v737_v63, %v738_v34  ;;  %v4834_v6 = vsel %vm791_vm3, %v795_v24, %v796_v28  ;;  %v759_v58 = vmul.f32 0.26601171, %v4807_v12 }
 0x166   : > { %v595_v52 = vadd.f32 %v4722_v33, %v563_v11  ;;  %v776_v13 = vsel %vm770_vm2, %v774_v51, %v775_v30  ;;  %v562_v53 = vadd.f32 %v4657_v25, %v530_v35  ;;  %v4845_v8 = vmul.f32 0.0010283801, %v7386_v0 }
 0x167   : > { %v4827_v56 = vpop.permute.xlu1 %911  ;;  %v4829_v57 = vpop.permute.xlu0 %909  ;;  %v714_v54 = vadd.f32 %v702_v38, %v677_v48  ;;  %v4848_v61 = vmul.f32 0.0010283801, %v7387_v15  ;;  %v704_v33 = vrot.slane %v4822_v49, 3  ;;  %v741_v3 = vrot.slane %v4825_v62, 4  ;;  %v7390_v48 = vld [vmem:[#allocation13_spill] sm:$0xff] }
 0x168   : > { %v642_v11 = vmul.f32 0.007598758, %v632_v20  ;;  %v4852_v9 = vadd.f32 %v619_v60, %v595_v52  ;;  %v662_v25 = vmul.f32 0.036000773, %v632_v20  ;;  %v4858_v26 = vmul.f32 0.10936069, %v632_v20 }
 0x169   : > { %1203 = vrot.lane.b32.xlu1 %v7384_v59, %s3937_s26  ;;  %1201 = vrot.lane.b32.xlu0 %v7385_v7, %s3937_s26  ;;  %v751_v22 = vadd.f32 %v739_v50, %v714_v54  ;;  %v4860_v27 = vmul.f32 0.21300554, %v632_v20  ;;  %v778_v34 = vrot.slane %v759_v58, 5  ;;  %v638_v30 = vmul.f32 0.0010283801, %v632_v20  ;;  %v7389_v60 = vld [vmem:[#allocation38_spill] sm:$0xff] }
 0x16a   : > { %v650_v47 = vrot.slane %v642_v11, 1  ;;  %v758_v28 = vmul.f32 0.26601171, %v632_v20  ;;  %v4867_v16 = vmul.f32 0.007598758, %v4747_v2  ;;  %v703_v17 = vrot.slane %v4858_v26, 3 }
 0x16b   : > { %v4854_v31 = vpop.permute.xlu1 %915  ;;  %v4856_v37 = vpop.permute.xlu0 %913  ;;  %v4869_v43 = vadd.f32 %v776_v13, %v751_v22  ;;  %v740_v44 = vrot.slane %v4860_v27, 4  ;;  %v670_v29 = vrot.slane %v662_v25, 2  ;;  %v4874_v20 = vmul.f32 0.10936069, %v4852_v9  ;;  %v7391_v52 = vld [vmem:[#allocation10_spill] sm:$0xff]  ;;  %v7393_v7 = vld [vmem:[#allocation12_spill] sm:$0xff] }
 0x16c   : > { %v658_v42 = vadd.f32 %v650_v47, %v638_v30  ;;  %v777_v45 = vrot.slane %v758_v28, 5  ;;  %v594_v19 = vadd.f32 %v4724_v41, %v562_v53  ;;  %v705_v63 = vsel %vm696_vm0, %v703_v17, %v704_v33  ;;  %v7392_v41 = vld [vmem:[#allocation11_spill] sm:$0xff] }
 0x16d   : > { %1207 = vrot.lane.b32.xlu1 %v7388_v32, %s3937_s26  ;;  %1205 = vrot.lane.b32.xlu0 %v7389_v60, %s3937_s26  ;;  %v742_v24 = vsel %vm733_vm1, %v740_v44, %v741_v3  ;;  %v4884_v38 = vmul.f32 0.21300554, %v4852_v9  ;;  %v761_v35 = vmul.f32 0.26601171, %v4852_v9  ;;  %v4889_v50 = vmul.f32 0.0010283801, %v7390_v48 }
 0x16e   : > { %v678_v51 = vadd.f32 %v670_v29, %v658_v42  ;;  %v779_v5 = vsel %vm770_vm2, %v777_v45, %v778_v34  ;;  %v4896_v13 = vmul.f32 0.036000773, %v4747_v2  ;;  %v4899_v58 = vmul.f32 0.0010283801, %v4747_v2  ;;  %v7395_v32 = vld [vmem:[#allocation16_spill] sm:$0xff] }
 0x16f   : > { %v4876_v46 = vpop.permute.xlu1 %919  ;;  %v4878_v14 = vpop.permute.xlu0 %917  ;;  %v634_v59 = vadd.f32 %v4794_v21, %v594_v19  ;;  %v4903_v53 = vmul.f32 0.0010283801, %v7393_v7  ;;  %v814_v54 = vrot.slane %v4757_v4, 7  ;;  %v849_v0 = vrot.slane %v4867_v16, 1  ;;  %v7394_v4 = vld [vmem:[#allocation15_spill] sm:$0xff] }
 0x170   : > { %v715_v15 = vadd.f32 %v705_v63, %v678_v51  ;;  %v707_v33 = vrot.slane %v4874_v20, 3  ;;  %v744_v2 = vrot.slane %v4884_v38, 4  ;;  %v781_v22 = vrot.slane %v761_v35, 5  ;;  %v7396_v7 = vld [vmem:[#allocation19_spill] sm:$0xff] }
 0x171   : > { %1227 = vrot.lane.b32.xlu1 %v7391_v52, %s3938_s12  ;;  %1225 = vrot.lane.b32.xlu0 %v7392_v41, %s3938_s12  ;;  %v643_v25 = vmul.f32 0.007598758, %v634_v59  ;;  %v663_v21 = vmul.f32 0.036000773, %v634_v59  ;;  %v686_v30 = vmul.f32 0.10936069, %v634_v59 }
 0x172   : > { %v752_v34 = vadd.f32 %v742_v24, %v715_v15  ;;  %v723_v47 = vmul.f32 0.21300554, %v634_v59  ;;  %v760_v28 = vmul.f32 0.26601171, %v634_v59  ;;  %v813_v60 = vrot.slane %v4772_v39, 7 }
 0x173   : > { %v4908_v3 = vpop.permute.xlu1 %955  ;;  %v4910_v11 = vpop.permute.xlu0 %953  ;;  %v799_v17 = vrot.slane %v4825_v62, 6  ;;  %v639_v44 = vmul.f32 0.0010283801, %v634_v59  ;;  %v651_v42 = vrot.slane %v643_v25, 1  ;;  %v706_v45 = vrot.slane %v686_v30, 3 }
 0x174   : > { %v789_v29 = vadd.f32 %v779_v5, %v752_v34  ;;  %v743_v19 = vrot.slane %v723_v47, 4  ;;  %v780_v63 = vrot.slane %v760_v28, 5  ;;  %v798_v35 = vrot.slane %v4860_v27, 6 }
 0x175   : > { %1231 = vrot.lane.b32.xlu1 %v7394_v4, %s3938_s12  ;;  %1229 = vrot.lane.b32.xlu0 %v7395_v32, %s3938_s12  ;;  %v802_v48 = vrot.slane %v4884_v38, 6  ;;  %v659_v52 = vadd.f32 %v651_v42, %v639_v44  ;;  %v671_v41 = vrot.slane %v663_v21, 2  ;;  %v708_v39 = vsel %vm696_vm0, %v706_v45, %v707_v33  ;;  %v7397_v38 = vld [vmem:[#allocation20_spill] sm:$0xff]  ;;  %v7398_v44 = vld [vmem:[#allocation23_spill] sm:$0xff] }
 0x176   : > { %v745_v62 = vsel %vm733_vm1, %v743_v19, %v744_v2  ;;  %v782_v59 = vsel %vm770_vm2, %v780_v63, %v781_v22  ;;  %v801_v5 = vrot.slane %v723_v47, 6  ;;  %v817_v15 = vrot.slane %v4779_v1, 7  ;;  %v7399_v45 = vld [vmem:[#allocation24_spill] sm:$0xff] }
 0x177   : > { %v4919_v24 = vpop.permute.xlu1 %959  ;;  %v4921_v51 = vpop.permute.xlu0 %957  ;;  %v834_v25 = vmul.f32 0.036000773, %v4774_v36  ;;  %v816_v27 = vrot.slane %v4805_v40, 7  ;;  %v679_v34 = vadd.f32 %v671_v41, %v659_v52  ;;  %v820_v33 = vrot.slane %v4822_v49, 7 }
 0x178   : > { %v819_v2 = vrot.slane %v4858_v26, 7  ;;  %v823_v22 = vrot.slane %v4874_v20, 7  ;;  %v822_v21 = vrot.slane %v686_v30, 7  ;;  %v842_v1 = vmul.f32 0.007598758, %v4774_v36 }
 0x179   : > { %1235 = vrot.lane.b32.xlu1 %v7396_v7, %s3938_s12  ;;  %1233 = vrot.lane.b32.xlu0 %v7397_v38, %s3938_s12  ;;  %v862_v4 = vmul.f32 0.0010283801, %v4774_v36  ;;  %v843_v40 = vmul.f32 0.007598758, %v4807_v12  ;;  %v716_v32 = vadd.f32 %v708_v39, %v679_v34  ;;  %v800_v49 = vsel %vm791_vm3, %v798_v35, %v799_v17 }
 0x17a   : > { %v803_v26 = vsel %vm791_vm3, %v801_v5, %v802_v48  ;;  %v808_v20 = vadd.f32 %v4792_v55, %v4818_v23  ;;  %v809_v30 = vadd.f32 %v4834_v6, %v4869_v43  ;;  %v810_v36 = vadd.f32 %v800_v49, %v789_v29  ;;  %v7405_v49 = vld [vmem:[#allocation18_spill] sm:$0xff] }
 0x17b   : > { %v4938_v47 = vpop.permute.xlu1 %963  ;;  %v4940_v28 = vpop.permute.xlu0 %961  ;;  %v753_v42 = vadd.f32 %v745_v62, %v716_v32  ;;  %v815_v19 = vsel %vm812_vm4, %v813_v60, %v814_v54  ;;  %v818_v63 = vsel %vm812_vm4, %v816_v27, %v817_v15  ;;  %v821_v35 = vsel %vm812_vm4, %v819_v2, %v820_v33 }
 0x17c   : > { %v824_v55 = vsel %vm812_vm4, %v822_v21, %v823_v22  ;;  %v829_v23 = vadd.f32 %v815_v19, %v808_v20  ;;  %v830_v48 = vadd.f32 %v818_v63, %v809_v30  ;;  %v869_v6 = vrot.slane %v4899_v58, 2 }
 0x17d   : > { %1239 = vrot.lane.b32.xlu1 %v7398_v44, %s3938_s12  ;;  %1237 = vrot.lane.b32.xlu0 %v7399_v45, %s3938_s12  ;;  %v835_v43 = vmul.f32 0.036000773, %v4807_v12  ;;  %v790_v41 = vadd.f32 %v782_v59, %v753_v42  ;;  %v831_v29 = vadd.f32 %v821_v35, %v810_v36  ;;  %v850_v39 = vrot.slane %v842_v1, 1  ;;  %v3802_v42 = vld [vmem:[%s4097_s3 + $0x8] sm:$0xff]  ;;  %v3803_v36 = vld [vmem:[%s4097_s3] sm:$0xff] }
 0x17e   : > { %v837_v54 = vadd.f32 %v4896_v13, %v829_v23  ;;  %v838_v60 = vadd.f32 %v834_v25, %v830_v48  ;;  %v863_v62 = vmul.f32 0.0010283801, %v4807_v12  ;;  %v851_v5 = vrot.slane %v843_v40, 1  ;;  %v7404_v40 = vld [vmem:[#allocation17_spill] sm:$0xff] }
 0x17f   : > { %v4957_v52 = vpop.permute.xlu1 %967  ;;  %v4959_v17 = vpop.permute.xlu0 %965  ;;  %v811_v7 = vadd.f32 %v803_v26, %v790_v41  ;;  %v839_v15 = vadd.f32 %v835_v43, %v831_v29  ;;  %v844_v58 = vmul.f32 0.007598758, %v4852_v9  ;;  %v870_v27 = vrot.slane %v862_v4, 2  ;;  %v7409_v35 = vld [vmem:[#allocation21_spill] sm:$0xff]  ;;  %v3804_v29 = vld [vmem:[%s4097_s3 + $0x18] sm:$0xff] }
 0x180   : > { %7400 = vst [vmem:[#allocation14_spill] sm:$0xff] %v4959_v17  ;;  %v836_v59 = vmul.f32 0.036000773, %v4852_v9  ;;  %v857_v13 = vadd.f32 %v849_v0, %v837_v54  ;;  %v858_v25 = vadd.f32 %v850_v39, %v838_v60  ;;  %v864_v2 = vmul.f32 0.0010283801, %v4852_v9  ;;  %v3805_v60 = vld [vmem:[%s4097_s3 + $0x10] sm:$0xff] }
 0x181   : > { %1267 = vrot.lane.b32.xlu1 %v4845_v8, %s3939_s21  ;;  %1265 = vrot.lane.b32.xlu0 %v4848_v61, %s3939_s21  ;;  %v832_v12 = vadd.f32 %v824_v55, %v811_v7  ;;  %v859_v33 = vadd.f32 %v851_v5, %v839_v15  ;;  %v871_v22 = vrot.slane %v863_v62, 2  ;;  %v852_v0 = vrot.slane %v844_v58, 1  ;;  %v3806_v58 = vld [vmem:[%s4097_s3 + $0x28] sm:$0xff] }
 0x182   : > { %v4982_v21 = vadd.f32 %v869_v6, %v857_v13  ;;  %v4984_v1 = vadd.f32 %v870_v27, %v858_v25  ;;  %v4991_v32 = vmul.f32 0.0010283801, %v7404_v40  ;;  %v4998_v26 = vmul.f32 0.0010283801, %v7405_v49  ;;  %v7410_v6 = vld [vmem:[#allocation22_spill] sm:$0xff]  ;;  %v3807_v13 = vld [vmem:[%s4097_s3 + $0x20] sm:$0xff] }
 0x183   : > { %v4973_v34 = vpop.permute.xlu1 %1003  ;;  %v4975_v38 = vpop.permute.xlu0 %1001  ;;  %v840_v16 = vadd.f32 %v836_v59, %v832_v12  ;;  %v4988_v4 = vadd.f32 %v871_v22, %v859_v33  ;;  %v872_v30 = vrot.slane %v864_v2, 2  ;;  %v5003_v45 = vmul.f32 %v3802_v42, %v3802_v42  ;;  %v3808_v22 = vld [vmem:[%s4097_s3 + $0x38] sm:$0xff]  ;;  %v3809_v40 = vld [vmem:[%s4097_s3 + $0x30] sm:$0xff] }
 0x184   : > { %7401 = vst [vmem:[#allocation35_spill] sm:$0xff] %v4982_v21  ;;  %7402 = vst [vmem:[#allocation36_spill] sm:$0xff] %v4984_v1  ;;  %v5008_v19 = vmul.f32 %v3803_v36, %v3803_v36  ;;  %v5013_v55 = vmul.f32 0.0010283801, %v7409_v35  ;;  %v5020_v43 = vmul.f32 0.0010283801, %v7410_v6  ;;  %v5028_v39 = vmul.f32 %v3804_v29, %v3804_v29 }
 0x185   : > { %1271 = vrot.lane.b32.xlu1 %v4903_v53, %s3939_s21  ;;  %1269 = vrot.lane.b32.xlu0 %v4889_v50, %s3939_s21  ;;  %7403 = vst [vmem:[#allocation25_spill] sm:$0xff] %v4988_v4  ;;  %v860_v20 = vadd.f32 %v852_v0, %v840_v16  ;;  %7406 = vst [vmem:[#allocation26_spill] sm:$0xff] %v5003_v45  ;;  %v5025_v41 = vmul.f32 0.007598758, %v5003_v45  ;;  %v5036_v62 = vmul.f32 %v3805_v60, %v3805_v60 }
 0x186   : > { %7407 = vst [vmem:[#allocation57_spill] sm:$0xff] %v5008_v19  ;;  %7412 = vst [vmem:[#allocation50_spill] sm:$0xff] %v5028_v39  ;;  %v5033_v54 = vmul.f32 0.007598758, %v5008_v19  ;;  %v5045_v15 = vmul.f32 0.007598758, %v5028_v39  ;;  %v5048_v27 = vmul.f32 %v3806_v58, %v3806_v58  ;;  %v5056_v25 = vmul.f32 %v3807_v13, %v3807_v13 }
 0x187   : > { %v4993_v9 = vpop.permute.xlu1 %1007  ;;  %v4995_v44 = vpop.permute.xlu0 %1005  ;;  %v5010_v63 = vadd.f32 %v872_v30, %v860_v20  ;;  %7411 = vst [vmem:[#allocation49_spill] sm:$0xff] %v5025_v41  ;;  %7414 = vst [vmem:[#allocation42_spill] sm:$0xff] %v5036_v62  ;;  %v5053_v59 = vmul.f32 0.007598758, %v5036_v62  ;;  %v5068_v16 = vmul.f32 %v3808_v22, %v3808_v22  ;;  %v5076_v49 = vmul.f32 %v3809_v40, %v3809_v40 }
 0x188   : > { %7413 = vst [vmem:[#allocation41_spill] sm:$0xff] %v5033_v54  ;;  %7416 = vst [vmem:[#allocation40_spill] sm:$0xff] %v5045_v15  ;;  %v5065_v2 = vmul.f32 0.007598758, %v5048_v27  ;;  %v5073_v0 = vmul.f32 0.007598758, %v5056_v25 }
 0x189   : > { %1275 = vrot.lane.b32.xlu1 %v4991_v32, %s3939_s21  ;;  %1273 = vrot.lane.b32.xlu0 %v4998_v26, %s3939_s21  ;;  %7408 = vst [vmem:[#allocation29_spill] sm:$0xff] %v5010_v63  ;;  %7417 = vst [vmem:[#allocation30_spill] sm:$0xff] %v5048_v27  ;;  %v5085_v42 = vmul.f32 0.007598758, %v5068_v16  ;;  %v5090_v36 = vmul.f32 0.007598758, %v5076_v49 }
 0x18a   : > { %7418 = vst [vmem:[#allocation43_spill] sm:$0xff] %v5053_v59  ;;  %7419 = vst [vmem:[#allocation58_spill] sm:$0xff] %v5056_v25  ;;  %v5099_v29 = vmul.f32 0.036000773, %v5003_v45  ;;  %v5104_v60 = vmul.f32 0.036000773, %v5008_v19 }
 0x18b   : > { %v5015_v23 = vpop.permute.xlu1 %1011  ;;  %v5017_v48 = vpop.permute.xlu0 %1009  ;;  %7420 = vst [vmem:[#allocation59_spill] sm:$0xff] %v5065_v2  ;;  %7421 = vst [vmem:[#allocation53_spill] sm:$0xff] %v5068_v16  ;;  %v5113_v22 = vmul.f32 0.036000773, %v5028_v39  ;;  %v5118_v40 = vmul.f32 0.036000773, %v5036_v62 }
 0x18c   : > { %7422 = vst [vmem:[#allocation54_spill] sm:$0xff] %v5073_v0  ;;  %7423 = vst [vmem:[#allocation55_spill] sm:$0xff] %v5076_v49  ;;  %v5127_v1 = vmul.f32 0.036000773, %v5048_v27  ;;  %v5188_v21 = vmul.f32 0.10936069, %v5056_v25 }
 0x18d   : > { %1279 = vrot.lane.b32.xlu1 %v5013_v55, %s3939_s21  ;;  %1277 = vrot.lane.b32.xlu0 %v5020_v43, %s3939_s21  ;;  %7424 = vst [vmem:[#allocation45_spill] sm:$0xff] %v5085_v42  ;;  %7425 = vst [vmem:[#allocation46_spill] sm:$0xff] %v5090_v36 }
 0x18e   : > { %7428 = vst [vmem:[#allocation61_spill] sm:$0xff] %v5099_v29  ;;  %7429 = vst [vmem:[#allocation47_spill] sm:$0xff] %v5104_v60 }
 0x18f   : > { %v5038_v5 = vpop.permute.xlu1 %1015  ;;  %v5040_v7 = vpop.permute.xlu0 %1013  ;;  %7432 = vst [vmem:[#allocation52_spill] sm:$0xff] %v5113_v22  ;;  %7433 = vst [vmem:[#allocation56_spill] sm:$0xff] %v5118_v40 }
 0x190   : > { %7415 = vst [vmem:[#allocation39_spill] sm:$0xff] %v5040_v7  ;;  %7434 = vst [vmem:[#allocation27_spill] sm:$0xff] %v5127_v1  ;;  %v5197_v7 = vmul.f32 0.10936069, %v5068_v16 }
 0x191   : > { %1571 = vrot.lane.b32.xlu1 %v5025_v41, %s3930_s18  ;;  %1569 = vrot.lane.b32.xlu0 %v5033_v54, %s3930_s18  ;;  %v5155_v41 = vmul.f32 0.10936069, %v5003_v45  ;;  %7447 = vst [vmem:[#allocation11_spill] sm:$0xff] %v5188_v21 }
 0x192   : > { %7450 = vst [vmem:[#allocation16_spill] sm:$0xff] %v5197_v7 }
 0x193   : > { %v5058_v12 = vpop.permute.xlu1 %1051  ;;  %v5060_v33 = vpop.permute.xlu0 %1049  ;;  %7440 = vst [vmem:[#allocation34_spill] sm:$0xff] %v5155_v41 }
 0x195   : > { %1575 = vrot.lane.b32.xlu1 %v5045_v15, %s3930_s18  ;;  %1573 = vrot.lane.b32.xlu0 %v5053_v59, %s3930_s18  ;;  %v5146_v59 = vmul.f32 0.036000773, %v5076_v49 }
 0x197   : > { %v5078_v20 = vpop.permute.xlu1 %1055  ;;  %v5080_v30 = vpop.permute.xlu0 %1053  ;;  %7437 = vst [vmem:[#allocation32_spill] sm:$0xff] %v5146_v59 }
 0x199   : > { %1579 = vrot.lane.b32.xlu1 %v5065_v2, %s3930_s18  ;;  %1577 = vrot.lane.b32.xlu0 %v5073_v0, %s3930_s18  ;;  %v5141_v2 = vmul.f32 0.036000773, %v5068_v16 }
 0x19b   : > { %v5092_v35 = vpop.permute.xlu1 %1059  ;;  %v5094_v6 = vpop.permute.xlu0 %1057  ;;  %7436 = vst [vmem:[#allocation31_spill] sm:$0xff] %v5141_v2 }
 0x19c   : > { %7426 = vst [vmem:[#allocation44_spill] sm:$0xff] %v5092_v35  ;;  %7427 = vst [vmem:[#allocation60_spill] sm:$0xff] %v5094_v6 }
 0x19d   : > { %1583 = vrot.lane.b32.xlu1 %v5085_v42, %s3930_s18  ;;  %1581 = vrot.lane.b32.xlu0 %v5090_v36, %s3930_s18  ;;  %v5132_v36 = vmul.f32 0.036000773, %v5056_v25 }
 0x19f   : > { %v5106_v58 = vpop.permute.xlu1 %1063  ;;  %v5108_v13 = vpop.permute.xlu0 %1061  ;;  %7435 = vst [vmem:[#allocation28_spill] sm:$0xff] %v5132_v36 }
 0x1a0   : > { %7430 = vst [vmem:[#allocation48_spill] sm:$0xff] %v5106_v58  ;;  %7431 = vst [vmem:[#allocation51_spill] sm:$0xff] %v5108_v13 }
 0x1a1   : > { %1619 = vrot.lane.b32.xlu1 %v5099_v29, %s3931_s16  ;;  %1617 = vrot.lane.b32.xlu0 %v5104_v60, %s3931_s16  ;;  %v5183_v29 = vmul.f32 0.10936069, %v5048_v27 }
 0x1a3   : > { %v5120_v63 = vpop.permute.xlu1 %1099  ;;  %v5122_v4 = vpop.permute.xlu0 %1097  ;;  %7446 = vst [vmem:[#allocation10_spill] sm:$0xff] %v5183_v29 }
 0x1a5   : > { %1623 = vrot.lane.b32.xlu1 %v5113_v22, %s3931_s16  ;;  %1621 = vrot.lane.b32.xlu0 %v5118_v40, %s3931_s16  ;;  %v5169_v22 = vmul.f32 0.10936069, %v5028_v39 }
 0x1a7   : > { %v5134_v42 = vpop.permute.xlu1 %1103  ;;  %v5136_v0 = vpop.permute.xlu0 %1101  ;;  %7444 = vst [vmem:[#allocation38_spill] sm:$0xff] %v5169_v22 }
 0x1a9   : > { %1627 = vrot.lane.b32.xlu1 %v5127_v1, %s3931_s16  ;;  %1625 = vrot.lane.b32.xlu0 %v5132_v36, %s3931_s16  ;;  %v5160_v1 = vmul.f32 0.10936069, %v5008_v19 }
 0x1ab   : > { %v5148_v15 = vpop.permute.xlu1 %1107  ;;  %v5150_v54 = vpop.permute.xlu0 %1105  ;;  %7441 = vst [vmem:[#allocation8_spill] sm:$0xff] %v5160_v1 }
 0x1ac   : > { %7438 = vst [vmem:[#allocation62_spill] sm:$0xff] %v5148_v15  ;;  %7439 = vst [vmem:[#allocation33_spill] sm:$0xff] %v5150_v54  ;;  %v1698_v54 = vmul.f32 0.21300554, %v5003_v45 }
 0x1ad   : > { %1631 = vrot.lane.b32.xlu1 %v5141_v2, %s3931_s16  ;;  %1629 = vrot.lane.b32.xlu0 %v5146_v59, %s3931_s16  ;;  %v5174_v2 = vmul.f32 0.10936069, %v5036_v62 }
 0x1af   : > { %v5162_v36 = vpop.permute.xlu1 %1111  ;;  %v5164_v40 = vpop.permute.xlu0 %1109  ;;  %7445 = vst [vmem:[#allocation13_spill] sm:$0xff] %v5174_v2 }
 0x1b0   : > { %7442 = vst [vmem:[#allocation9_spill] sm:$0xff] %v5162_v36  ;;  %7443 = vst [vmem:[#allocation37_spill] sm:$0xff] %v5164_v40 }
 0x1b1   : > { %1667 = vrot.lane.b32.xlu1 %v5155_v41, %s3932_s22  ;;  %1665 = vrot.lane.b32.xlu0 %v5160_v1, %s3932_s22  ;;  %v5236_v41 = vmul.f32 0.21300554, %v5068_v16 }
 0x1b3   : > { %v5176_v59 = vpop.permute.xlu1 %1131  ;;  %v5178_v60 = vpop.permute.xlu0 %1129 }
 0x1b5   : > { %1671 = vrot.lane.b32.xlu1 %v5169_v22, %s3932_s22  ;;  %1669 = vrot.lane.b32.xlu0 %v5174_v2, %s3932_s22  ;;  %v5202_v22 = vmul.f32 0.10936069, %v5076_v49 }
 0x1b7   : > { %v5190_v40 = vpop.permute.xlu1 %1135  ;;  %v5192_v13 = vpop.permute.xlu0 %1133  ;;  %7451 = vst [vmem:[#allocation19_spill] sm:$0xff] %v5202_v22 }
 0x1b8   : > { %7448 = vst [vmem:[#allocation12_spill] sm:$0xff] %v5190_v40  ;;  %7449 = vst [vmem:[#allocation15_spill] sm:$0xff] %v5192_v13  ;;  %v5240_v13 = vmul.f32 0.21300554, %v5076_v49 }
 0x1b9   : > { %1675 = vrot.lane.b32.xlu1 %v5183_v29, %s3932_s22  ;;  %1673 = vrot.lane.b32.xlu0 %v5188_v21, %s3932_s22  ;;  %v1697_v29 = vmul.f32 0.21300554, %v5008_v19 }
 0x1bb   : > { %v5204_v2 = vpop.permute.xlu1 %1139  ;;  %v5206_v36 = vpop.permute.xlu0 %1137 }
 0x1bc   : > { %7452 = vst [vmem:[#allocation20_spill] sm:$0xff] %v5204_v2  ;;  %7453 = vst [vmem:[#allocation23_spill] sm:$0xff] %v5206_v36  ;;  %v1700_v2 = vmul.f32 0.21300554, %v5028_v39  ;;  %v1699_v36 = vmul.f32 0.21300554, %v5036_v62 }
 0x1bd   : > { %1679 = vrot.lane.b32.xlu1 %v5197_v7, %s3932_s22  ;;  %1677 = vrot.lane.b32.xlu0 %v5202_v22, %s3932_s22  ;;  %v1702_v22 = vmul.f32 0.21300554, %v5048_v27 }
 0x1bf   : > { %v5214_v1 = vpop.permute.xlu1 %1143  ;;  %v5216_v21 = vpop.permute.xlu0 %1141 }
 0x1c0   : > { %7454 = vst [vmem:[#allocation24_spill] sm:$0xff] %v5214_v1  ;;  %7455 = vst [vmem:[#allocation17_spill] sm:$0xff] %v5216_v21  ;;  %v1701_v21 = vmul.f32 0.21300554, %v5056_v25 }
 0x1c1   : > { %1715 = vrot.lane.b32.xlu1 %v1698_v54, %s3933_s29  ;;  %1713 = vrot.lane.b32.xlu0 %v1697_v29, %s3933_s29 }
 0x1c3   : > { %v5222_v7 = vpop.permute.xlu1 %1163  ;;  %v5224_v15 = vpop.permute.xlu0 %1161 }
 0x1c4   : > { %7456 = vst [vmem:[#allocation18_spill] sm:$0xff] %v5224_v15 }
 0x1c5   : > { %1719 = vrot.lane.b32.xlu1 %v1700_v2, %s3933_s29  ;;  %1717 = vrot.lane.b32.xlu0 %v1699_v36, %s3933_s29 }
 0x1c7   : > { %v5230_v1 = vpop.permute.xlu1 %1167  ;;  %v5232_v17 = vpop.permute.xlu0 %1165 }
 0x1c8   : > { %7457 = vst [vmem:[#allocation21_spill] sm:$0xff] %v5230_v1  ;;  %7458 = vst [vmem:[#allocation22_spill] sm:$0xff] %v5232_v17  ;;  %v1746_v1 = vmul.f32 0.26601171, %v5003_v45  ;;  %v1745_v17 = vmul.f32 0.26601171, %v5008_v19 }
 0x1c9   : > { %1723 = vrot.lane.b32.xlu1 %v1702_v22, %s3933_s29  ;;  %1721 = vrot.lane.b32.xlu0 %v1701_v21, %s3933_s29  ;;  %v1750_v19 = vmul.f32 0.26601171, %v5048_v27 }
 0x1cb   : > { %v5242_v40 = vpop.permute.xlu1 %1171  ;;  %v5244_v58 = vpop.permute.xlu0 %1169 }
 0x1cc   : > { %7459 = vst [vmem:[#allocation63_spill] sm:$0xff] %v5242_v40  ;;  %7460 = vst [vmem:[#allocation64_spill] sm:$0xff] %v5244_v58  ;;  %v1748_v40 = vmul.f32 0.26601171, %v5028_v39  ;;  %v1747_v58 = vmul.f32 0.26601171, %v5036_v62 }
 0x1cd   : > { %1727 = vrot.lane.b32.xlu1 %v5236_v41, %s3933_s29  ;;  %1725 = vrot.lane.b32.xlu0 %v5240_v13, %s3933_s29  ;;  %v1751_v62 = vmul.f32 0.26601171, %v5076_v49 }
 0x1cf   : > { %v5252_v6 = vpop.permute.xlu1 %1175  ;;  %v5254_v15 = vpop.permute.xlu0 %1173 }
 0x1d0   : > { %7461 = vst [vmem:[#allocation65_spill] sm:$0xff] %v5252_v6  ;;  %7462 = vst [vmem:[#allocation66_spill] sm:$0xff] %v5254_v15  ;;  %v1749_v15 = vmul.f32 0.26601171, %v5056_v25 }
 0x1d1   : > { %1763 = vrot.lane.b32.xlu1 %v1746_v1, %s3934_s30  ;;  %1761 = vrot.lane.b32.xlu0 %v1745_v17, %s3934_s30  ;;  %v1752_v17 = vmul.f32 0.26601171, %v5068_v16  ;;  %v929_v16 = vadd.f32 %v4811_v18, %v4848_v61 }
 0x1d3   : > { %v5260_v35 = vpop.permute.xlu1 %1195  ;;  %v5262_v45 = vpop.permute.xlu0 %1193 }
 0x1d5   : > { %1767 = vrot.lane.b32.xlu1 %v1748_v40, %s3934_s30  ;;  %1765 = vrot.lane.b32.xlu0 %v1747_v58, %s3934_s30 }
 0x1d7   : > { %v5268_v6 = vpop.permute.xlu1 %1199  ;;  %v5270_v1 = vpop.permute.xlu0 %1197 }
 0x1d9   : > { %1771 = vrot.lane.b32.xlu1 %v1750_v19, %s3934_s30  ;;  %1769 = vrot.lane.b32.xlu0 %v1749_v15, %s3934_s30  ;;  %v930_v19 = vadd.f32 %v4809_v10, %v4845_v8  ;;  %v932_v10 = vadd.f32 %v4827_v56, %v4903_v53  ;;  %v931_v8 = vadd.f32 %v4829_v57, %v4889_v50 }
 0x1da   : > { %v934_v56 = vadd.f32 %v4854_v31, %v4991_v32  ;;  %v933_v50 = vadd.f32 %v4856_v37, %v4998_v26 }
 0x1db   : > { %v5276_v39 = vpop.permute.xlu1 %1203  ;;  %v5278_v40 = vpop.permute.xlu0 %1201 }
 0x1dc   : > { %v982_v31 = vadd.f32 %v4938_v47, %v934_v56  ;;  %v7476_v56 = vld [vmem:[#allocation22_spill] sm:$0xff] }
 0x1dd   : > { %1775 = vrot.lane.b32.xlu1 %v1752_v17, %s3934_s30  ;;  %1773 = vrot.lane.b32.xlu0 %v1751_v62, %s3934_s30  ;;  %v978_v17 = vadd.f32 %v4908_v3, %v930_v19  ;;  %v977_v62 = vadd.f32 %v4910_v11, %v929_v16  ;;  %v980_v3 = vadd.f32 %v4919_v24, %v932_v10  ;;  %v7473_v10 = vld [vmem:[#allocation33_spill] sm:$0xff] }
 0x1de   : > { %v979_v11 = vadd.f32 %v4921_v51, %v931_v8 }
 0x1df   : > { %v5282_v58 = vpop.permute.xlu1 %1207  ;;  %v5284_v25 = vpop.permute.xlu0 %1205  ;;  %v1026_v27 = vadd.f32 %v4973_v34, %v978_v17  ;;  %v1025_v18 = vadd.f32 %v4975_v38, %v977_v62  ;;  %v936_v34 = vadd.f32 %v4876_v46, %v5013_v55  ;;  %v1028_v24 = vadd.f32 %v4993_v9, %v980_v3  ;;  %v7472_v62 = vld [vmem:[#allocation8_spill] sm:$0xff]  ;;  %v7475_v3 = vld [vmem:[#allocation21_spill] sm:$0xff] }
 0x1e0   : > { %v1027_v51 = vadd.f32 %v4995_v44, %v979_v11  ;;  %v1030_v44 = vadd.f32 %v5015_v23, %v982_v31  ;;  %v935_v23 = vadd.f32 %v4878_v14, %v5020_v43  ;;  %v7470_v14 = vld [vmem:[#allocation14_spill] sm:$0xff] }
 0x1e1   : > { %1795 = vrot.lane.b32.xlu1 %v1698_v54, %s3935_s4  ;;  %1793 = vrot.lane.b32.xlu0 %v1697_v29, %s3935_s4  ;;  %v1074_v61 = vadd.f32 %v5058_v12, %v1026_v27  ;;  %v1073_v53 = vadd.f32 %v5060_v33, %v1025_v18  ;;  %v984_v37 = vadd.f32 %v4957_v52, %v936_v34  ;;  %v7464_v33 = vld [vmem:[#allocation18_spill] sm:$0xff]  ;;  %v7474_v18 = vld [vmem:[#allocation9_spill] sm:$0xff] }
 0x1e2   : > { %v1076_v46 = vadd.f32 %v5078_v20, %v1028_v24  ;;  %v1075_v9 = vadd.f32 %v5080_v30, %v1027_v51  ;;  %v983_v43 = vadd.f32 %v7470_v14, %v935_v23  ;;  %v7478_v24 = vld [vmem:[#allocation20_spill] sm:$0xff]  ;;  %v7484_v23 = vld [vmem:[#allocation63_spill] sm:$0xff] }
 0x1e3   : > { %v1228_v15 = vpop.permute.xlu1 %1227  ;;  %v5290_v49 = vpop.permute.xlu0 %1225  ;;  %v1122_v57 = vadd.f32 %v5120_v63, %v1074_v61  ;;  %v1121_v32 = vadd.f32 %v5122_v4, %v1073_v53  ;;  %v1032_v52 = vadd.f32 %v5038_v5, %v984_v37  ;;  %v7466_v5 = vld [vmem:[#allocation48_spill] sm:$0xff] }
 0x1e4   : > { %v1124_v26 = vadd.f32 %v5134_v42, %v1076_v46  ;;  %v1123_v55 = vadd.f32 %v5136_v0, %v1075_v9  ;;  %v7467_v42 = vld [vmem:[#allocation12_spill] sm:$0xff]  ;;  %v7468_v0 = vld [vmem:[#allocation15_spill] sm:$0xff] }
 0x1e5   : > { %1799 = vrot.lane.b32.xlu1 %v1700_v2, %s3935_s4  ;;  %1797 = vrot.lane.b32.xlu0 %v1699_v36, %s3935_s4  ;;  %v1154_v63 = vadd.f32 %v5176_v59, %v1122_v57  ;;  %v1153_v47 = vadd.f32 %v5178_v60, %v1121_v32  ;;  %v1080_v30 = vadd.f32 %v7466_v5, %v1032_v52  ;;  %v7479_v32 = vld [vmem:[#allocation23_spill] sm:$0xff]  ;;  %v7482_v52 = vld [vmem:[#allocation13_spill] sm:$0xff] }
 0x1e6   : > { %v1156_v36 = vadd.f32 %v7467_v42, %v1124_v26  ;;  %v1155_v60 = vadd.f32 %v7468_v0, %v1123_v55  ;;  %v7483_v26 = vld [vmem:[#allocation51_spill] sm:$0xff]  ;;  %v7487_v0 = vld [vmem:[#allocation10_spill] sm:$0xff] }
 0x1e7   : > { %v5303_v54 = vpop.permute.xlu1 %1231  ;;  %v5305_v29 = vpop.permute.xlu0 %1229  ;;  %v1186_v4 = vadd.f32 %v5222_v7, %v1154_v63  ;;  %v1185_v7 = vadd.f32 %v7464_v33, %v1153_v47  ;;  %v1128_v61 = vadd.f32 %v7474_v18, %v1080_v30  ;;  %v7486_v33 = vld [vmem:[#allocation65_spill] sm:$0xff] }
 0x1e8   : > { %v1188_v11 = vadd.f32 %v7475_v3, %v1156_v36  ;;  %v1187_v53 = vadd.f32 %v7476_v56, %v1155_v60 }
 0x1e9   : > { %1803 = vrot.lane.b32.xlu1 %v1702_v22, %s3935_s4  ;;  %1801 = vrot.lane.b32.xlu0 %v1701_v21, %s3935_s4  ;;  %v981_v21 = vadd.f32 %v4940_v28, %v933_v50  ;;  %v1218_v2 = vadd.f32 %v5260_v35, %v1186_v4  ;;  %v7471_v22 = vld [vmem:[#allocation62_spill] sm:$0xff]  ;;  %v1217_v17 = vadd.f32 %v5262_v45, %v1185_v7  ;;  %v7477_v50 = vld [vmem:[#allocation39_spill] sm:$0xff] }
 0x1ea   : > { %v1031_v34 = vadd.f32 %v7477_v50, %v983_v43  ;;  %v1220_v46 = vadd.f32 %v5268_v6, %v1188_v11  ;;  %v1219_v9 = vadd.f32 %v5270_v1, %v1187_v53  ;;  %v7485_v1 = vld [vmem:[#allocation64_spill] sm:$0xff] }
 0x1eb   : > { %v5323_v38 = vpop.permute.xlu1 %1235  ;;  %v5328_v27 = vpop.permute.xlu0 %1233  ;;  %v1029_v28 = vadd.f32 %v5017_v48, %v981_v21  ;;  %v7465_v48 = vld [vmem:[#allocation60_spill] sm:$0xff]  ;;  %v1250_v35 = vadd.f32 %v1228_v15, %v1218_v2  ;;  %v1249_v31 = vadd.f32 %v5290_v49, %v1217_v17 }
 0x1ec   : > { %v7480_v21 = vld [vmem:[#allocation24_spill] sm:$0xff]  ;;  %v1079_v55 = vadd.f32 %v7483_v26, %v1031_v34  ;;  %v1252_v2 = vadd.f32 %v5303_v54, %v1220_v46 }
 0x1ed   : > { %1807 = vrot.lane.b32.xlu1 %v5236_v41, %s3935_s4  ;;  %1805 = vrot.lane.b32.xlu0 %v5240_v13, %s3935_s4  ;;  %v7463_v41 = vld [vmem:[#allocation44_spill] sm:$0xff]  ;;  %v1077_v20 = vadd.f32 %v7465_v48, %v1029_v28  ;;  %v7469_v13 = vld [vmem:[#allocation34_spill] sm:$0xff]  ;;  %v1160_v37 = vadd.f32 %v7480_v21, %v1128_v61  ;;  %v1251_v48 = vadd.f32 %v5305_v29, %v1219_v9 }
 0x1ee   : > { %v1078_v12 = vadd.f32 %v7463_v41, %v1030_v44  ;;  %v7481_v44 = vld [vmem:[#allocation38_spill] sm:$0xff] }
 0x1ef   : > { %v5345_v59 = vpop.permute.xlu1 %1239  ;;  %v5352_v16 = vpop.permute.xlu0 %1237  ;;  %v1125_v8 = vadd.f32 %v7473_v10, %v1077_v20  ;;  %v1192_v7 = vadd.f32 %v7486_v33, %v1160_v37  ;;  %v7491_v37 = vld [vmem:[#allocation37_spill] sm:$0xff] }
 0x1f0   : > { %v1126_v19 = vadd.f32 %v7471_v22, %v1078_v12  ;;  %v7488_v22 = vld [vmem:[#allocation11_spill] sm:$0xff]  ;;  %v1127_v46 = vadd.f32 %v7491_v37, %v1079_v55 }
 0x1f1   : > { %1827 = vrot.lane.b32.xlu1 %v7469_v13, %s3936_s24  ;;  %1825 = vrot.lane.b32.xlu0 %v7472_v62, %s3936_s24  ;;  %v1157_v63 = vadd.f32 %v7479_v32, %v1125_v8 }
 0x1f2   : > { %v1158_v51 = vadd.f32 %v7478_v24, %v1126_v19 }
 0x1f3   : > { %v1268_v57 = vpop.permute.xlu1 %1267  ;;  %v1266_v15 = vpop.permute.xlu0 %1265  ;;  %v1189_v12 = vadd.f32 %v7485_v1, %v1157_v63 }
 0x1f4   : > { %v5372_v45 = vadd.f32 %v1268_v57, %v1250_v35  ;;  %v1289_v28 = vadd.f32 %v1266_v15, %v1249_v31  ;;  %v1190_v6 = vadd.f32 %v7484_v23, %v1158_v51  ;;  %v7489_v57 = vld [vmem:[#allocation16_spill] sm:$0xff]  ;;  %v7490_v51 = vld [vmem:[#allocation19_spill] sm:$0xff]  ;;  %v7494_v23 = vld [vmem:[#allocation61_spill] sm:$0xff] }
 0x1f5   : > { %1831 = vrot.lane.b32.xlu1 %v7481_v44, %s3936_s24  ;;  %1829 = vrot.lane.b32.xlu0 %v7482_v52, %s3936_s24  ;;  %v1221_v31 = vadd.f32 %v5278_v40, %v1189_v12  ;;  %v7495_v12 = vld [vmem:[#allocation47_spill] sm:$0xff] }
 0x1f6   : > { %v5381_v47 = vmul.f32 0.10936069, %v5372_v45  ;;  %v1378_v4 = vmul.f32 0.21300554, %v5372_v45  ;;  %v1414_v49 = vmul.f32 0.26601171, %v5372_v45  ;;  %v1222_v54 = vadd.f32 %v5276_v39, %v1190_v6 }
 0x1f7   : > { %v1272_v41 = vpop.permute.xlu1 %1271  ;;  %v1270_v20 = vpop.permute.xlu0 %1269  ;;  %v1301_v60 = vmul.f32 0.007598758, %v1289_v28  ;;  %v1321_v13 = vmul.f32 0.036000773, %v1289_v28  ;;  %v5396_v14 = vmul.f32 0.10936069, %v1289_v28  ;;  %v1253_v52 = vadd.f32 %v5328_v27, %v1221_v31 }
 0x1f8   : > { %v1358_v5 = vrot.slane %v5381_v47, 3  ;;  %v1394_v30 = vrot.slane %v1378_v4, 4  ;;  %v1430_v42 = vrot.slane %v1414_v49, 5  ;;  %v1450_v36 = vrot.slane %v1378_v4, 6  ;;  %v7492_v4 = vld [vmem:[#allocation35_spill] sm:$0xff] }
 0x1f9   : > { %1835 = vrot.lane.b32.xlu1 %v7487_v0, %s3936_s24  ;;  %v5398_v43 = vadd.f32 %v1272_v41, %v1252_v2  ;;  %1833 = vrot.lane.b32.xlu0 %v7488_v22, %s3936_s24  ;;  %v1297_v29 = vmul.f32 0.0010283801, %v1289_v28  ;;  %v1377_v19 = vmul.f32 0.21300554, %v1289_v28  ;;  %v1413_v17 = vmul.f32 0.26601171, %v1289_v28 }
 0x1fa   : > { %v1309_v62 = vrot.slane %v1301_v60, 1  ;;  %v1329_v10 = vrot.slane %v1321_v13, 2  ;;  %v1357_v8 = vrot.slane %v5396_v14, 3  ;;  %v1291_v18 = vadd.f32 %v1270_v20, %v1251_v48  ;;  %v7496_v13 = vld [vmem:[#allocation52_spill] sm:$0xff] }
 0x1fb   : > { %v1276_v35 = vpop.permute.xlu1 %1275  ;;  %v1274_v61 = vpop.permute.xlu0 %1273  ;;  %v1393_v3 = vrot.slane %v1377_v19, 4  ;;  %v1429_v11 = vrot.slane %v1413_v17, 5  ;;  %v1449_v56 = vrot.slane %v1377_v19, 6  ;;  %v5405_v53 = vmul.f32 0.10936069, %v5398_v43  ;;  %v7497_v17 = vld [vmem:[#allocation56_spill] sm:$0xff] }
 0x1fc   : > { %v1317_v39 = vadd.f32 %v1309_v62, %v1297_v29  ;;  %v1359_v50 = vsel %vm696_vm0, %v1357_v8, %v1358_v5  ;;  %v1380_v34 = vmul.f32 0.21300554, %v5398_v43  ;;  %v1416_v24 = vmul.f32 0.26601171, %v5398_v43 }
 0x1fd   : > { %1839 = vrot.lane.b32.xlu1 %v7489_v57, %s3936_s24  ;;  %1837 = vrot.lane.b32.xlu0 %v7490_v51, %s3936_s24  ;;  %v1395_v15 = vsel %vm733_vm1, %v1393_v3, %v1394_v30  ;;  %v1431_v32 = vsel %vm770_vm2, %v1429_v11, %v1430_v42  ;;  %v5418_v63 = vsel %vm791_vm3, %v1449_v56, %v1450_v36  ;;  %v1361_v26 = vrot.slane %v5405_v53, 3  ;;  %v7499_v51 = vld [vmem:[#allocation57_spill] sm:$0xff] }
 0x1fe   : > { %v1337_v9 = vadd.f32 %v1329_v10, %v1317_v39  ;;  %v5425_v49 = vmul.f32 %v7492_v4, %v7492_v4  ;;  %v1224_v28 = vadd.f32 %v5282_v58, %v1192_v7  ;;  %v1254_v40 = vadd.f32 %v5323_v38, %v1222_v54 }
 0x1ff   : > { %v1280_v21 = vpop.permute.xlu1 %1279  ;;  %v5421_v44 = vpop.permute.xlu0 %1277  ;;  %v1397_v55 = vrot.slane %v1380_v34, 4  ;;  %v1433_v41 = vrot.slane %v1416_v24, 5  ;;  %v1302_v1 = vmul.f32 0.007598758, %v1291_v18  ;;  %v1453_v33 = vrot.slane %v1380_v34, 6 }
 0x200   : > { %7493 = vst [vmem:[#allocation44_spill] sm:$0xff] %v5425_v49  ;;  %v1373_v6 = vadd.f32 %v1359_v50, %v1337_v9  ;;  %v1322_v2 = vmul.f32 0.036000773, %v1291_v18  ;;  %v5435_v48 = vmul.f32 0.10936069, %v1291_v18  ;;  %v5437_v58 = vadd.f32 %v1276_v35, %v1254_v40  ;;  %v7502_v9 = vld [vmem:[#allocation26_spill] sm:$0xff] }
 0x201   : > { %1859 = vrot.lane.b32.xlu1 %v7494_v23, %s3937_s26  ;;  %1857 = vrot.lane.b32.xlu0 %v7495_v12, %s3937_s26  ;;  %v1298_v7 = vmul.f32 0.0010283801, %v1291_v18  ;;  %v1310_v20 = vrot.slane %v1302_v1, 1  ;;  %v1379_v5 = vmul.f32 0.21300554, %v1291_v18  ;;  %v1293_v60 = vadd.f32 %v1274_v61, %v1253_v52  ;;  %v7498_v61 = vld [vmem:[#allocation17_spill] sm:$0xff] }
 0x202   : > { %v1409_v27 = vadd.f32 %v1395_v15, %v1373_v6  ;;  %v1330_v42 = vrot.slane %v1322_v2, 2  ;;  %v1360_v36 = vrot.slane %v5435_v48, 3  ;;  %v1415_v0 = vmul.f32 0.26601171, %v1291_v18  ;;  %v7500_v15 = vld [vmem:[#allocation27_spill] sm:$0xff]  ;;  %v7503_v52 = vld [vmem:[#allocation50_spill] sm:$0xff] }
 0x203   : > { %v5439_v38 = vpop.permute.xlu1 %1571  ;;  %v5441_v30 = vpop.permute.xlu0 %1569  ;;  %v1318_v54 = vadd.f32 %v1310_v20, %v1298_v7  ;;  %v1396_v29 = vrot.slane %v1379_v5, 4  ;;  %v1452_v19 = vrot.slane %v1379_v5, 6  ;;  %v5452_v10 = vmul.f32 0.10936069, %v5437_v58 }
 0x204   : > { %v5446_v22 = vadd.f32 %v1431_v32, %v1409_v27  ;;  %v1362_v35 = vsel %vm696_vm0, %v1360_v36, %v1361_v26  ;;  %v1432_v62 = vrot.slane %v1415_v0, 5  ;;  %v5455_v8 = vmul.f32 0.21300554, %v5437_v58  ;;  %v7501_v32 = vld [vmem:[#allocation66_spill] sm:$0xff]  ;;  %v7505_v36 = vld [vmem:[#allocation31_spill] sm:$0xff] }
 0x205   : > { %1863 = vrot.lane.b32.xlu1 %v7496_v13, %s3937_s26  ;;  %1861 = vrot.lane.b32.xlu0 %v7497_v17, %s3937_s26  ;;  %v1159_v3 = vadd.f32 %v7498_v61, %v1127_v46  ;;  %v1338_v11 = vadd.f32 %v1330_v42, %v1318_v54  ;;  %v1398_v56 = vsel %vm733_vm1, %v1396_v29, %v1397_v55  ;;  %v1418_v24 = vmul.f32 0.26601171, %v5437_v58  ;;  %v7506_v29 = vld [vmem:[#allocation32_spill] sm:$0xff] }
 0x206   : > { %v5462_v57 = vsel %vm791_vm3, %v1452_v19, %v1453_v33  ;;  %v1256_v50 = vadd.f32 %v5345_v59, %v1224_v28  ;;  %v1434_v34 = vsel %vm770_vm2, %v1432_v62, %v1433_v41  ;;  %v5470_v31 = vmul.f32 0.0010283801, %v7499_v51  ;;  %v7504_v59 = vld [vmem:[#allocation28_spill] sm:$0xff] }
 0x207   : > { %v5457_v18 = vpop.permute.xlu1 %1575  ;;  %v5464_v39 = vpop.permute.xlu0 %1573  ;;  %v1191_v37 = vadd.f32 %v7501_v32, %v1159_v3  ;;  %v1374_v46 = vadd.f32 %v1362_v35, %v1338_v11  ;;  %v5476_v40 = vmul.f32 0.0010283801, %v7502_v9  ;;  %v5479_v26 = vmul.f32 0.0010283801, %v7503_v52  ;;  %v7508_v9 = vld [vmem:[#allocation41_spill] sm:$0xff] }
 0x208   : > { %v1364_v28 = vrot.slane %v5452_v10, 3  ;;  %v1400_v23 = vrot.slane %v5455_v8, 4  ;;  %v1303_v6 = vmul.f32 0.007598758, %v1293_v60  ;;  %v5485_v55 = vadd.f32 %v1280_v21, %v1256_v50 }
 0x209   : > { %1867 = vrot.lane.b32.xlu1 %v7500_v15, %s3937_s26  ;;  %1865 = vrot.lane.b32.xlu0 %v7504_v59, %s3937_s26  ;;  %v1410_v1 = vadd.f32 %v1398_v56, %v1374_v46  ;;  %v1323_v12 = vmul.f32 0.036000773, %v1293_v60  ;;  %v5489_v33 = vmul.f32 0.10936069, %v1293_v60  ;;  %v5491_v2 = vmul.f32 0.21300554, %v1293_v60 }
 0x20a   : > { %v1436_v7 = vrot.slane %v1418_v24, 5  ;;  %v1299_v20 = vmul.f32 0.0010283801, %v1293_v60  ;;  %v1311_v5 = vrot.slane %v1303_v6, 1  ;;  %v1417_v42 = vmul.f32 0.26601171, %v1293_v60 }
 0x20b   : > { %v5487_v41 = vpop.permute.xlu1 %1579  ;;  %v5493_v27 = vpop.permute.xlu0 %1577  ;;  %v1223_v21 = vadd.f32 %v5284_v25, %v1191_v37  ;;  %v5498_v0 = vadd.f32 %v1434_v34, %v1410_v1  ;;  %v1363_v13 = vrot.slane %v5489_v33, 3  ;;  %v1399_v54 = vrot.slane %v5491_v2, 4  ;;  %v7507_v15 = vld [vmem:[#allocation49_spill] sm:$0xff] }
 0x20c   : > { %v1319_v19 = vadd.f32 %v1311_v5, %v1299_v20  ;;  %v1331_v17 = vrot.slane %v1323_v12, 2  ;;  %v1435_v35 = vrot.slane %v1417_v42, 5  ;;  %v5505_v62 = vmul.f32 0.10936069, %v5485_v55 }
 0x20d   : > { %1871 = vrot.lane.b32.xlu1 %v7505_v36, %s3937_s26  ;;  %1869 = vrot.lane.b32.xlu0 %v7506_v29, %s3937_s26  ;;  %v1255_v61 = vadd.f32 %v5352_v16, %v1223_v21  ;;  %v1365_v25 = vsel %vm696_vm0, %v1363_v13, %v1364_v28  ;;  %v1401_v3 = vsel %vm733_vm1, %v1399_v54, %v1400_v23  ;;  %v5513_v11 = vmul.f32 0.21300554, %v5485_v55  ;;  %v7510_v29 = vld [vmem:[#allocation43_spill] sm:$0xff] }
 0x20e   : > { %v5518_v50 = vmul.f32 0.036000773, %v5372_v45  ;;  %v1339_v34 = vadd.f32 %v1331_v17, %v1319_v19  ;;  %v1437_v24 = vsel %vm770_vm2, %v1435_v35, %v1436_v7  ;;  %v1420_v51 = vmul.f32 0.26601171, %v5485_v55 }
 0x20f   : > { %v5507_v60 = vpop.permute.xlu1 %1583  ;;  %v5515_v56 = vpop.permute.xlu0 %1581  ;;  %v1470_v16 = vrot.slane %v5381_v47, 7  ;;  %v5526_v32 = vmul.f32 0.007598758, %v5372_v45  ;;  %v5529_v37 = vmul.f32 0.0010283801, %v5372_v45  ;;  %v1295_v46 = vadd.f32 %v5421_v44, %v1255_v61 }
 0x210   : > { %v1469_v52 = vrot.slane %v5396_v14, 7  ;;  %v1473_v59 = vrot.slane %v5405_v53, 7  ;;  %v1375_v28 = vadd.f32 %v1365_v25, %v1339_v34  ;;  %v1367_v23 = vrot.slane %v5505_v62, 3  ;;  %v7509_v14 = vld [vmem:[#allocation40_spill] sm:$0xff] }
 0x211   : > { %1891 = vrot.lane.b32.xlu1 %v7507_v15, %s3938_s12  ;;  %1889 = vrot.lane.b32.xlu0 %v7508_v9, %s3938_s12  ;;  %v1403_v1 = vrot.slane %v5513_v11, 4  ;;  %v1439_v12 = vrot.slane %v1420_v51, 5  ;;  %v1304_v7 = vmul.f32 0.007598758, %v1295_v46  ;;  %v1324_v45 = vmul.f32 0.036000773, %v1295_v46 }
 0x212   : > { %v1411_v44 = vadd.f32 %v1401_v3, %v1375_v28  ;;  %v1347_v5 = vmul.f32 0.10936069, %v1295_v46  ;;  %v1383_v42 = vmul.f32 0.21300554, %v1295_v46  ;;  %v1419_v36 = vmul.f32 0.26601171, %v1295_v46 }
 0x213   : > { %v5537_v6 = vpop.permute.xlu1 %1619  ;;  %v5540_v20 = vpop.permute.xlu0 %1617  ;;  %v1456_v53 = vrot.slane %v5455_v8, 6  ;;  %v1455_v21 = vrot.slane %v5491_v2, 6  ;;  %v1300_v13 = vmul.f32 0.0010283801, %v1295_v46  ;;  %v1312_v54 = vrot.slane %v1304_v7, 1  ;;  %v7511_v28 = vld [vmem:[#allocation59_spill] sm:$0xff] }
 0x214   : > { %v1447_v19 = vadd.f32 %v1437_v24, %v1411_v44  ;;  %v1366_v17 = vrot.slane %v1347_v5, 3  ;;  %v1402_v35 = vrot.slane %v1383_v42, 4  ;;  %v1438_v61 = vrot.slane %v1419_v36, 5 }
 0x215   : > { %1895 = vrot.lane.b32.xlu1 %v7509_v14, %s3938_s12  ;;  %1893 = vrot.lane.b32.xlu0 %v7510_v29, %s3938_s12  ;;  %v1459_v3 = vrot.slane %v5513_v11, 6  ;;  %v1320_v34 = vadd.f32 %v1312_v54, %v1300_v13  ;;  %v1332_v51 = vrot.slane %v1324_v45, 2  ;;  %v1458_v15 = vrot.slane %v1383_v42, 6  ;;  %v7512_v42 = vld [vmem:[#allocation54_spill] sm:$0xff] }
 0x216   : > { %v1490_v8 = vmul.f32 0.036000773, %v5398_v43  ;;  %v1368_v2 = vsel %vm696_vm0, %v1366_v17, %v1367_v23  ;;  %v1404_v46 = vsel %vm733_vm1, %v1402_v35, %v1403_v1  ;;  %v1440_v24 = vsel %vm770_vm2, %v1438_v61, %v1439_v12  ;;  %v7513_v17 = vld [vmem:[#allocation45_spill] sm:$0xff]  ;;  %v7514_v61 = vld [vmem:[#allocation46_spill] sm:$0xff] }
 0x217   : > { %v5548_v25 = vpop.permute.xlu1 %1623  ;;  %v5551_v9 = vpop.permute.xlu0 %1621  ;;  %v1472_v7 = vrot.slane %v5435_v48, 7  ;;  %v1476_v11 = vrot.slane %v5452_v10, 7  ;;  %v1475_v45 = vrot.slane %v5489_v33, 7  ;;  %v1340_v44 = vadd.f32 %v1332_v51, %v1320_v34 }
 0x218   : > { %v1498_v36 = vmul.f32 0.007598758, %v5398_v43  ;;  %v1518_v23 = vmul.f32 0.0010283801, %v5398_v43  ;;  %v1479_v1 = vrot.slane %v5505_v62, 7  ;;  %v1478_v12 = vrot.slane %v1347_v5, 7 }
 0x219   : > { %1899 = vrot.lane.b32.xlu1 %v7511_v28, %s3938_s12  ;;  %1897 = vrot.lane.b32.xlu0 %v7512_v42, %s3938_s12  ;;  %v1491_v13 = vmul.f32 0.036000773, %v5437_v58  ;;  %v1376_v48 = vadd.f32 %v1368_v2, %v1340_v44  ;;  %v1457_v10 = vsel %vm791_vm3, %v1455_v21, %v1456_v53  ;;  %v1460_v33 = vsel %vm791_vm3, %v1458_v15, %v1459_v3 }
 0x21a   : > { %v1499_v29 = vmul.f32 0.007598758, %v5437_v58  ;;  %v1465_v43 = vadd.f32 %v5418_v63, %v5446_v22  ;;  %v1466_v62 = vadd.f32 %v5462_v57, %v5498_v0  ;;  %v1467_v5 = vadd.f32 %v1457_v10, %v1447_v19  ;;  %v7516_v10 = vld [vmem:[#allocation36_spill] sm:$0xff] }
 0x21b   : > { %v5567_v14 = vpop.permute.xlu1 %1627  ;;  %v5570_v54 = vpop.permute.xlu0 %1625  ;;  %v1412_v35 = vadd.f32 %v1404_v46, %v1376_v48  ;;  %v1471_v53 = vsel %vm812_vm4, %v1469_v52, %v1470_v16  ;;  %v1474_v21 = vsel %vm812_vm4, %v1472_v7, %v1473_v59  ;;  %v1477_v3 = vsel %vm812_vm4, %v1475_v45, %v1476_v11 }
 0x21c   : > { %v1480_v63 = vsel %vm812_vm4, %v1478_v12, %v1479_v1  ;;  %v1485_v22 = vadd.f32 %v1471_v53, %v1465_v43  ;;  %v1486_v51 = vadd.f32 %v1474_v21, %v1466_v62  ;;  %v1487_v57 = vadd.f32 %v1477_v3, %v1467_v5 }
 0x21d   : > { %1903 = vrot.lane.b32.xlu1 %v7513_v17, %s3938_s12  ;;  %1901 = vrot.lane.b32.xlu0 %v7514_v61, %s3938_s12  ;;  %v1505_v0 = vrot.slane %v5526_v32, 1  ;;  %v1506_v19 = vrot.slane %v1498_v36, 1  ;;  %v1448_v2 = vadd.f32 %v1440_v24, %v1412_v35  ;;  %v1519_v47 = vmul.f32 0.0010283801, %v5437_v58  ;;  %v7521_v35 = vld [vmem:[#allocation58_spill] sm:$0xff] }
 0x21e   : > { %v1507_v16 = vrot.slane %v1499_v29, 1  ;;  %v1493_v52 = vadd.f32 %v5518_v50, %v1485_v22  ;;  %v1494_v59 = vadd.f32 %v1490_v8, %v1486_v51  ;;  %v1495_v46 = vadd.f32 %v1491_v13, %v1487_v57  ;;  %v7515_v50 = vld [vmem:[#allocation42_spill] sm:$0xff] }
 0x21f   : > { %v5588_v34 = vpop.permute.xlu1 %1631  ;;  %v5592_v15 = vpop.permute.xlu0 %1629  ;;  %v1525_v28 = vrot.slane %v5529_v37, 2  ;;  %v1526_v7 = vrot.slane %v1518_v23, 2  ;;  %v1468_v32 = vadd.f32 %v1460_v33, %v1448_v2  ;;  %v1500_v11 = vmul.f32 0.007598758, %v5485_v55  ;;  %v7518_v29 = vld [vmem:[#allocation30_spill] sm:$0xff]  ;;  %v5648_v2 = vld [vmem:[%s4103_s27 + $0x8] sm:$0xff] }
 0x220   : > { %v1513_v58 = vadd.f32 %v1505_v0, %v1493_v52  ;;  %v1514_v45 = vadd.f32 %v1506_v19, %v1494_v59  ;;  %v1515_v44 = vadd.f32 %v1507_v16, %v1495_v46  ;;  %v1527_v42 = vrot.slane %v1519_v47, 2  ;;  %7527 = vst [vmem:[#allocation62_spill] sm:$0xff] %v5648_v2  ;;  %v5668_v59 = vld [vmem:[%s4103_s27] sm:$0xff] }
 0x221   : > { %1931 = vrot.lane.b32.xlu1 %v5476_v40, %s3939_s21  ;;  %1929 = vrot.lane.b32.xlu0 %v5470_v31, %s3939_s21  ;;  %v1492_v36 = vmul.f32 0.036000773, %v5485_v55  ;;  %v5606_v8 = vmul.f32 0.0010283801, %v7515_v50  ;;  %v1488_v37 = vadd.f32 %v1480_v63, %v1468_v32  ;;  %v1520_v23 = vmul.f32 0.0010283801, %v5485_v55 }
 0x222   : > { %v1533_v12 = vadd.f32 %v1525_v28, %v1513_v58  ;;  %v1534_v13 = vadd.f32 %v1526_v7, %v1514_v45  ;;  %v1535_v48 = vadd.f32 %v1527_v42, %v1515_v44  ;;  %v5615_v33 = vmul.f32 %v7516_v10, %v7516_v10  ;;  %v7519_v55 = vld [vmem:[#allocation25_spill] sm:$0xff]  ;;  %7532 = vst [vmem:[#allocation22_spill] sm:$0xff] %v5668_v59  ;;  %v7536_v45 = vld [vmem:[#allocation55_spill] sm:$0xff] }
 0x223   : > { %v5602_v24 = vpop.permute.xlu1 %1667  ;;  %v5608_v1 = vpop.permute.xlu0 %1665  ;;  %v5618_v17 = vmul.f32 0.0010283801, %v7518_v29  ;;  %v1496_v43 = vadd.f32 %v1492_v36, %v1488_v37  ;;  %v1508_v62 = vrot.slane %v1500_v11, 1  ;;  %v5624_v5 = vmul.f32 %v7519_v55, %v7519_v55  ;;  %v7535_v32 = vld [vmem:[#allocation53_spill] sm:$0xff]  ;;  %v5715_v29 = vld [vmem:[%s4103_s27 + $0x10] sm:$0xff] }
 0x224   : > { %7517 = vst [vmem:[#allocation18_spill] sm:$0xff] %v5615_v33  ;;  %v5627_v61 = vmul.f32 0.0010283801, %v7521_v35  ;;  %v5631_v21 = vmul.f32 %v1533_v12, %v1533_v12  ;;  %v5633_v3 = vmul.f32 %v1534_v13, %v1534_v13  ;;  %v5635_v63 = vmul.f32 %v1535_v48, %v1535_v48  ;;  %v7537_v36 = vld [vmem:[#allocation29_spill] sm:$0xff]  ;;  %7545 = vst [vmem:[#allocation65_spill] sm:$0xff] %v5715_v29 }
 0x225   : > { %1935 = vrot.lane.b32.xlu1 %v5479_v26, %s3939_s21  ;;  %1933 = vrot.lane.b32.xlu0 %v5606_v8, %s3939_s21  ;;  %7520 = vst [vmem:[#allocation60_spill] sm:$0xff] %v5624_v5  ;;  %v1516_v51 = vadd.f32 %v1508_v62, %v1496_v43  ;;  %v1528_v57 = vrot.slane %v1520_v23, 2  ;;  %v5640_v0 = vmul.f32 %v1533_v12, %v7492_v4  ;;  %v5679_v11 = vmul.f32 0.0010283801, %v7535_v32 }
 0x226   : > { %7522 = vst [vmem:[#allocation48_spill] sm:$0xff] %v5631_v21  ;;  %7523 = vst [vmem:[#allocation12_spill] sm:$0xff] %v5633_v3  ;;  %v5643_v19 = vmul.f32 %v1534_v13, %v7516_v10  ;;  %v5652_v47 = vmul.f32 %v5648_v2, %v5648_v2  ;;  %v5655_v16 = vmul.f32 %v1535_v48, %v7519_v55  ;;  %v5684_v44 = vmul.f32 0.0010283801, %v7536_v45  ;;  %v5703_v13 = vld [vmem:[%s4103_s27 + $0x18] sm:$0xff]  ;;  %v5747_v45 = vld [vmem:[%s4103_s27 + $0x20] sm:$0xff] }
 0x227   : > { %v5629_v53 = vpop.permute.xlu1 %1671  ;;  %7524 = vst [vmem:[#allocation15_spill] sm:$0xff] %v5635_v63  ;;  %v5637_v22 = vpop.permute.xlu0 %1669  ;;  %7525 = vst [vmem:[#allocation34_spill] sm:$0xff] %v5640_v0  ;;  %v5659_v52 = vadd.f32 %v5631_v21, %v5425_v49  ;;  %v5663_v4 = vadd.f32 %v5633_v3, %v5615_v33  ;;  %v5672_v46 = vmul.f32 %v5668_v59, %v5668_v59  ;;  %v5763_v0 = vld [vmem:[%s4103_s27 + $0x38] sm:$0xff] }
 0x228   : > { %7526 = vst [vmem:[#allocation14_spill] sm:$0xff] %v5643_v19  ;;  %7528 = vst [vmem:[#allocation8_spill] sm:$0xff] %v5652_v47  ;;  %v1536_v28 = vadd.f32 %v1528_v57, %v1516_v51  ;;  %v5676_v7 = vadd.f32 %v5635_v63, %v5624_v5  ;;  %v5690_v50 = vmul.f32 %v7537_v36, %v7537_v36  ;;  %v5700_v12 = vmul.f32 0.007598758, %v5652_v47  ;;  %v5735_v57 = vld [vmem:[%s4103_s27 + $0x28] sm:$0xff] }
 0x229   : > { %1939 = vrot.lane.b32.xlu1 %v5618_v17, %s3939_s21  ;;  %7529 = vst [vmem:[#allocation33_spill] sm:$0xff] %v5655_v16  ;;  %7530 = vst [vmem:[#allocation9_spill] sm:$0xff] %v5659_v52  ;;  %1937 = vrot.lane.b32.xlu0 %v5627_v61, %s3939_s21  ;;  %v5707_v48 = vmul.f32 %v5703_v13, %v5703_v13  ;;  %v5712_v10 = vmul.f32 0.007598758, %v5672_v46  ;;  %v5719_v43 = vmul.f32 %v5715_v29, %v5715_v29 }
 0x22a   : > { %7531 = vst [vmem:[#allocation21_spill] sm:$0xff] %v5663_v4  ;;  %7533 = vst [vmem:[#allocation39_spill] sm:$0xff] %v5672_v46  ;;  %v5692_v37 = vmul.f32 %v1536_v28, %v1536_v28  ;;  %v5695_v23 = vmul.f32 %v1536_v28, %v7537_v36  ;;  %v5739_v28 = vmul.f32 %v5735_v57, %v5735_v57 }
 0x22b   : > { %7534 = vst [vmem:[#allocation20_spill] sm:$0xff] %v5676_v7  ;;  %v5681_v58 = vpop.permute.xlu1 %1675  ;;  %v5686_v42 = vpop.permute.xlu0 %1673  ;;  %7538 = vst [vmem:[#allocation23_spill] sm:$0xff] %v5690_v50  ;;  %v5732_v51 = vmul.f32 0.007598758, %v5707_v48  ;;  %v5744_v32 = vmul.f32 0.007598758, %v5719_v43  ;;  %v5751_v36 = vmul.f32 %v5747_v45, %v5747_v45 }
 0x22c   : > { %7539 = vst [vmem:[#allocation24_spill] sm:$0xff] %v5692_v37  ;;  %7540 = vst [vmem:[#allocation38_spill] sm:$0xff] %v5695_v23  ;;  %v5723_v62 = vadd.f32 %v5692_v37, %v5690_v50  ;;  %v5760_v19 = vmul.f32 0.007598758, %v5739_v28  ;;  %v5775_v7 = vld [vmem:[%s4103_s27 + $0x30] sm:$0xff] }
 0x22d   : > { %1943 = vrot.lane.b32.xlu1 %v5679_v11, %s3939_s21  ;;  %7541 = vst [vmem:[#allocation13_spill] sm:$0xff] %v5700_v12  ;;  %7542 = vst [vmem:[#allocation51_spill] sm:$0xff] %v5703_v13  ;;  %1941 = vrot.lane.b32.xlu0 %v5684_v44, %s3939_s21  ;;  %v5772_v37 = vmul.f32 0.007598758, %v5751_v36  ;;  %v5779_v63 = vmul.f32 %v5775_v7, %v5775_v7  ;;  %v5802_v50 = vmul.f32 0.036000773, %v5652_v47 }
 0x22e   : > { %7543 = vst [vmem:[#allocation63_spill] sm:$0xff] %v5707_v48  ;;  %7544 = vst [vmem:[#allocation64_spill] sm:$0xff] %v5712_v10  ;;  %v5816_v33 = vmul.f32 0.036000773, %v5707_v48  ;;  %v5830_v13 = vmul.f32 0.036000773, %v5739_v28 }
 0x22f   : > { %7546 = vst [vmem:[#allocation10_spill] sm:$0xff] %v5723_v62  ;;  %v5725_v55 = vpop.permute.xlu1 %1679  ;;  %v5727_v35 = vpop.permute.xlu0 %1677  ;;  %7547 = vst [vmem:[#allocation11_spill] sm:$0xff] %v5732_v51  ;;  %v5767_v62 = vmul.f32 %v5763_v0, %v5763_v0  ;;  %v5793_v21 = vmul.f32 0.007598758, %v5779_v63  ;;  %v5835_v2 = vmul.f32 0.036000773, %v5751_v36 }
 0x230   : > { %7548 = vst [vmem:[#allocation16_spill] sm:$0xff] %v5735_v57  ;;  %7549 = vst [vmem:[#allocation19_spill] sm:$0xff] %v5739_v28  ;;  %v5872_v59 = vmul.f32 0.10936069, %v5707_v48 }
 0x231   : > { %2235 = vrot.lane.b32.xlu1 %v5700_v12, %s3930_s18  ;;  %2233 = vrot.lane.b32.xlu0 %v5712_v10, %s3930_s18  ;;  %7550 = vst [vmem:[#allocation37_spill] sm:$0xff] %v5744_v32  ;;  %7551 = vst [vmem:[#allocation35_spill] sm:$0xff] %v5747_v45  ;;  %v5788_v52 = vmul.f32 0.007598758, %v5767_v62  ;;  %v5844_v45 = vmul.f32 0.036000773, %v5767_v62 }
 0x232   : > { %7552 = vst [vmem:[#allocation61_spill] sm:$0xff] %v5751_v36  ;;  %7553 = vst [vmem:[#allocation47_spill] sm:$0xff] %v5760_v19  ;;  %v5858_v10 = vmul.f32 0.10936069, %v5652_v47 }
 0x233   : > { %v5753_v16 = vpop.permute.xlu1 %1715  ;;  %v5755_v23 = vpop.permute.xlu0 %1713  ;;  %7554 = vst [vmem:[#allocation52_spill] sm:$0xff] %v5763_v0  ;;  %7555 = vst [vmem:[#allocation56_spill] sm:$0xff] %v5772_v37 }
 0x234   : > { %7556 = vst [vmem:[#allocation17_spill] sm:$0xff] %v5775_v7  ;;  %7557 = vst [vmem:[#allocation57_spill] sm:$0xff] %v5779_v63 }
 0x235   : > { %2239 = vrot.lane.b32.xlu1 %v5732_v51, %s3930_s18  ;;  %2237 = vrot.lane.b32.xlu0 %v5744_v32, %s3930_s18  ;;  %7559 = vst [vmem:[#allocation66_spill] sm:$0xff] %v5788_v52  ;;  %7560 = vst [vmem:[#allocation26_spill] sm:$0xff] %v5793_v21 }
 0x236   : > { %7563 = vst [vmem:[#allocation31_spill] sm:$0xff] %v5802_v50  ;;  %7567 = vst [vmem:[#allocation40_spill] sm:$0xff] %v5816_v33 }
 0x237   : > { %v5781_v4 = vpop.permute.xlu1 %1719  ;;  %v5783_v3 = vpop.permute.xlu0 %1717  ;;  %7569 = vst [vmem:[#allocation59_spill] sm:$0xff] %v5830_v13  ;;  %7570 = vst [vmem:[#allocation54_spill] sm:$0xff] %v5835_v2 }
 0x238   : > { %7558 = vst [vmem:[#allocation27_spill] sm:$0xff] %v5783_v3  ;;  %7573 = vst [vmem:[#allocation42_spill] sm:$0xff] %v5844_v45 }
 0x239   : > { %2243 = vrot.lane.b32.xlu1 %v5760_v19, %s3930_s18  ;;  %2241 = vrot.lane.b32.xlu0 %v5772_v37, %s3930_s18  ;;  %v5807_v19 = vmul.f32 0.036000773, %v5672_v46  ;;  %v5849_v37 = vmul.f32 0.036000773, %v5779_v63  ;;  %7577 = vst [vmem:[#allocation58_spill] sm:$0xff] %v5858_v10  ;;  %7580 = vst [vmem:[#allocation29_spill] sm:$0xff] %v5872_v59 }
 0x23b   : > { %v5795_v0 = vpop.permute.xlu1 %1723  ;;  %v5797_v57 = vpop.permute.xlu0 %1721  ;;  %7564 = vst [vmem:[#allocation32_spill] sm:$0xff] %v5807_v19  ;;  %7574 = vst [vmem:[#allocation36_spill] sm:$0xff] %v5849_v37 }
 0x23c   : > { %7561 = vst [vmem:[#allocation50_spill] sm:$0xff] %v5795_v0  ;;  %7562 = vst [vmem:[#allocation28_spill] sm:$0xff] %v5797_v57 }
 0x23d   : > { %2247 = vrot.lane.b32.xlu1 %v5788_v52, %s3930_s18  ;;  %2245 = vrot.lane.b32.xlu0 %v5793_v21, %s3930_s18  ;;  %v5821_v52 = vmul.f32 0.036000773, %v5719_v43 }
 0x23f   : > { %v5809_v7 = vpop.permute.xlu1 %1727  ;;  %v5811_v5 = vpop.permute.xlu0 %1725  ;;  %7568 = vst [vmem:[#allocation43_spill] sm:$0xff] %v5821_v52 }
 0x240   : > { %7565 = vst [vmem:[#allocation49_spill] sm:$0xff] %v5809_v7  ;;  %7566 = vst [vmem:[#allocation41_spill] sm:$0xff] %v5811_v5 }
 0x241   : > { %2283 = vrot.lane.b32.xlu1 %v5802_v50, %s3931_s16  ;;  %2281 = vrot.lane.b32.xlu0 %v5807_v19, %s3931_s16 }
 0x243   : > { %v5823_v49 = vpop.permute.xlu1 %1763  ;;  %v5825_v21 = vpop.permute.xlu0 %1761 }
 0x245   : > { %2287 = vrot.lane.b32.xlu1 %v5816_v33, %s3931_s16  ;;  %2285 = vrot.lane.b32.xlu0 %v5821_v52, %s3931_s16  ;;  %v5900_v52 = vmul.f32 0.10936069, %v5767_v62 }
 0x247   : > { %v5837_v12 = vpop.permute.xlu1 %1767  ;;  %v5839_v51 = vpop.permute.xlu0 %1765  ;;  %7584 = vst [vmem:[#allocation70_spill] sm:$0xff] %v5900_v52 }
 0x248   : > { %7571 = vst [vmem:[#allocation45_spill] sm:$0xff] %v5837_v12  ;;  %7572 = vst [vmem:[#allocation46_spill] sm:$0xff] %v5839_v51  ;;  %v5948_v12 = vmul.f32 0.21300554, %v5767_v62 }
 0x249   : > { %2291 = vrot.lane.b32.xlu1 %v5830_v13, %s3931_s16  ;;  %2289 = vrot.lane.b32.xlu0 %v5835_v2, %s3931_s16  ;;  %v5863_v13 = vmul.f32 0.10936069, %v5672_v46 }
 0x24a   : > { %7594 = vst [vmem:[#allocation80_spill] sm:$0xff] %v5948_v12 }
 0x24b   : > { %v5851_v50 = vpop.permute.xlu1 %1771  ;;  %v5853_v33 = vpop.permute.xlu0 %1769 }
 0x24c   : > { %7575 = vst [vmem:[#allocation30_spill] sm:$0xff] %v5851_v50  ;;  %7576 = vst [vmem:[#allocation25_spill] sm:$0xff] %v5853_v33 }
 0x24d   : > { %2295 = vrot.lane.b32.xlu1 %v5844_v45, %s3931_s16  ;;  %2293 = vrot.lane.b32.xlu0 %v5849_v37, %s3931_s16  ;;  %v5877_v45 = vmul.f32 0.10936069, %v5719_v43 }
 0x24f   : > { %v5865_v32 = vpop.permute.xlu1 %1775  ;;  %v5867_v2 = vpop.permute.xlu0 %1773 }
 0x250   : > { %7578 = vst [vmem:[#allocation53_spill] sm:$0xff] %v5865_v32  ;;  %7579 = vst [vmem:[#allocation55_spill] sm:$0xff] %v5867_v2  ;;  %v5886_v2 = vmul.f32 0.10936069, %v5739_v28 }
 0x251   : > { %2331 = vrot.lane.b32.xlu1 %v5858_v10, %s3932_s22  ;;  %2329 = vrot.lane.b32.xlu0 %v5863_v13, %s3932_s22  ;;  %v5891_v10 = vmul.f32 0.10936069, %v5751_v36 }
 0x252   : > { %7581 = vst [vmem:[#allocation67_spill] sm:$0xff] %v5886_v2 }
 0x253   : > { %v5879_v37 = vpop.permute.xlu1 %1795  ;;  %v5881_v19 = vpop.permute.xlu0 %1793 }
 0x255   : > { %2335 = vrot.lane.b32.xlu1 %v5872_v59, %s3932_s22  ;;  %2333 = vrot.lane.b32.xlu0 %v5877_v45, %s3932_s22  ;;  %v5905_v59 = vmul.f32 0.10936069, %v5779_v63 }
 0x257   : > { %v5893_v32 = vpop.permute.xlu1 %1799  ;;  %v5895_v5 = vpop.permute.xlu0 %1797  ;;  %7585 = vst [vmem:[#allocation71_spill] sm:$0xff] %v5905_v59 }
 0x258   : > { %7582 = vst [vmem:[#allocation68_spill] sm:$0xff] %v5893_v32  ;;  %7583 = vst [vmem:[#allocation69_spill] sm:$0xff] %v5895_v5  ;;  %v5914_v5 = vmul.f32 0.21300554, %v5652_v47 }
 0x259   : > { %2339 = vrot.lane.b32.xlu1 %v5886_v2, %s3932_s22  ;;  %2337 = vrot.lane.b32.xlu0 %v5891_v10, %s3932_s22  ;;  %v2361_v2 = vmul.f32 0.21300554, %v5672_v46 }
 0x25b   : > { %v5907_v33 = vpop.permute.xlu1 %1803  ;;  %v5909_v50 = vpop.permute.xlu0 %1801 }
 0x25c   : > { %7586 = vst [vmem:[#allocation72_spill] sm:$0xff] %v5907_v33  ;;  %7587 = vst [vmem:[#allocation73_spill] sm:$0xff] %v5909_v50  ;;  %v5926_v50 = vmul.f32 0.21300554, %v5707_v48 }
 0x25d   : > { %2343 = vrot.lane.b32.xlu1 %v5900_v52, %s3932_s22  ;;  %2341 = vrot.lane.b32.xlu0 %v5905_v59, %s3932_s22  ;;  %v2363_v52 = vmul.f32 0.21300554, %v5719_v43  ;;  %v5937_v59 = vmul.f32 0.21300554, %v5739_v28 }
 0x25f   : > { %v5919_v32 = vpop.permute.xlu1 %1807  ;;  %v5921_v51 = vpop.permute.xlu0 %1805  ;;  %7591 = vst [vmem:[#allocation77_spill] sm:$0xff] %v5937_v59 }
 0x260   : > { %7588 = vst [vmem:[#allocation74_spill] sm:$0xff] %v5919_v32  ;;  %7589 = vst [vmem:[#allocation75_spill] sm:$0xff] %v5921_v51  ;;  %v2365_v51 = vmul.f32 0.21300554, %v5751_v36 }
 0x261   : > { %2379 = vrot.lane.b32.xlu1 %v5914_v5, %s3933_s29  ;;  %2377 = vrot.lane.b32.xlu0 %v2361_v2, %s3933_s29 }
 0x263   : > { %v5930_v33 = vpop.permute.xlu1 %1827  ;;  %v5932_v29 = vpop.permute.xlu0 %1825 }
 0x264   : > { %7590 = vst [vmem:[#allocation76_spill] sm:$0xff] %v5932_v29  ;;  %v5952_v29 = vmul.f32 0.21300554, %v5779_v63 }
 0x265   : > { %2383 = vrot.lane.b32.xlu1 %v5926_v50, %s3933_s29  ;;  %2381 = vrot.lane.b32.xlu0 %v2363_v52, %s3933_s29 }
 0x267   : > { %v5941_v32 = vpop.permute.xlu1 %1831  ;;  %v5943_v7 = vpop.permute.xlu0 %1829 }
 0x268   : > { %7592 = vst [vmem:[#allocation78_spill] sm:$0xff] %v5941_v32  ;;  %7593 = vst [vmem:[#allocation79_spill] sm:$0xff] %v5943_v7  ;;  %v2410_v7 = vmul.f32 0.26601171, %v5652_v47 }
 0x269   : > { %2387 = vrot.lane.b32.xlu1 %v5937_v59, %s3933_s29  ;;  %2385 = vrot.lane.b32.xlu0 %v2365_v51, %s3933_s29  ;;  %v2409_v59 = vmul.f32 0.26601171, %v5672_v46  ;;  %v2413_v46 = vmul.f32 0.26601171, %v5751_v36 }
 0x26b   : > { %v5954_v57 = vpop.permute.xlu1 %1835  ;;  %v5956_v0 = vpop.permute.xlu0 %1833 }
 0x26c   : > { %7595 = vst [vmem:[#allocation81_spill] sm:$0xff] %v5954_v57  ;;  %7596 = vst [vmem:[#allocation82_spill] sm:$0xff] %v5956_v0  ;;  %v2412_v57 = vmul.f32 0.26601171, %v5707_v48  ;;  %v2411_v0 = vmul.f32 0.26601171, %v5719_v43 }
 0x26d   : > { %2391 = vrot.lane.b32.xlu1 %v5948_v12, %s3933_s29  ;;  %2389 = vrot.lane.b32.xlu0 %v5952_v29, %s3933_s29 }
 0x26f   : > { %v5964_v32 = vpop.permute.xlu1 %1839  ;;  %v5966_v3 = vpop.permute.xlu0 %1837 }
 0x270   : > { %7597 = vst [vmem:[#allocation83_spill] sm:$0xff] %v5964_v32  ;;  %7598 = vst [vmem:[#allocation84_spill] sm:$0xff] %v5966_v3 }
 0x271   : > { %2427 = vrot.lane.b32.xlu1 %v2410_v7, %s3934_s30  ;;  %2425 = vrot.lane.b32.xlu0 %v2409_v59, %s3934_s30  ;;  %v2415_v59 = vmul.f32 0.26601171, %v5779_v63 }
 0x273   : > { %v5972_v12 = vpop.permute.xlu1 %1859  ;;  %v5974_v47 = vpop.permute.xlu0 %1857 }
 0x275   : > { %2431 = vrot.lane.b32.xlu1 %v2412_v57, %s3934_s30  ;;  %2429 = vrot.lane.b32.xlu0 %v2411_v0, %s3934_s30 }
 0x277   : > { %v5979_v32 = vpop.permute.xlu1 %1863  ;;  %v5981_v3 = vpop.permute.xlu0 %1861 }
 0x279   : > { %2457 = vrot.lane.b32.xlu1 %v2361_v2, %s3935_s4  ;;  %2433 = vrot.lane.b32.xlu0 %v2413_v46, %s3934_s30  ;;  %v2414_v2 = vmul.f32 0.26601171, %v5739_v28  ;;  %v1594_v46 = vadd.f32 %v5439_v38, %v5476_v40  ;;  %v1596_v38 = vadd.f32 %v5457_v18, %v5479_v26  ;;  %v1600_v18 = vadd.f32 %v5507_v60, %v5679_v11 }
 0x27b   : > { %v5986_v7 = vpop.permute.xlu1 %1867  ;;  %v5988_v48 = vpop.permute.xlu0 %1865  ;;  %v1644_v26 = vadd.f32 %v5548_v25, %v1596_v38  ;;  %v1648_v25 = vadd.f32 %v5588_v34, %v1600_v18  ;;  %v7607_v38 = vld [vmem:[#allocation30_spill] sm:$0xff]  ;;  %v7610_v18 = vld [vmem:[#allocation43_spill] sm:$0xff] }
 0x27d   : > { %2437 = vrot.lane.b32.xlu1 %v2415_v59, %s3934_s30  ;;  %2461 = vrot.lane.b32.xlu0 %v2363_v52, %s3935_s4  ;;  %v1593_v59 = vadd.f32 %v5441_v30, %v5470_v31  ;;  %v1642_v52 = vadd.f32 %v5537_v6, %v1594_v46  ;;  %v1595_v30 = vadd.f32 %v5464_v39, %v5606_v8  ;;  %v3818_v46 = vld [vmem:[%s4097_s3 + $0x10] sm:$0xff] }
 0x27e   : > { %v1599_v39 = vadd.f32 %v5515_v56, %v5684_v44 }
 0x27f   : > { %v5992_v0 = vpop.permute.xlu1 %1871  ;;  %v5994_v57 = vpop.permute.xlu0 %1869  ;;  %v1690_v28 = vadd.f32 %v5602_v24, %v1642_v52  ;;  %v1597_v24 = vadd.f32 %v5493_v27, %v5627_v61  ;;  %v1643_v8 = vadd.f32 %v5551_v9, %v1595_v30  ;;  %v7606_v52 = vld [vmem:[#allocation46_spill] sm:$0xff] }
 0x280   : > { %v1647_v56 = vadd.f32 %v5592_v15, %v1599_v39  ;;  %v1696_v15 = vadd.f32 %v5725_v55, %v1648_v25  ;;  %v7603_v55 = vld [vmem:[#allocation49_spill] sm:$0xff] }
 0x281   : > { %2489 = vrot.lane.b32.xlu1 %v5863_v13, %s3936_s24  ;;  %2465 = vrot.lane.b32.xlu0 %v2365_v51, %s3935_s4  ;;  %v1641_v13 = vadd.f32 %v5540_v20, %v1593_v59  ;;  %v1738_v6 = vadd.f32 %v5753_v16, %v1690_v28  ;;  %v1598_v20 = vadd.f32 %v5487_v41, %v5618_v17 }
 0x282   : > { %v1645_v60 = vadd.f32 %v5570_v54, %v1597_v24  ;;  %v1692_v17 = vadd.f32 %v5629_v53, %v1644_v26  ;;  %v7611_v26 = vld [vmem:[#allocation41_spill] sm:$0xff] }
 0x283   : > { %v6002_v63 = vpop.permute.xlu1 %1891  ;;  %v6007_v36 = vpop.permute.xlu0 %1889  ;;  %v1689_v31 = vadd.f32 %v5608_v1, %v1641_v13  ;;  %v1786_v41 = vadd.f32 %v5823_v49, %v1738_v6  ;;  %v1646_v27 = vadd.f32 %v5567_v14, %v1598_v20  ;;  %v1691_v14 = vadd.f32 %v5637_v22, %v1643_v8  ;;  %v7599_v22 = vld [vmem:[#allocation27_spill] sm:$0xff]  ;;  %v7609_v20 = vld [vmem:[#allocation68_spill] sm:$0xff] }
 0x284   : > { %v1693_v34 = vadd.f32 %v5686_v42, %v1645_v60  ;;  %v1740_v53 = vadd.f32 %v5781_v4, %v1692_v17  ;;  %v7600_v42 = vld [vmem:[#allocation50_spill] sm:$0xff]  ;;  %v7601_v4 = vld [vmem:[#allocation28_spill] sm:$0xff]  ;;  %v7614_v60 = vld [vmem:[#allocation69_spill] sm:$0xff] }
 0x285   : > { %2435 = vrot.lane.b32.xlu1 %v2414_v2, %s3934_s30  ;;  %2493 = vrot.lane.b32.xlu0 %v5877_v45, %s3936_s24  ;;  %v1737_v1 = vadd.f32 %v5755_v23, %v1689_v31  ;;  %v1818_v16 = vadd.f32 %v5879_v37, %v1786_v41  ;;  %v1694_v54 = vadd.f32 %v5681_v58, %v1646_v27  ;;  %v7602_v23 = vld [vmem:[#allocation45_spill] sm:$0xff]  ;;  %v7613_v27 = vld [vmem:[#allocation32_spill] sm:$0xff] }
 0x286   : > { %v1739_v58 = vadd.f32 %v7599_v22, %v1691_v14  ;;  %v1741_v37 = vadd.f32 %v7601_v4, %v1693_v34  ;;  %v1788_v28 = vadd.f32 %v7602_v23, %v1740_v53  ;;  %v1744_v45 = vadd.f32 %v7603_v55, %v1696_v15  ;;  %v7608_v31 = vld [vmem:[#allocation25_spill] sm:$0xff]  ;;  %v7615_v17 = vld [vmem:[#allocation72_spill] sm:$0xff]  ;;  %v7617_v14 = vld [vmem:[#allocation78_spill] sm:$0xff] }
 0x287   : > { %v6016_v40 = vpop.permute.xlu1 %1895  ;;  %v6022_v51 = vpop.permute.xlu0 %1893  ;;  %v1785_v9 = vadd.f32 %v5825_v21, %v1737_v1  ;;  %v1695_v21 = vadd.f32 %v5727_v35, %v1647_v56  ;;  %v1850_v44 = vadd.f32 %v5930_v33, %v1818_v16  ;;  %v7604_v35 = vld [vmem:[#allocation76_spill] sm:$0xff]  ;;  %v7618_v53 = vld [vmem:[#allocation55_spill] sm:$0xff]  ;;  %v7622_v4 = vld [vmem:[#allocation82_spill] sm:$0xff] }
 0x288   : > { %v1787_v13 = vadd.f32 %v7606_v52, %v1739_v58  ;;  %v1789_v6 = vadd.f32 %v7608_v31, %v1741_v37  ;;  %v1820_v24 = vadd.f32 %v7609_v20, %v1788_v28  ;;  %v7620_v22 = vld [vmem:[#allocation79_spill] sm:$0xff]  ;;  %v7623_v28 = vld [vmem:[#allocation77_spill] sm:$0xff] }
 0x289   : > { %2463 = vrot.lane.b32.xlu1 %v5926_v50, %s3935_s4  ;;  %2459 = vrot.lane.b32.xlu0 %v5914_v5, %s3935_s4  ;;  %v2416_v5 = vmul.f32 0.26601171, %v5767_v62  ;;  %v1817_v11 = vadd.f32 %v5881_v19, %v1785_v9  ;;  %v1742_v50 = vadd.f32 %v7600_v42, %v1694_v54  ;;  %v1882_v19 = vadd.f32 %v5972_v12, %v1850_v44  ;;  %v7612_v12 = vld [vmem:[#allocation53_spill] sm:$0xff] }
 0x28a   : > { %v1743_v39 = vadd.f32 %v7611_v26, %v1695_v21  ;;  %v1792_v8 = vadd.f32 %v7612_v12, %v1744_v45  ;;  %v1819_v25 = vadd.f32 %v7614_v60, %v1787_v13  ;;  %v7616_v9 = vld [vmem:[#allocation73_spill] sm:$0xff]  ;;  %v1852_v54 = vadd.f32 %v7617_v14, %v1820_v24  ;;  %v7619_v21 = vld [vmem:[#allocation74_spill] sm:$0xff] }
 0x28b   : > { %v6044_v61 = vpop.permute.xlu1 %1899  ;;  %v6049_v49 = vpop.permute.xlu0 %1897  ;;  %v1849_v2 = vadd.f32 %v7604_v35, %v1817_v11  ;;  %v1790_v30 = vadd.f32 %v7607_v38, %v1742_v50  ;;  %v1914_v41 = vadd.f32 %v6002_v63, %v1882_v19  ;;  %v1821_v16 = vadd.f32 %v7616_v9, %v1789_v6  ;;  %v7621_v42 = vld [vmem:[#allocation81_spill] sm:$0xff]  ;;  %v7626_v38 = vld [vmem:[#allocation22_spill] sm:$0xff] }
 0x28c   : > { %v1791_v15 = vadd.f32 %v7618_v53, %v1743_v39  ;;  %v1824_v11 = vadd.f32 %v7619_v21, %v1792_v8  ;;  %v1851_v58 = vadd.f32 %v7620_v22, %v1819_v25  ;;  %v1884_v23 = vadd.f32 %v5979_v32, %v1852_v54  ;;  %v3819_v32 = vld [vmem:[%s4097_s3] sm:$0xff]  ;;  %v7628_v8 = vld [vmem:[#allocation29_spill] sm:$0xff] }
 0x28d   : > { %2497 = vrot.lane.b32.xlu1 %v5891_v10, %s3936_s24  ;;  %2469 = vrot.lane.b32.xlu0 %v5952_v29, %s3935_s4  ;;  %v7605_v29 = vld [vmem:[#allocation65_spill] sm:$0xff]  ;;  %v1881_v1 = vadd.f32 %v5974_v47, %v1849_v2  ;;  %v1822_v56 = vadd.f32 %v7615_v17, %v1790_v30  ;;  %v1853_v37 = vadd.f32 %v7622_v4, %v1821_v16  ;;  %v7624_v2 = vld [vmem:[#allocation75_spill] sm:$0xff] }
 0x28e   : > { %v6077_v59 = vmul.f32 %v3818_v46, %v7605_v29  ;;  %v1823_v19 = vadd.f32 %v7624_v2, %v1791_v15  ;;  %v7625_v46 = vld [vmem:[#allocation83_spill] sm:$0xff]  ;;  %v1883_v52 = vadd.f32 %v5981_v3, %v1851_v58  ;;  %v6115_v30 = vmul.f32 %v3819_v32, %v7626_v38  ;;  %v7634_v38 = vld [vmem:[#allocation37_spill] sm:$0xff] }
 0x28f   : > { %v6068_v10 = vpop.permute.xlu1 %1903  ;;  %v6073_v33 = vpop.permute.xlu0 %1901  ;;  %v1913_v47 = vadd.f32 %v6007_v36, %v1881_v1  ;;  %v1854_v50 = vadd.f32 %v7621_v42, %v1822_v56  ;;  %v1856_v29 = vadd.f32 %v7625_v46, %v1824_v11  ;;  %v1885_v6 = vadd.f32 %v5988_v48, %v1853_v37  ;;  %v7630_v11 = vld [vmem:[#allocation54_spill] sm:$0xff]  ;;  %v7631_v58 = vld [vmem:[#allocation71_spill] sm:$0xff] }
 0x290   : > { %7627 = vst [vmem:[#allocation27_spill] sm:$0xff] %v6115_v30  ;;  %v1916_v20 = vadd.f32 %v6016_v40, %v1884_v23  ;;  %v1915_v48 = vadd.f32 %v6022_v51, %v1883_v52  ;;  %v6145_v2 = vmul.f32 0.007598758, %v6077_v59 }
 0x291   : > { %2525 = vrot.lane.b32.xlu1 %v7610_v18, %s3937_s26  ;;  %2521 = vrot.lane.b32.xlu0 %v7613_v27, %s3937_s26  ;;  %v1886_v31 = vadd.f32 %v5986_v7, %v1854_v50  ;;  %v7629_v7 = vld [vmem:[#allocation58_spill] sm:$0xff]  ;;  %v1888_v46 = vadd.f32 %v5992_v0, %v1856_v29 }
 0x292   : > { %7633 = vst [vmem:[#allocation50_spill] sm:$0xff] %v6145_v2 }
 0x293   : > { %v1932_v34 = vpop.permute.xlu1 %1931  ;;  %v1930_v63 = vpop.permute.xlu0 %1929  ;;  %v1918_v52 = vadd.f32 %v6044_v61, %v1886_v31 }
 0x294   : > { %v6098_v44 = vadd.f32 %v1932_v34, %v1914_v41  ;;  %v1953_v35 = vadd.f32 %v1930_v63, %v1913_v47 }
 0x295   : > { %2467 = vrot.lane.b32.xlu1 %v7623_v28, %s3935_s4  ;;  %2439 = vrot.lane.b32.xlu0 %v2416_v5, %s3934_s30  ;;  %v7632_v28 = vld [vmem:[#allocation84_spill] sm:$0xff] }
 0x296   : > { %v2006_v55 = vmul.f32 0.10936069, %v6098_v44  ;;  %v2042_v45 = vmul.f32 0.21300554, %v6098_v44  ;;  %v2078_v36 = vmul.f32 0.26601171, %v6098_v44 }
 0x297   : > { %v1936_v13 = vpop.permute.xlu1 %1935  ;;  %v1934_v18 = vpop.permute.xlu0 %1933  ;;  %v1965_v3 = vmul.f32 0.007598758, %v1953_v35  ;;  %v1985_v1 = vmul.f32 0.036000773, %v1953_v35  ;;  %v2005_v41 = vmul.f32 0.10936069, %v1953_v35 }
 0x298   : > { %v2022_v24 = vrot.slane %v2006_v55, 3  ;;  %v2058_v5 = vrot.slane %v2042_v45, 4  ;;  %v2094_v26 = vrot.slane %v2078_v36, 5  ;;  %v2114_v39 = vrot.slane %v2042_v45, 6 }
 0x299   : > { %v2134_v12 = vrot.slane %v2006_v55, 7  ;;  %2495 = vrot.lane.b32.xlu1 %v7628_v8, %s3936_s24  ;;  %v6122_v27 = vadd.f32 %v1936_v13, %v1916_v20  ;;  %2491 = vrot.lane.b32.xlu0 %v7629_v7, %s3936_s24  ;;  %v1961_v40 = vmul.f32 0.0010283801, %v1953_v35  ;;  %v2041_v60 = vmul.f32 0.21300554, %v1953_v35 }
 0x29a   : > { %v2077_v25 = vmul.f32 0.26601171, %v1953_v35  ;;  %v1973_v56 = vrot.slane %v1965_v3, 1  ;;  %v1993_v9 = vrot.slane %v1985_v1, 2  ;;  %v2021_v16 = vrot.slane %v2005_v41, 3 }
 0x29b   : > { %v1940_v17 = vpop.permute.xlu1 %1939  ;;  %v2133_v14 = vrot.slane %v2005_v41, 7  ;;  %v1938_v54 = vpop.permute.xlu0 %1937  ;;  %v2057_v34 = vrot.slane %v2041_v60, 4  ;;  %v2113_v15 = vrot.slane %v2041_v60, 6  ;;  %v2008_v21 = vmul.f32 0.10936069, %v6122_v27 }
 0x29c   : > { %v2093_v53 = vrot.slane %v2077_v25, 5  ;;  %v1981_v47 = vadd.f32 %v1973_v56, %v1961_v40  ;;  %v2023_v51 = vsel %vm696_vm0, %v2021_v16, %v2022_v24  ;;  %v2044_v22 = vmul.f32 0.21300554, %v6122_v27  ;;  %v7637_v56 = vld [vmem:[#allocation80_spill] sm:$0xff] }
 0x29d   : > { %2529 = vrot.lane.b32.xlu1 %v7630_v11, %s3937_s26  ;;  %v2135_v63 = vsel %vm812_vm4, %v2133_v14, %v2134_v12  ;;  %2501 = vrot.lane.b32.xlu0 %v7631_v58, %s3936_s24  ;;  %v2059_v42 = vsel %vm733_vm1, %v2057_v34, %v2058_v5  ;;  %v2115_v4 = vsel %vm791_vm3, %v2113_v15, %v2114_v39  ;;  %v2080_v36 = vmul.f32 0.26601171, %v6122_v27  ;;  %v7635_v5 = vld [vmem:[#allocation64_spill] sm:$0xff] }
 0x29e   : > { %v2095_v50 = vsel %vm770_vm2, %v2093_v53, %v2094_v26  ;;  %v1955_v37 = vadd.f32 %v1934_v18, %v1915_v48  ;;  %v1855_v55 = vadd.f32 %v7632_v28, %v1823_v19  ;;  %v2001_v45 = vadd.f32 %v1993_v9, %v1981_v47  ;;  %v7636_v48 = vld [vmem:[#allocation67_spill] sm:$0xff] }
 0x29f   : > { %v6138_v23 = vpop.permute.xlu1 %1943  ;;  %v6142_v35 = vpop.permute.xlu0 %1941  ;;  %v1917_v13 = vadd.f32 %v6049_v49, %v1885_v6  ;;  %v2025_v32 = vrot.slane %v2008_v21, 3  ;;  %v2061_v19 = vrot.slane %v2044_v22, 4  ;;  %v2117_v24 = vrot.slane %v2044_v22, 6 }
 0x2a0   : > { %v2037_v20 = vadd.f32 %v2023_v51, %v2001_v45  ;;  %v2137_v18 = vrot.slane %v2008_v21, 7  ;;  %v2097_v26 = vrot.slane %v2080_v36, 5  ;;  %v1966_v39 = vmul.f32 0.007598758, %v1955_v37  ;;  %v7639_v45 = vld [vmem:[#allocation31_spill] sm:$0xff] }
 0x2a1   : > { %2557 = vrot.lane.b32.xlu1 %v7634_v38, %s3938_s12  ;;  %2553 = vrot.lane.b32.xlu0 %v7635_v5, %s3938_s12  ;;  %v1986_v12 = vmul.f32 0.036000773, %v1955_v37  ;;  %v6154_v8 = vadd.f32 %v1940_v17, %v1918_v52  ;;  %v1962_v49 = vmul.f32 0.0010283801, %v1955_v37  ;;  %v2007_v29 = vmul.f32 0.10936069, %v1955_v37 }
 0x2a2   : > { %v2073_v61 = vadd.f32 %v2059_v42, %v2037_v20  ;;  %v2043_v31 = vmul.f32 0.21300554, %v1955_v37  ;;  %v1974_v3 = vrot.slane %v1966_v39, 1  ;;  %v2079_v41 = vmul.f32 0.26601171, %v1955_v37 }
 0x2a3   : > { %v6156_v0 = vpop.permute.xlu1 %2235  ;;  %v6158_v6 = vpop.permute.xlu0 %2233  ;;  %v1994_v1 = vrot.slane %v1986_v12, 2  ;;  %v1957_v7 = vadd.f32 %v1938_v54, %v1917_v13  ;;  %v2024_v60 = vrot.slane %v2007_v29, 3  ;;  %v2136_v14 = vrot.slane %v2007_v29, 7 }
 0x2a4   : > { %v2109_v40 = vadd.f32 %v2095_v50, %v2073_v61  ;;  %v2060_v25 = vrot.slane %v2043_v31, 4  ;;  %v2116_v17 = vrot.slane %v2043_v31, 6  ;;  %v1982_v9 = vadd.f32 %v1974_v3, %v1962_v49  ;;  %v7638_v50 = vld [vmem:[#allocation40_spill] sm:$0xff] }
 0x2a5   : > { %2499 = vrot.lane.b32.xlu1 %v7636_v48, %s3936_s24  ;;  %2471 = vrot.lane.b32.xlu0 %v7637_v56, %s3935_s4  ;;  %v2096_v16 = vrot.slane %v2079_v41, 5  ;;  %v2010_v34 = vmul.f32 0.10936069, %v6154_v8  ;;  %v2026_v54 = vsel %vm696_vm0, %v2024_v60, %v2025_v32  ;;  %v2138_v58 = vsel %vm812_vm4, %v2136_v14, %v2137_v18  ;;  %v7641_v56 = vld [vmem:[#allocation56_spill] sm:$0xff] }
 0x2a6   : > { %v2129_v15 = vadd.f32 %v2115_v4, %v2109_v40  ;;  %v2062_v21 = vsel %vm733_vm1, %v2060_v25, %v2061_v19  ;;  %v2118_v11 = vsel %vm791_vm3, %v2116_v17, %v2117_v24  ;;  %v2002_v51 = vadd.f32 %v1994_v1, %v1982_v9 }
 0x2a7   : > { %v6165_v53 = vpop.permute.xlu1 %2239  ;;  %v6170_v47 = vpop.permute.xlu0 %2237  ;;  %v2098_v22 = vsel %vm770_vm2, %v2096_v16, %v2097_v26  ;;  %v2046_v42 = vmul.f32 0.21300554, %v6154_v8  ;;  %v2082_v4 = vmul.f32 0.26601171, %v6154_v8  ;;  %v6181_v28 = vmul.f32 0.0010283801, %v5719_v43 }
 0x2a8   : > { %v6177_v37 = vadd.f32 %v2135_v63, %v2129_v15  ;;  %v6186_v36 = vmul.f32 0.007598758, %v6115_v30  ;;  %v1887_v52 = vadd.f32 %v5994_v57, %v1855_v55  ;;  %v1920_v13 = vadd.f32 %v6068_v10, %v1888_v46 }
 0x2a9   : > { %2527 = vrot.lane.b32.xlu1 %v7638_v50, %s3937_s26  ;;  %2523 = vrot.lane.b32.xlu0 %v7639_v45, %s3937_s26  ;;  %v2038_v32 = vadd.f32 %v2026_v54, %v2002_v51  ;;  %v2028_v38 = vrot.slane %v2010_v34, 3  ;;  %v2064_v63 = vrot.slane %v2046_v42, 4  ;;  %v2100_v19 = vrot.slane %v2082_v4, 5  ;;  %v7643_v50 = vld [vmem:[#allocation39_spill] sm:$0xff] }
 0x2aa   : > { %7640 = vst [vmem:[#allocation28_spill] sm:$0xff] %v6186_v36  ;;  %v2120_v24 = vrot.slane %v2046_v42, 6  ;;  %v2140_v18 = vrot.slane %v2010_v34, 7  ;;  %v1967_v26 = vmul.f32 0.007598758, %v1957_v7  ;;  %v6195_v12 = vadd.f32 %v6138_v23, %v1920_v13  ;;  %v7642_v34 = vld [vmem:[#allocation36_spill] sm:$0xff] }
 0x2ab   : > { %v6190_v20 = vpop.permute.xlu1 %2243  ;;  %v6192_v43 = vpop.permute.xlu0 %2241  ;;  %v2074_v5 = vadd.f32 %v2062_v21, %v2038_v32  ;;  %v1987_v39 = vmul.f32 0.036000773, %v1957_v7  ;;  %v1919_v57 = vadd.f32 %v6073_v33, %v1887_v52  ;;  %v1963_v10 = vmul.f32 0.0010283801, %v1957_v7 }
 0x2ac   : > { %v2009_v55 = vmul.f32 0.10936069, %v1957_v7  ;;  %v2045_v46 = vmul.f32 0.21300554, %v1957_v7  ;;  %v1975_v49 = vrot.slane %v1967_v26, 1 }
 0x2ad   : > { %2901 = vrot.lane.b32.xlu1 %v6145_v2, %s3930_s18  ;;  %2897 = vrot.lane.b32.xlu0 %v6186_v36, %s3930_s18  ;;  %v2110_v61 = vadd.f32 %v2098_v22, %v2074_v5  ;;  %v1995_v29 = vrot.slane %v1987_v39, 2  ;;  %v2081_v31 = vmul.f32 0.26601171, %v1957_v7  ;;  %v2012_v17 = vmul.f32 0.10936069, %v6195_v12 }
 0x2ae   : > { %v2027_v1 = vrot.slane %v2009_v55, 3  ;;  %v2063_v23 = vrot.slane %v2045_v46, 4  ;;  %v2119_v41 = vrot.slane %v2045_v46, 6  ;;  %v2139_v48 = vrot.slane %v2009_v55, 7 }
 0x2af   : > { %v6202_v3 = vpop.permute.xlu1 %2247  ;;  %v6204_v40 = vpop.permute.xlu0 %2245  ;;  %v2130_v60 = vadd.f32 %v2118_v11, %v2110_v61  ;;  %v1983_v33 = vadd.f32 %v1975_v49, %v1963_v10  ;;  %v2099_v25 = vrot.slane %v2081_v31, 5  ;;  %v1959_v11 = vadd.f32 %v6142_v35, %v1919_v57  ;;  %v3820_v57 = vld [vmem:[%s4097_s3 + $0x20] sm:$0xff]  ;;  %v7644_v10 = vld [vmem:[#allocation35_spill] sm:$0xff] }
 0x2b0   : > { %v2029_v9 = vsel %vm696_vm0, %v2027_v1, %v2028_v38  ;;  %v2065_v7 = vsel %vm733_vm1, %v2063_v23, %v2064_v63  ;;  %v2121_v16 = vsel %vm791_vm3, %v2119_v41, %v2120_v24  ;;  %v2141_v14 = vsel %vm812_vm4, %v2139_v48, %v2140_v18  ;;  %v7646_v31 = vld [vmem:[#allocation59_spill] sm:$0xff] }
 0x2b1   : > { %2561 = vrot.lane.b32.xlu1 %v7641_v56, %s3938_s12  ;;  %2533 = vrot.lane.b32.xlu0 %v7642_v34, %s3937_s26  ;;  %v6215_v15 = vadd.f32 %v2138_v58, %v2130_v60  ;;  %v2003_v54 = vadd.f32 %v1995_v29, %v1983_v33  ;;  %v2101_v21 = vsel %vm770_vm2, %v2099_v25, %v2100_v19  ;;  %v2048_v22 = vmul.f32 0.21300554, %v6195_v12  ;;  %v7647_v60 = vld [vmem:[#allocation70_spill] sm:$0xff] }
 0x2b2   : > { %v2084_v42 = vmul.f32 0.26601171, %v6195_v12  ;;  %v6224_v4 = vmul.f32 0.0010283801, %v7643_v50  ;;  %v2031_v58 = vrot.slane %v2012_v17, 3  ;;  %v2143_v32 = vrot.slane %v2012_v17, 7 }
 0x2b3   : > { %v6219_v51 = vpop.permute.xlu1 %2283  ;;  %v6226_v45 = vpop.permute.xlu0 %2281  ;;  %v2039_v52 = vadd.f32 %v2029_v9, %v2003_v54  ;;  %v2067_v13 = vrot.slane %v2048_v22, 4  ;;  %v2123_v63 = vrot.slane %v2048_v22, 6  ;;  %v1968_v19 = vmul.f32 0.007598758, %v1959_v11 }
 0x2b4   : > { %v2103_v38 = vrot.slane %v2084_v42, 5  ;;  %v1988_v18 = vmul.f32 0.036000773, %v1959_v11  ;;  %v2011_v5 = vmul.f32 0.10936069, %v1959_v11  ;;  %v6238_v55 = vmul.f32 %v3820_v57, %v7644_v10 }
 0x2b5   : > { %2597 = vrot.lane.b32.xlu1 %v6181_v28, %s3939_s21  ;;  %2593 = vrot.lane.b32.xlu0 %v6224_v4, %s3939_s21  ;;  %v2075_v35 = vadd.f32 %v2065_v7, %v2039_v52  ;;  %v2047_v26 = vmul.f32 0.21300554, %v1959_v11  ;;  %v1964_v61 = vmul.f32 0.0010283801, %v1959_v11  ;;  %v1976_v49 = vrot.slane %v1968_v19, 1  ;;  %v7649_v52 = vld [vmem:[#allocation11_spill] sm:$0xff] }
 0x2b6   : > { %7645 = vst [vmem:[#allocation45_spill] sm:$0xff] %v6238_v55  ;;  %v2083_v29 = vmul.f32 0.26601171, %v1959_v11  ;;  %v1996_v1 = vrot.slane %v1988_v18, 2  ;;  %v2030_v23 = vrot.slane %v2011_v5, 3  ;;  %v2142_v56 = vrot.slane %v2011_v5, 7 }
 0x2b7   : > { %v6232_v24 = vpop.permute.xlu1 %2287  ;;  %v6234_v39 = vpop.permute.xlu0 %2285  ;;  %v2111_v46 = vadd.f32 %v2101_v21, %v2075_v35  ;;  %v2066_v41 = vrot.slane %v2047_v26, 4  ;;  %v2122_v48 = vrot.slane %v2047_v26, 6  ;;  %v1984_v25 = vadd.f32 %v1976_v49, %v1964_v61  ;;  %v7653_v18 = vld [vmem:[#allocation62_spill] sm:$0xff] }
 0x2b8   : > { %v2102_v17 = vrot.slane %v2083_v29, 5  ;;  %v2032_v7 = vsel %vm696_vm0, %v2030_v23, %v2031_v58  ;;  %v6252_v11 = vmul.f32 0.036000773, %v6115_v30  ;;  %v2144_v50 = vsel %vm812_vm4, %v2142_v56, %v2143_v32  ;;  %v7650_v58 = vld [vmem:[#allocation13_spill] sm:$0xff] }
 0x2b9   : > { %2531 = vrot.lane.b32.xlu1 %v7646_v31, %s3937_s26  ;;  %2503 = vrot.lane.b32.xlu0 %v7647_v60, %s3936_s24  ;;  %v2131_v33 = vadd.f32 %v2121_v16, %v2111_v46  ;;  %v2068_v34 = vsel %vm733_vm1, %v2066_v41, %v2067_v13  ;;  %v2124_v54 = vsel %vm791_vm3, %v2122_v48, %v2123_v63  ;;  %v6261_v13 = vmul.f32 0.007598758, %v6238_v55 }
 0x2ba   : > { %7648 = vst [vmem:[#allocation49_spill] sm:$0xff] %v6252_v11  ;;  %v2004_v42 = vadd.f32 %v1996_v1, %v1984_v25  ;;  %v2104_v16 = vsel %vm770_vm2, %v2102_v17, %v2103_v38  ;;  %v2161_v35 = vmul.f32 0.007598758, %v6098_v44  ;;  %v2153_v32 = vmul.f32 0.036000773, %v6098_v44  ;;  %v7657_v25 = vld [vmem:[#allocation51_spill] sm:$0xff] }
 0x2bb   : > { %v6244_v9 = vpop.permute.xlu1 %2291  ;;  %v6249_v21 = vpop.permute.xlu0 %2289  ;;  %v2151_v22 = vadd.f32 %v2141_v14, %v2131_v33  ;;  %7651 = vst [vmem:[#allocation76_spill] sm:$0xff] %v6261_v13  ;;  %v3821_v14 = vld [vmem:[%s4097_s3 + $0x8] sm:$0xff]  ;;  %v2162_v38 = vmul.f32 0.007598758, %v6122_v27  ;;  %v2163_v26 = vmul.f32 0.007598758, %v6154_v8 }
 0x2bc   : > { %v2040_v63 = vadd.f32 %v2032_v7, %v2004_v42  ;;  %v6268_v5 = vmul.f32 %v3821_v14, %v7653_v18  ;;  %v2181_v10 = vmul.f32 0.0010283801, %v6098_v44  ;;  %v2154_v46 = vmul.f32 0.036000773, %v6122_v27  ;;  %v3822_v33 = vld [vmem:[%s4097_s3 + $0x18] sm:$0xff] }
 0x2bd   : > { %2559 = vrot.lane.b32.xlu1 %v7649_v52, %s3938_s12  ;;  %2555 = vrot.lane.b32.xlu0 %v7650_v58, %s3938_s12  ;;  %v6280_v49 = vmul.f32 0.036000773, %v6077_v59  ;;  %v2182_v29 = vmul.f32 0.0010283801, %v6122_v27  ;;  %v2155_v31 = vmul.f32 0.036000773, %v6154_v8  ;;  %v2157_v44 = vadd.f32 %v2153_v32, %v6177_v37 }
 0x2be   : > { %v2076_v61 = vadd.f32 %v2068_v34, %v2040_v63  ;;  %v2183_v1 = vmul.f32 0.0010283801, %v6154_v8  ;;  %v2169_v23 = vrot.slane %v2161_v35, 1  ;;  %v6291_v60 = vmul.f32 0.007598758, %v6268_v5  ;;  %v7659_v52 = vld [vmem:[#allocation26_spill] sm:$0xff] }
 0x2bf   : > { %v6264_v19 = vpop.permute.xlu1 %2295  ;;  %v6273_v57 = vpop.permute.xlu0 %2293  ;;  %7654 = vst [vmem:[#allocation46_spill] sm:$0xff] %v6280_v49  ;;  %v6295_v17 = vmul.f32 %v3822_v33, %v7657_v25  ;;  %v2170_v27 = vrot.slane %v2162_v38, 1  ;;  %v2171_v56 = vrot.slane %v2163_v26, 1  ;;  %v2158_v8 = vadd.f32 %v2154_v46, %v6215_v15 }
 0x2c0   : > { %7652 = vst [vmem:[#allocation65_spill] sm:$0xff] %v6264_v19  ;;  %v2112_v41 = vadd.f32 %v2104_v16, %v2076_v61  ;;  %7656 = vst [vmem:[#allocation25_spill] sm:$0xff] %v6291_v60  ;;  %v2159_v34 = vadd.f32 %v2155_v31, %v2151_v22  ;;  %v2189_v42 = vrot.slane %v2181_v10, 2  ;;  %v2164_v37 = vmul.f32 0.007598758, %v6195_v12 }
 0x2c1   : > { %2945 = vrot.lane.b32.xlu1 %v6252_v11, %s3931_s16  ;;  %2905 = vrot.lane.b32.xlu0 %v6261_v13, %s3930_s18  ;;  %7658 = vst [vmem:[#allocation68_spill] sm:$0xff] %v6295_v17  ;;  %v2177_v58 = vadd.f32 %v2169_v23, %v2157_v44  ;;  %v2190_v35 = vrot.slane %v2182_v29, 2  ;;  %v2191_v63 = vrot.slane %v2183_v1, 2  ;;  %v2178_v14 = vadd.f32 %v2170_v27, %v2158_v8 }
 0x2c2   : > { %v2132_v16 = vadd.f32 %v2124_v54, %v2112_v41  ;;  %v2179_v18 = vadd.f32 %v2171_v56, %v2159_v34  ;;  %v2156_v32 = vmul.f32 0.036000773, %v6195_v12  ;;  %v2184_v15 = vmul.f32 0.0010283801, %v6195_v12  ;;  %v7662_v54 = vld [vmem:[#allocation61_spill] sm:$0xff] }
 0x2c3   : > { %v6288_v48 = vpop.permute.xlu1 %2331  ;;  %v6297_v7 = vpop.permute.xlu0 %2329  ;;  %v6309_v26 = vadd.f32 %v2189_v42, %v2177_v58  ;;  %v6312_v10 = vmul.f32 0.0010283801, %v7662_v54  ;;  %v6316_v61 = vadd.f32 %v2190_v35, %v2178_v14  ;;  %v2172_v31 = vrot.slane %v2164_v37, 1  ;;  %v7669_v42 = vld [vmem:[#allocation42_spill] sm:$0xff]  ;;  %v7672_v35 = vld [vmem:[#allocation8_spill] sm:$0xff]  ;;  %v7676_v54 = vld [vmem:[#allocation47_spill] sm:$0xff] }
 0x2c4   : > { %7655 = vst [vmem:[#allocation30_spill] sm:$0xff] %v6288_v48  ;;  %v2152_v38 = vadd.f32 %v2144_v50, %v2132_v16  ;;  %v6318_v29 = vadd.f32 %v2191_v63, %v2179_v18  ;;  %v6327_v44 = vmul.f32 0.007598758, %v6295_v17  ;;  %v2192_v27 = vrot.slane %v2184_v15, 2  ;;  %v3823_v37 = vld [vmem:[%s4097_s3 + $0x30] sm:$0xff]  ;;  %v7670_v16 = vld [vmem:[#allocation17_spill] sm:$0xff] }
 0x2c5   : > { %2565 = vrot.lane.b32.xlu1 %v7659_v52, %s3938_s12  ;;  %2949 = vrot.lane.b32.xlu0 %v6280_v49, %s3931_s16  ;;  %7661 = vst [vmem:[#allocation41_spill] sm:$0xff] %v6309_v26  ;;  %7663 = vst [vmem:[#allocation53_spill] sm:$0xff] %v6316_v61  ;;  %v6341_v52 = vmul.f32 %v3823_v37, %v7670_v16  ;;  %v6348_v63 = vmul.f32 0.0010283801, %v7672_v35  ;;  %v6378_v37 = vmul.f32 0.036000773, %v6238_v55 }
 0x2c6   : > { %7664 = vst [vmem:[#allocation32_spill] sm:$0xff] %v6318_v29  ;;  %v2160_v12 = vadd.f32 %v2156_v32, %v2152_v38  ;;  %7666 = vst [vmem:[#allocation69_spill] sm:$0xff] %v6327_v44  ;;  %v7681_v32 = vld [vmem:[#allocation16_spill] sm:$0xff]  ;;  %v7682_v41 = vld [vmem:[#allocation57_spill] sm:$0xff]  ;;  %v6405_v33 = vmul.f32 0.036000773, %v6268_v5 }
 0x2c7   : > { %v6307_v22 = vpop.permute.xlu1 %2335  ;;  %v6314_v46 = vpop.permute.xlu0 %2333  ;;  %v6359_v38 = vmul.f32 0.007598758, %v6341_v52  ;;  %7679 = vst [vmem:[#allocation74_spill] sm:$0xff] %v6378_v37  ;;  %v6396_v50 = vmul.f32 0.0010283801, %v7682_v41 }
 0x2c8   : > { %7660 = vst [vmem:[#allocation43_spill] sm:$0xff] %v6307_v22  ;;  %v2180_v8 = vadd.f32 %v2172_v31, %v2160_v12  ;;  %v7678_v12 = vld [vmem:[#allocation63_spill] sm:$0xff]  ;;  %7684 = vst [vmem:[#allocation82_spill] sm:$0xff] %v6405_v33  ;;  %v6430_v1 = vmul.f32 0.036000773, %v6341_v52 }
 0x2c9   : > { %2899 = vrot.lane.b32.xlu1 %v6291_v60, %s3930_s18  ;;  %2601 = vrot.lane.b32.xlu0 %v6312_v10, %s3939_s21  ;;  %7675 = vst [vmem:[#allocation78_spill] sm:$0xff] %v6359_v38  ;;  %v7692_v60 = vld [vmem:[#allocation19_spill] sm:$0xff]  ;;  %v3025_v13 = vmul.f32 0.21300554, %v6115_v30  ;;  %v6471_v11 = vmul.f32 0.10936069, %v6268_v5 }
 0x2ca   : > { %v6343_v58 = vadd.f32 %v2192_v27, %v2180_v8  ;;  %v6366_v27 = vmul.f32 0.0010283801, %v7678_v12  ;;  %v3824_v12 = vld [vmem:[%s4097_s3 + $0x28] sm:$0xff]  ;;  %7690 = vst [vmem:[#allocation29_spill] sm:$0xff] %v6430_v1  ;;  %v3077_v19 = vmul.f32 0.26601171, %v6238_v55 }
 0x2cb   : > { %v6333_v56 = vpop.permute.xlu1 %2339  ;;  %v6335_v34 = vpop.permute.xlu0 %2337  ;;  %v6393_v25 = vmul.f32 %v3824_v12, %v7681_v32  ;;  %v6421_v12 = vmul.f32 0.036000773, %v6295_v17  ;;  %7696 = vst [vmem:[#allocation84_spill] sm:$0xff] %v6471_v11 }
 0x2cc   : > { %7671 = vst [vmem:[#allocation72_spill] sm:$0xff] %v6343_v58 }
 0x2cd   : > { %2535 = vrot.lane.b32.xlu1 %v7669_v42, %s3937_s26  ;;  %2903 = vrot.lane.b32.xlu0 %v6327_v44, %s3930_s18  ;;  %v6373_v42 = vmul.f32 0.10936069, %v6115_v30  ;;  %v6410_v29 = vmul.f32 0.007598758, %v6393_v25  ;;  %7687 = vst [vmem:[#allocation83_spill] sm:$0xff] %v6421_v12 }
 0x2ce   : > { %v6475_v49 = vmul.f32 0.036000773, %v6393_v25 }
 0x2cf   : > { %v6350_v14 = vpop.permute.xlu1 %2343  ;;  %v6354_v15 = vpop.permute.xlu0 %2341  ;;  %7685 = vst [vmem:[#allocation77_spill] sm:$0xff] %v6410_v29 }
 0x2d0   : > { %7673 = vst [vmem:[#allocation73_spill] sm:$0xff] %v6350_v14  ;;  %7697 = vst [vmem:[#allocation37_spill] sm:$0xff] %v6475_v49  ;;  %v3073_v14 = vmul.f32 0.26601171, %v6115_v30 }
 0x2d1   : > { %2595 = vrot.lane.b32.xlu1 %v6348_v63, %s3939_s21  ;;  %2563 = vrot.lane.b32.xlu0 %v7676_v54, %s3938_s12  ;;  %v6389_v54 = vmul.f32 0.10936069, %v6077_v59 }
 0x2d3   : > { %v6363_v31 = vpop.permute.xlu1 %2379  ;;  %v6368_v8 = vpop.permute.xlu0 %2377 }
 0x2d4   : > { %7677 = vst [vmem:[#allocation55_spill] sm:$0xff] %v6363_v31  ;;  %v6498_v31 = vmul.f32 0.21300554, %v6238_v55 }
 0x2d5   : > { %2909 = vrot.lane.b32.xlu1 %v6359_v38, %s3930_s18  ;;  %2599 = vrot.lane.b32.xlu0 %v6366_v27, %s3939_s21  ;;  %v7689_v38 = vld [vmem:[#allocation66_spill] sm:$0xff] }
 0x2d7   : > { %v6380_v16 = vpop.permute.xlu1 %2383  ;;  %v6382_v35 = vpop.permute.xlu0 %2381 }
 0x2d8   : > { %7680 = vst [vmem:[#allocation79_spill] sm:$0xff] %v6380_v16 }
 0x2d9   : > { %2993 = vrot.lane.b32.xlu1 %v6373_v42, %s3932_s22  ;;  %2953 = vrot.lane.b32.xlu0 %v6378_v37, %s3931_s16 }
 0x2db   : > { %v6398_v18 = vpop.permute.xlu1 %2387  ;;  %v6400_v58 = vpop.permute.xlu0 %2385 }
 0x2dc   : > { %7683 = vst [vmem:[#allocation81_spill] sm:$0xff] %v6398_v18 }
 0x2dd   : > { %2605 = vrot.lane.b32.xlu1 %v6396_v50, %s3939_s21  ;;  %2997 = vrot.lane.b32.xlu0 %v6389_v54, %s3932_s22 }
 0x2df   : > { %v6412_v32 = vpop.permute.xlu1 %2391  ;;  %v6414_v41 = vpop.permute.xlu0 %2389 }
 0x2e0   : > { %7686 = vst [vmem:[#allocation75_spill] sm:$0xff] %v6412_v32 }
 0x2e1   : > { %2947 = vrot.lane.b32.xlu1 %v6405_v33, %s3931_s16  ;;  %2907 = vrot.lane.b32.xlu0 %v6410_v29, %s3930_s18  ;;  %v6437_v29 = vmul.f32 0.0010283801, %v7692_v60  ;;  %v3825_v33 = vld [vmem:[%s4097_s3 + $0x38] sm:$0xff] }
 0x2e3   : > { %v6423_v23 = vpop.permute.xlu1 %2427  ;;  %v6425_v61 = vpop.permute.xlu0 %2425 }
 0x2e4   : > { %7688 = vst [vmem:[#allocation22_spill] sm:$0xff] %v6423_v23  ;;  %v6489_v23 = vmul.f32 0.0010283801, %v5767_v62 }
 0x2e5   : > { %2567 = vrot.lane.b32.xlu1 %v7689_v38, %s3938_s12  ;;  %2951 = vrot.lane.b32.xlu0 %v6421_v12, %s3931_s16  ;;  %v7693_v38 = vld [vmem:[#allocation52_spill] sm:$0xff]  ;;  %v6451_v12 = vmul.f32 0.10936069, %v6238_v55  ;;  %v6562_v55 = vmul.f32 0.21300554, %v6393_v25 }
 0x2e6   : > { %v6446_v36 = vmul.f32 %v3825_v33, %v7693_v38  ;;  %v3027_v33 = vmul.f32 0.21300554, %v6077_v59 }
 0x2e7   : > { %v6434_v26 = vpop.permute.xlu1 %2431  ;;  %v6439_v44 = vpop.permute.xlu0 %2429  ;;  %7694 = vst [vmem:[#allocation54_spill] sm:$0xff] %v6451_v12  ;;  %7713 = vst [vmem:[#allocation26_spill] sm:$0xff] %v6562_v55 }
 0x2e8   : > { %7691 = vst [vmem:[#allocation58_spill] sm:$0xff] %v6434_v26 }
 0x2e9   : > { %2957 = vrot.lane.b32.xlu1 %v6430_v1, %s3931_s16  ;;  %2603 = vrot.lane.b32.xlu0 %v6437_v29, %s3939_s21  ;;  %v6459_v1 = vmul.f32 0.007598758, %v6446_v36 }
 0x2eb   : > { %v6453_v2 = vpop.permute.xlu1 %2457  ;;  %v6455_v60 = vpop.permute.xlu0 %2433  ;;  %7695 = vst [vmem:[#allocation71_spill] sm:$0xff] %v6459_v1 }
 0x2ed   : > { %3041 = vrot.lane.b32.xlu1 %v3025_v13, %s3933_s29  ;;  %3001 = vrot.lane.b32.xlu0 %v6451_v12, %s3932_s22 }
 0x2ef   : > { %v6464_v38 = vpop.permute.xlu1 %2437  ;;  %v6466_v37 = vpop.permute.xlu0 %2461 }
 0x2f1   : > { %2911 = vrot.lane.b32.xlu1 %v6459_v1, %s3930_s18  ;;  %3045 = vrot.lane.b32.xlu0 %v3027_v33, %s3933_s29  ;;  %v6486_v1 = vmul.f32 0.10936069, %v6295_v17 }
 0x2f3   : > { %v6477_v26 = vpop.permute.xlu1 %2489  ;;  %v6479_v12 = vpop.permute.xlu0 %2465  ;;  %7698 = vst [vmem:[#allocation64_spill] sm:$0xff] %v6486_v1 }
 0x2f5   : > { %2995 = vrot.lane.b32.xlu1 %v6471_v11, %s3932_s22  ;;  %2955 = vrot.lane.b32.xlu0 %v6475_v49, %s3931_s16  ;;  %v6503_v49 = vmul.f32 0.10936069, %v6341_v52 }
 0x2f7   : > { %v6491_v32 = vpop.permute.xlu1 %2435  ;;  %v6493_v16 = vpop.permute.xlu0 %2493  ;;  %7700 = vst [vmem:[#allocation80_spill] sm:$0xff] %v6503_v49 }
 0x2f8   : > { %7699 = vst [vmem:[#allocation67_spill] sm:$0xff] %v6491_v32  ;;  %v3075_v32 = vmul.f32 0.26601171, %v6077_v59 }
 0x2f9   : > { %2607 = vrot.lane.b32.xlu1 %v6489_v23, %s3939_s21  ;;  %2999 = vrot.lane.b32.xlu0 %v6486_v1, %s3932_s22 }
 0x2fb   : > { %v6505_v11 = vpop.permute.xlu1 %2463  ;;  %v6507_v62 = vpop.permute.xlu0 %2459 }
 0x2fc   : > { %7701 = vst [vmem:[#allocation40_spill] sm:$0xff] %v6505_v11  ;;  %7702 = vst [vmem:[#allocation31_spill] sm:$0xff] %v6507_v62  ;;  %v6521_v11 = vmul.f32 0.10936069, %v6393_v25  ;;  %v6525_v62 = vmul.f32 0.036000773, %v6446_v36 }
 0x2fd   : > { %3049 = vrot.lane.b32.xlu1 %v6498_v31, %s3933_s29  ;;  %3005 = vrot.lane.b32.xlu0 %v6503_v49, %s3932_s22  ;;  %v6534_v49 = vmul.f32 0.21300554, %v6295_v17 }
 0x2fe   : > { %7703 = vst [vmem:[#allocation56_spill] sm:$0xff] %v6521_v11  ;;  %7704 = vst [vmem:[#allocation36_spill] sm:$0xff] %v6525_v62 }
 0x2ff   : > { %v6515_v18 = vpop.permute.xlu1 %2497  ;;  %v6517_v1 = vpop.permute.xlu0 %2469  ;;  %7706 = vst [vmem:[#allocation35_spill] sm:$0xff] %v6534_v49 }
 0x301   : > { %3093 = vrot.lane.b32.xlu1 %v3075_v32, %s3934_s30  ;;  %3089 = vrot.lane.b32.xlu0 %v3073_v14, %s3934_s30  ;;  %v6539_v32 = vmul.f32 0.21300554, %v6268_v5 }
 0x303   : > { %v6527_v22 = vpop.permute.xlu1 %2525  ;;  %v6529_v48 = vpop.permute.xlu0 %2521  ;;  %7707 = vst [vmem:[#allocation59_spill] sm:$0xff] %v6539_v32 }
 0x304   : > { %7705 = vst [vmem:[#allocation39_spill] sm:$0xff] %v6529_v48 }
 0x305   : > { %3003 = vrot.lane.b32.xlu1 %v6521_v11, %s3932_s22  ;;  %2959 = vrot.lane.b32.xlu0 %v6525_v62, %s3931_s16  ;;  %v6551_v11 = vmul.f32 0.21300554, %v6341_v52 }
 0x307   : > { %v6541_v14 = vpop.permute.xlu1 %2467  ;;  %v6543_v30 = vpop.permute.xlu0 %2439  ;;  %7710 = vst [vmem:[#allocation13_spill] sm:$0xff] %v6551_v11 }
 0x308   : > { %7708 = vst [vmem:[#allocation70_spill] sm:$0xff] %v6541_v14  ;;  %7709 = vst [vmem:[#allocation11_spill] sm:$0xff] %v6543_v30 }
 0x309   : > { %3047 = vrot.lane.b32.xlu1 %v6534_v49, %s3933_s29  ;;  %3043 = vrot.lane.b32.xlu0 %v6539_v32, %s3933_s29  ;;  %v6566_v32 = vmul.f32 0.10936069, %v6446_v36  ;;  %v3074_v49 = vmul.f32 0.26601171, %v6268_v5 }
 0x30b   : > { %v6553_v48 = vpop.permute.xlu1 %2495  ;;  %v6555_v62 = vpop.permute.xlu0 %2491 }
 0x30c   : > { %7711 = vst [vmem:[#allocation62_spill] sm:$0xff] %v6553_v48  ;;  %7712 = vst [vmem:[#allocation51_spill] sm:$0xff] %v6555_v62 }
 0x30d   : > { %3097 = vrot.lane.b32.xlu1 %v3077_v19, %s3934_s30  ;;  %3053 = vrot.lane.b32.xlu0 %v6551_v11, %s3933_s29  ;;  %v2261_v19 = vadd.f32 %v6192_v43, %v6312_v10  ;;  %v2259_v11 = vadd.f32 %v6170_v47, %v6181_v28  ;;  %v2257_v43 = vadd.f32 %v6158_v6, %v6224_v4 }
 0x30e   : > { %v2263_v10 = vadd.f32 %v6204_v40, %v6396_v50  ;;  %v3079_v40 = vmul.f32 0.26601171, %v6341_v52 }
 0x30f   : > { %v2530_v30 = vpop.permute.xlu1 %2529  ;;  %v2502_v14 = vpop.permute.xlu0 %2501  ;;  %v2305_v28 = vadd.f32 %v6226_v45, %v2257_v43  ;;  %v7718_v43 = vld [vmem:[#allocation43_spill] sm:$0xff] }
 0x311   : > { %3125 = vrot.lane.b32.xlu1 %v3027_v33, %s3935_s4  ;;  %3121 = vrot.lane.b32.xlu0 %v3025_v13, %s3935_s4  ;;  %v3076_v33 = vmul.f32 0.26601171, %v6295_v17  ;;  %v2309_v13 = vadd.f32 %v6249_v21, %v2261_v19  ;;  %v2307_v17 = vadd.f32 %v6234_v39, %v2259_v11  ;;  %v2311_v21 = vadd.f32 %v6273_v57, %v2263_v10 }
 0x312   : > { %v2353_v4 = vadd.f32 %v6297_v7, %v2305_v28 }
 0x313   : > { %v6568_v48 = vpop.permute.xlu1 %2557  ;;  %v6572_v62 = vpop.permute.xlu0 %2553  ;;  %v2355_v19 = vadd.f32 %v6314_v46, %v2307_v17  ;;  %v2359_v39 = vadd.f32 %v6354_v15, %v2311_v21  ;;  %v6609_v17 = vmul.f32 0.0010283801, %v6077_v59  ;;  %v2258_v59 = vadd.f32 %v6156_v0, %v6348_v63 }
 0x314   : > { %7714 = vst [vmem:[#allocation61_spill] sm:$0xff] %v6572_v62  ;;  %v3078_v0 = vmul.f32 0.26601171, %v6393_v25  ;;  %v2260_v63 = vadd.f32 %v6165_v53, %v6366_v27 }
 0x315   : > { %3051 = vrot.lane.b32.xlu1 %v6562_v55, %s3933_s29  ;;  %3007 = vrot.lane.b32.xlu0 %v6566_v32, %s3932_s22  ;;  %v2357_v55 = vadd.f32 %v6335_v34, %v2309_v13  ;;  %v2403_v45 = vadd.f32 %v6382_v35, %v2355_v19  ;;  %v2306_v53 = vadd.f32 %v6219_v51, %v2258_v59  ;;  %v7721_v19 = vld [vmem:[#allocation73_spill] sm:$0xff] }
 0x316   : > { %v2308_v27 = vadd.f32 %v6232_v24, %v2260_v63  ;;  %v7731_v63 = vld [vmem:[#allocation40_spill] sm:$0xff] }
 0x317   : > { %v6587_v62 = vpop.permute.xlu1 %2499  ;;  %v6591_v47 = vpop.permute.xlu0 %2471  ;;  %v2405_v6 = vadd.f32 %v6400_v58, %v2357_v55  ;;  %v2401_v55 = vadd.f32 %v6368_v8, %v2353_v4  ;;  %v2451_v7 = vadd.f32 %v6439_v44, %v2403_v45 }
 0x318   : > { %v2356_v51 = vadd.f32 %v7718_v43, %v2308_v27  ;;  %v7735_v27 = vld [vmem:[#allocation62_spill] sm:$0xff] }
 0x319   : > { %3095 = vrot.lane.b32.xlu1 %v3076_v33, %s3934_s30  ;;  %3091 = vrot.lane.b32.xlu0 %v3074_v49, %s3934_s30  ;;  %v2453_v57 = vadd.f32 %v6455_v60, %v2405_v6  ;;  %v2407_v49 = vadd.f32 %v6414_v41, %v2359_v39  ;;  %v2449_v34 = vadd.f32 %v6425_v61, %v2401_v55  ;;  %v7715_v33 = vld [vmem:[#allocation39_spill] sm:$0xff] }
 0x31a   : > { %v2483_v8 = vadd.f32 %v6466_v37, %v2451_v7  ;;  %v2262_v41 = vadd.f32 %v6190_v20, %v6437_v29  ;;  %v6642_v20 = vmul.f32 0.21300554, %v6446_v36  ;;  %v7723_v39 = vld [vmem:[#allocation79_spill] sm:$0xff] }
 0x31b   : > { %v6602_v11 = vpop.permute.xlu1 %2527  ;;  %v6606_v50 = vpop.permute.xlu0 %2523  ;;  %v2485_v46 = vadd.f32 %v6479_v12, %v2453_v57  ;;  %v2455_v58 = vadd.f32 %v6464_v38, %v2407_v49  ;;  %v2481_v61 = vadd.f32 %v6453_v2, %v2449_v34  ;;  %v2264_v2 = vadd.f32 %v6202_v3, %v6489_v23  ;;  %v7717_v23 = vld [vmem:[#allocation30_spill] sm:$0xff]  ;;  %v7720_v28 = vld [vmem:[#allocation61_spill] sm:$0xff]  ;;  %v7724_v49 = vld [vmem:[#allocation67_spill] sm:$0xff] }
 0x31c   : > { %v2310_v29 = vadd.f32 %v6244_v9, %v2262_v41  ;;  %v7716_v9 = vld [vmem:[#allocation65_spill] sm:$0xff]  ;;  %v2404_v45 = vadd.f32 %v7723_v39, %v2356_v51  ;;  %v7726_v34 = vld [vmem:[#allocation75_spill] sm:$0xff]  ;;  %v7742_v39 = vld [vmem:[#allocation26_spill] sm:$0xff] }
 0x31d   : > { %3129 = vrot.lane.b32.xlu1 %v6498_v31, %s3935_s4  ;;  %3101 = vrot.lane.b32.xlu0 %v3079_v40, %s3934_s30  ;;  %v2517_v35 = vadd.f32 %v6515_v18, %v2485_v46  ;;  %v2487_v12 = vadd.f32 %v6517_v1, %v2455_v58  ;;  %v2515_v18 = vadd.f32 %v6493_v16, %v2483_v8  ;;  %v7722_v40 = vld [vmem:[#allocation55_spill] sm:$0xff]  ;;  %v7728_v8 = vld [vmem:[#allocation58_spill] sm:$0xff] }
 0x31e   : > { %v2513_v1 = vadd.f32 %v6477_v26, %v2481_v61  ;;  %v2358_v38 = vadd.f32 %v6333_v56, %v2310_v29  ;;  %v2312_v26 = vadd.f32 %v7716_v9, %v2264_v2  ;;  %v7725_v46 = vld [vmem:[#allocation35_spill] sm:$0xff]  ;;  %v7730_v61 = vld [vmem:[#allocation70_spill] sm:$0xff] }
 0x31f   : > { %v2902_v15 = vpop.permute.xlu1 %2901  ;;  %v6627_v44 = vpop.permute.xlu0 %2897  ;;  %v2549_v37 = vadd.f32 %v2530_v30, %v2517_v35  ;;  %v2547_v30 = vadd.f32 %v6527_v22, %v2515_v18  ;;  %v7719_v22 = vld [vmem:[#allocation81_spill] sm:$0xff]  ;;  %v2452_v35 = vadd.f32 %v7728_v8, %v2404_v45  ;;  %v7729_v41 = vld [vmem:[#allocation59_spill] sm:$0xff] }
 0x320   : > { %v6625_v31 = vadd.f32 %v2902_v15, %v6609_v17  ;;  %v2545_v13 = vadd.f32 %v7715_v33, %v2513_v1  ;;  %v2406_v10 = vadd.f32 %v7719_v22, %v2358_v38  ;;  %v2360_v6 = vadd.f32 %v7721_v19, %v2312_v26  ;;  %v7727_v15 = vld [vmem:[#allocation22_spill] sm:$0xff]  ;;  %v7733_v29 = vld [vmem:[#allocation11_spill] sm:$0xff]  ;;  %v7738_v26 = vld [vmem:[#allocation13_spill] sm:$0xff] }
 0x321   : > { %3157 = vrot.lane.b32.xlu1 %v6389_v54, %s3936_s24  ;;  %3153 = vrot.lane.b32.xlu0 %v6373_v42, %s3936_s24  ;;  %v2519_v54 = vadd.f32 %v2502_v14, %v2487_v12  ;;  %v2354_v14 = vadd.f32 %v7717_v23, %v2306_v53  ;;  %v2579_v24 = vadd.f32 %v6568_v48, %v2547_v30  ;;  %v7734_v53 = vld [vmem:[#allocation54_spill] sm:$0xff]  ;;  %v7741_v19 = vld [vmem:[#allocation49_spill] sm:$0xff] }
 0x322   : > { %v2577_v56 = vadd.f32 %v7720_v28, %v2545_v13  ;;  %v2454_v7 = vadd.f32 %v7724_v49, %v2406_v10  ;;  %v2408_v58 = vadd.f32 %v7726_v34, %v2360_v6  ;;  %v2484_v18 = vadd.f32 %v7731_v63, %v2452_v35  ;;  %v7737_v13 = vld [vmem:[#allocation27_spill] sm:$0xff]  ;;  %v7739_v22 = vld [vmem:[#allocation46_spill] sm:$0xff]  ;;  %v7740_v10 = vld [vmem:[#allocation45_spill] sm:$0xff] }
 0x323   : > { %v2562_v60 = vpop.permute.xlu1 %2561  ;;  %v2534_v42 = vpop.permute.xlu0 %2533  ;;  %v2402_v4 = vadd.f32 %v7722_v40, %v2354_v14  ;;  %v6690_v9 = vmul.f32 0.0010283801, %v7737_v13  ;;  %v6699_v28 = vmul.f32 0.0010283801, %v7740_v10  ;;  %v6719_v49 = vmul.f32 0.0010283801, %v6268_v5 }
 0x324   : > { %v6651_v16 = vadd.f32 %v2562_v60, %v2549_v37  ;;  %v2551_v3 = vadd.f32 %v2534_v42, %v2519_v54  ;;  %v2486_v12 = vadd.f32 %v7730_v61, %v2454_v7  ;;  %v7732_v37 = vld [vmem:[#allocation31_spill] sm:$0xff]  ;;  %v2456_v1 = vadd.f32 %v7733_v29, %v2408_v58  ;;  %v7744_v34 = vld [vmem:[#allocation84_spill] sm:$0xff]  ;;  %v7745_v5 = vld [vmem:[#allocation74_spill] sm:$0xff] }
 0x325   : > { %3099 = vrot.lane.b32.xlu1 %v3078_v0, %s3934_s30  ;;  %3055 = vrot.lane.b32.xlu0 %v6642_v20, %s3933_s29  ;;  %v2450_v59 = vadd.f32 %v7727_v15, %v2402_v4  ;;  %v2516_v30 = vadd.f32 %v7735_v27, %v2484_v18  ;;  %v7736_v42 = vld [vmem:[#allocation51_spill] sm:$0xff]  ;;  %v6745_v63 = vmul.f32 0.0010283801, %v6341_v52  ;;  %v7748_v29 = vld [vmem:[#allocation50_spill] sm:$0xff]  ;;  %v7749_v52 = vld [vmem:[#allocation28_spill] sm:$0xff] }
 0x326   : > { %v2518_v60 = vadd.f32 %v6587_v62, %v2486_v12  ;;  %v2488_v33 = vadd.f32 %v6591_v47, %v2456_v1  ;;  %v2921_v47 = vadd.f32 %v6627_v44, %v6690_v9 }
 0x327   : > { %v2598_v21 = vpop.permute.xlu1 %2597  ;;  %v2594_v55 = vpop.permute.xlu0 %2593  ;;  %v2482_v2 = vadd.f32 %v7732_v37, %v2450_v59  ;;  %v2548_v43 = vadd.f32 %v6602_v11, %v2516_v30  ;;  %v3080_v11 = vmul.f32 0.26601171, %v6446_v36 }
 0x328   : > { %v6667_v57 = vadd.f32 %v2598_v21, %v2579_v24  ;;  %v6670_v48 = vadd.f32 %v2594_v55, %v2577_v56 }
 0x329   : > { %3127 = vrot.lane.b32.xlu1 %v7725_v46, %s3935_s4  ;;  %3123 = vrot.lane.b32.xlu0 %v7729_v41, %s3935_s4  ;;  %v2514_v38 = vadd.f32 %v7736_v42, %v2482_v2  ;;  %v7743_v46 = vld [vmem:[#allocation64_spill] sm:$0xff] }
 0x32a   : > { %v7747_v41 = vld [vmem:[#allocation80_spill] sm:$0xff]  ;;  %v2630_v18 = vmul.f32 0.007598758, %v6667_v57  ;;  %v2649_v37 = vmul.f32 0.036000773, %v6670_v48 }
 0x32b   : > { %v2532_v0 = vpop.permute.xlu1 %2531  ;;  %v2504_v54 = vpop.permute.xlu0 %2503  ;;  %v2546_v62 = vadd.f32 %v6606_v50, %v2514_v38  ;;  %v2626_v1 = vmul.f32 0.0010283801, %v6667_v57  ;;  %v2705_v27 = vmul.f32 0.21300554, %v6670_v48  ;;  %v2741_v30 = vmul.f32 0.26601171, %v6670_v48 }
 0x32c   : > { %v2550_v23 = vadd.f32 %v2532_v0, %v2518_v60  ;;  %v2520_v51 = vadd.f32 %v2504_v54, %v2488_v33  ;;  %v6756_v54 = vmul.f32 0.036000773, %v6667_v57  ;;  %v2625_v60 = vmul.f32 0.0010283801, %v6670_v48 }
 0x32d   : > { %3161 = vrot.lane.b32.xlu1 %v7734_v53, %s3936_s24  ;;  %3133 = vrot.lane.b32.xlu0 %v7738_v26, %s3935_s4  ;;  %v2669_v53 = vmul.f32 0.10936069, %v6670_v48  ;;  %v6765_v38 = vmul.f32 0.10936069, %v6667_v57  ;;  %v6768_v33 = vmul.f32 0.21300554, %v6667_v57 }
 0x32e   : > { %v6771_v13 = vmul.f32 0.26601171, %v6667_v57 }
 0x32f   : > { %v2560_v14 = vpop.permute.xlu1 %2559  ;;  %v2556_v24 = vpop.permute.xlu0 %2555  ;;  %v2685_v57 = vrot.slane %v2669_v53, 3 }
 0x330   : > { %v6703_v56 = vadd.f32 %v2560_v14, %v2548_v43  ;;  %v2578_v21 = vadd.f32 %v2556_v24, %v2546_v62  ;;  %v2638_v43 = vrot.slane %v2630_v18, 1 }
 0x331   : > { %3189 = vrot.lane.b32.xlu1 %v7739_v22, %s3937_s26  ;;  %3185 = vrot.lane.b32.xlu0 %v7741_v19, %s3937_s26  ;;  %v2757_v19 = vrot.slane %v2741_v30, 5 }
 0x333   : > { %v2946_v50 = vpop.permute.xlu1 %2945  ;;  %v2906_v40 = vpop.permute.xlu0 %2905 }
 0x334   : > { %v6708_v6 = vadd.f32 %v2946_v50, %v2921_v47  ;;  %v6711_v4 = vadd.f32 %v2906_v40, %v6699_v28 }
 0x335   : > { %3131 = vrot.lane.b32.xlu1 %v7742_v39, %s3935_s4  ;;  %3103 = vrot.lane.b32.xlu0 %v3080_v11, %s3934_s30  ;;  %v2777_v11 = vrot.slane %v2705_v27, 6 }
 0x337   : > { %v2566_v44 = vpop.permute.xlu1 %2565  ;;  %v2950_v55 = vpop.permute.xlu0 %2949 }
 0x338   : > { %v6716_v45 = vadd.f32 %v2566_v44, %v2551_v3  ;;  %v6722_v7 = vadd.f32 %v2950_v55, %v6625_v31  ;;  %v2629_v3 = vmul.f32 0.007598758, %v6670_v48  ;;  %v7746_v31 = vld [vmem:[#allocation68_spill] sm:$0xff] }
 0x339   : > { %3159 = vrot.lane.b32.xlu1 %v7743_v46, %s3936_s24  ;;  %3155 = vrot.lane.b32.xlu0 %v7744_v34, %s3936_s24  ;;  %v6738_v35 = vmul.f32 0.0010283801, %v7746_v31  ;;  %v7750_v48 = vld [vmem:[#allocation56_spill] sm:$0xff]  ;;  %v2797_v34 = vrot.slane %v2669_v53, 7  ;;  %v2724_v53 = vrot.slane %v6768_v33, 4 }
 0x33b   : > { %v2900_v58 = vpop.permute.xlu1 %2899  ;;  %v2602_v59 = vpop.permute.xlu0 %2601 }
 0x33c   : > { %v6729_v15 = vadd.f32 %v2900_v58, %v6719_v49  ;;  %v6733_v8 = vadd.f32 %v2602_v59, %v6651_v16  ;;  %v2637_v16 = vrot.slane %v2629_v3, 1  ;;  %v7751_v3 = vld [vmem:[#allocation83_spill] sm:$0xff] }
 0x33d   : > { %3193 = vrot.lane.b32.xlu1 %v7745_v5, %s3937_s26  ;;  %3165 = vrot.lane.b32.xlu0 %v7747_v41, %s3936_s24 }
 0x33e   : > { %v2645_v62 = vadd.f32 %v2637_v16, %v2625_v60  ;;  %v2646_v60 = vadd.f32 %v2638_v43, %v2626_v1  ;;  %v2760_v1 = vrot.slane %v6771_v13, 5  ;;  %v2780_v43 = vrot.slane %v6768_v33, 6 }
 0x33f   : > { %v2536_v61 = vpop.permute.xlu1 %2535  ;;  %v2904_v0 = vpop.permute.xlu0 %2903 }
 0x340   : > { %v6742_v12 = vadd.f32 %v2536_v61, %v2520_v51  ;;  %v6750_v2 = vadd.f32 %v2904_v0, %v6738_v35  ;;  %v2657_v51 = vrot.slane %v2649_v37, 2  ;;  %v7752_v61 = vld [vmem:[#allocation82_spill] sm:$0xff]  ;;  %v2658_v0 = vrot.slane %v6756_v54, 2 }
 0x341   : > { %3221 = vrot.lane.b32.xlu1 %v7748_v29, %s3938_s12  ;;  %3217 = vrot.lane.b32.xlu0 %v7749_v52, %s3938_s12  ;;  %v2688_v52 = vrot.slane %v6765_v38, 3 }
 0x342   : > { %v2665_v46 = vadd.f32 %v2657_v51, %v2645_v62  ;;  %v2800_v51 = vrot.slane %v6765_v38, 7 }
 0x343   : > { %v2596_v42 = vpop.permute.xlu1 %2595  ;;  %v2564_v14 = vpop.permute.xlu0 %2563 }
 0x344   : > { %v6773_v26 = vadd.f32 %v2596_v42, %v2578_v21  ;;  %v6775_v24 = vadd.f32 %v2564_v14, %v2550_v23  ;;  %v2721_v21 = vrot.slane %v2705_v27, 4 }
 0x345   : > { %3163 = vrot.lane.b32.xlu1 %v7750_v48, %s3936_s24  ;;  %3135 = vrot.lane.b32.xlu0 %v6642_v20, %s3935_s4  ;;  %v7754_v48 = vld [vmem:[#allocation29_spill] sm:$0xff] }
 0x346   : > { %v2670_v22 = vmul.f32 0.10936069, %v6773_v26  ;;  %v2706_v10 = vmul.f32 0.21300554, %v6773_v26  ;;  %v2742_v47 = vmul.f32 0.26601171, %v6773_v26 }
 0x347   : > { %v2910_v50 = vpop.permute.xlu1 %2909  ;;  %v2600_v55 = vpop.permute.xlu0 %2599 }
 0x348   : > { %v2686_v40 = vrot.slane %v2670_v22, 3  ;;  %v2722_v23 = vrot.slane %v2706_v10, 4  ;;  %v2758_v39 = vrot.slane %v2742_v47, 5  ;;  %v2778_v44 = vrot.slane %v2706_v10, 6 }
 0x349   : > { %v2798_v58 = vrot.slane %v2670_v22, 7  ;;  %v6785_v59 = vadd.f32 %v2910_v50, %v6745_v63  ;;  %3191 = vrot.lane.b32.xlu1 %v7751_v3, %s3937_s26  ;;  %3187 = vrot.lane.b32.xlu0 %v7752_v61, %s3937_s26  ;;  %v6798_v37 = vadd.f32 %v2600_v55, %v6703_v56  ;;  %v7753_v56 = vld [vmem:[#allocation76_spill] sm:$0xff]  ;;  %v2845_v3 = vmul.f32 0.0010283801, %v6773_v26 }
 0x34a   : > { %v2687_v20 = vsel %vm696_vm0, %v2685_v57, %v2686_v40  ;;  %v2723_v5 = vsel %vm733_vm1, %v2721_v21, %v2722_v23  ;;  %v2759_v31 = vsel %vm770_vm2, %v2757_v19, %v2758_v39  ;;  %v2779_v41 = vsel %vm791_vm3, %v2777_v11, %v2778_v44 }
 0x34b   : > { %v2701_v18 = vadd.f32 %v2687_v20, %v2665_v46  ;;  %v2799_v16 = vsel %vm812_vm4, %v2797_v34, %v2798_v58  ;;  %v2994_v29 = vpop.permute.xlu1 %2993  ;;  %v2954_v30 = vpop.permute.xlu0 %2953  ;;  %v2672_v14 = vmul.f32 0.10936069, %v6798_v37  ;;  %v2708_v54 = vmul.f32 0.21300554, %v6798_v37 }
 0x34c   : > { %v6803_v27 = vadd.f32 %v2994_v29, %v6708_v6  ;;  %v2744_v62 = vmul.f32 0.26601171, %v6798_v37  ;;  %v6814_v6 = vadd.f32 %v2954_v30, %v6711_v4  ;;  %v2666_v19 = vadd.f32 %v2658_v0, %v2646_v60 }
 0x34d   : > { %v2737_v42 = vadd.f32 %v2723_v5, %v2701_v18  ;;  %3225 = vrot.lane.b32.xlu1 %v7753_v56, %s3938_s12  ;;  %3197 = vrot.lane.b32.xlu0 %v7754_v48, %s3937_s26  ;;  %v2689_v10 = vrot.slane %v2672_v14, 3  ;;  %v2725_v47 = vrot.slane %v2708_v54, 4  ;;  %v2825_v11 = vmul.f32 0.007598758, %v6773_v26 }
 0x34e   : > { %v2761_v57 = vrot.slane %v2744_v62, 5  ;;  %v2781_v50 = vrot.slane %v2708_v54, 6  ;;  %v2801_v13 = vrot.slane %v2672_v14, 7  ;;  %v2817_v58 = vmul.f32 0.036000773, %v6773_v26  ;;  %v7756_v54 = vld [vmem:[#allocation69_spill] sm:$0xff] }
 0x34f   : > { %v2773_v22 = vadd.f32 %v2759_v31, %v2737_v42  ;;  %v2606_v21 = vpop.permute.xlu1 %2605  ;;  %v2998_v40 = vpop.permute.xlu0 %2997  ;;  %v2690_v38 = vsel %vm696_vm0, %v2688_v52, %v2689_v10  ;;  %v2726_v4 = vsel %vm733_vm1, %v2724_v53, %v2725_v47  ;;  %v2833_v61 = vrot.slane %v2825_v11, 1  ;;  %v7758_v10 = vld [vmem:[#allocation48_spill] sm:$0xff]  ;;  %v7759_v47 = vld [vmem:[#allocation9_spill] sm:$0xff] }
 0x350   : > { %v2762_v23 = vsel %vm770_vm2, %v2760_v1, %v2761_v57  ;;  %v2702_v39 = vadd.f32 %v2690_v38, %v2666_v19  ;;  %v2782_v44 = vsel %vm791_vm3, %v2780_v43, %v2781_v50  ;;  %v2802_v55 = vsel %vm812_vm4, %v2800_v51, %v2801_v13  ;;  %v7757_v51 = vld [vmem:[#allocation25_spill] sm:$0xff] }
 0x351   : > { %v2793_v33 = vadd.f32 %v2779_v41, %v2773_v22  ;;  %3261 = vrot.lane.b32.xlu1 %v6609_v17, %s3939_s21  ;;  %v6827_v46 = vadd.f32 %v2606_v21, %v6716_v45  ;;  %3257 = vrot.lane.b32.xlu0 %v6690_v9, %s3939_s21  ;;  %v6834_v20 = vadd.f32 %v2998_v40, %v6722_v7  ;;  %v6837_v0 = vmul.f32 0.0010283801, %v6393_v25  ;;  %v7755_v45 = vld [vmem:[#allocation37_spill] sm:$0xff] }
 0x352   : > { %v2738_v5 = vadd.f32 %v2726_v4, %v2702_v39  ;;  %v2631_v9 = vmul.f32 0.007598758, %v6733_v8  ;;  %v2853_v26 = vrot.slane %v2845_v3, 2  ;;  %v2651_v60 = vmul.f32 0.036000773, %v6733_v8  ;;  %v7760_v38 = vld [vmem:[#allocation41_spill] sm:$0xff] }
 0x353   : > { %v2813_v34 = vadd.f32 %v2799_v16, %v2793_v33  ;;  %v2948_v17 = vpop.permute.xlu1 %2947  ;;  %v2908_v31 = vpop.permute.xlu0 %2907  ;;  %v2673_v25 = vmul.f32 0.10936069, %v6733_v8  ;;  %v2826_v53 = vmul.f32 0.007598758, %v6798_v37  ;;  %v2818_v1 = vmul.f32 0.036000773, %v6798_v37 }
 0x354   : > { %v2774_v18 = vadd.f32 %v2762_v23, %v2738_v5  ;;  %v6843_v16 = vadd.f32 %v2948_v17, %v6729_v15  ;;  %v6851_v14 = vadd.f32 %v2908_v31, %v6837_v0  ;;  %v2639_v62 = vrot.slane %v2631_v9, 1  ;;  %v7761_v4 = vld [vmem:[#allocation44_spill] sm:$0xff] }
 0x355   : > { %v2821_v41 = vadd.f32 %v2817_v58, %v2813_v34  ;;  %3195 = vrot.lane.b32.xlu1 %v7755_v45, %s3937_s26  ;;  %3167 = vrot.lane.b32.xlu0 %v6566_v32, %s3936_s24  ;;  %v2846_v43 = vmul.f32 0.0010283801, %v6798_v37  ;;  %v2627_v48 = vmul.f32 0.0010283801, %v6733_v8  ;;  %v3577_v57 = vadd.f32 0.0001, %v7759_v47 }
 0x356   : > { %v2794_v52 = vadd.f32 %v2782_v44, %v2774_v18  ;;  %v2745_v21 = vmul.f32 0.26601171, %v6733_v8  ;;  %v2834_v11 = vrot.slane %v2826_v53, 1  ;;  %v2659_v13 = vrot.slane %v2651_v60, 2  ;;  %v7763_v34 = vld [vmem:[#allocation78_spill] sm:$0xff]  ;;  %v7765_v53 = vld [vmem:[#allocation36_spill] sm:$0xff] }
 0x357   : > { %v2841_v7 = vadd.f32 %v2833_v61, %v2821_v41  ;;  %v2568_v29 = vpop.permute.xlu1 %2567  ;;  %v2952_v30 = vpop.permute.xlu0 %2951  ;;  %v6879_v33 = vmul.f32 0.0010283801, %v6446_v36  ;;  %v7762_v23 = vsub.f32 %v7760_v38, %v7761_v4  ;;  %v2647_v39 = vadd.f32 %v2639_v62, %v2627_v48 }
 0x358   : > { %v6854_v15 = vadd.f32 %v2568_v29, %v6742_v12  ;;  %v6857_v32 = vadd.f32 %v2952_v30, %v6750_v2  ;;  %v2814_v56 = vadd.f32 %v2802_v55, %v2794_v52  ;;  %v2709_v12 = vmul.f32 0.21300554, %v6733_v8 }
 0x359   : > { %v2861_v42 = vadd.f32 %v2853_v26, %v2841_v7  ;;  %3223 = vrot.lane.b32.xlu1 %v7756_v54, %s3938_s12  ;;  %3219 = vrot.lane.b32.xlu0 %v7757_v51, %s3938_s12  ;;  %v2691_v44 = vrot.slane %v2673_v25, 3  ;;  %v2763_v17 = vrot.slane %v2745_v21, 5  ;;  %v7764_v7 = vld [vmem:[#allocation77_spill] sm:$0xff]  ;;  %v2667_v26 = vadd.f32 %v2659_v13, %v2647_v39 }
 0x35a   : > { %v2822_v19 = vadd.f32 %v2818_v1, %v2814_v56  ;;  %v2727_v36 = vrot.slane %v2709_v12, 4  ;;  %v2783_v5 = vrot.slane %v2709_v12, 6  ;;  %v2803_v29 = vrot.slane %v2673_v25, 7  ;;  %v7767_v21 = vld [vmem:[#allocation21_spill] sm:$0xff] }
 0x35b   : > { %v2958_v22 = vpop.permute.xlu1 %2957  ;;  %v3545_v2 = vsub.f32 %v2861_v42, %v7758_v10  ;;  %v2604_v37 = vpop.permute.xlu0 %2603  ;;  %v2632_v48 = vmul.f32 0.007598758, %v6827_v46 }
 0x35c   : > { %v6871_v50 = vadd.f32 %v2958_v22, %v6785_v59  ;;  %v6874_v40 = vadd.f32 %v2604_v37, %v6775_v24  ;;  %v2842_v55 = vadd.f32 %v2834_v11, %v2822_v19  ;;  %v2854_v59 = vrot.slane %v2846_v43, 2  ;;  %v7766_v22 = vld [vmem:[#allocation12_spill] sm:$0xff]  ;;  %v7768_v11 = vld [vmem:[#allocation53_spill] sm:$0xff]  ;;  %v7769_v37 = vld [vmem:[#allocation18_spill] sm:$0xff] }
 0x35d   : > { %3265 = vrot.lane.b32.xlu1 %v6699_v28, %s3939_s21  ;;  %v3581_v8 = vadd.f32 %v3545_v2, %v7762_v23  ;;  %3229 = vrot.lane.b32.xlu0 %v7763_v34, %s3938_s12  ;;  %v3578_v19 = vadd.f32 0.0001, %v7767_v21  ;;  %v7770_v13 = vsub.f32 %v7768_v11, %v7769_v37 }
 0x35e   : > { %v2674_v24 = vmul.f32 0.10936069, %v6874_v40  ;;  %v2710_v58 = vmul.f32 0.21300554, %v6874_v40  ;;  %v2746_v28 = vmul.f32 0.26601171, %v6874_v40  ;;  %v2862_v31 = vadd.f32 %v2854_v59, %v2842_v55 }
 0x35f   : > { %v3042_v3 = vpop.permute.xlu1 %3041  ;;  %v3002_v41 = vpop.permute.xlu0 %3001  ;;  %v3585_v2 = vadd.f32 0.0009, %v3581_v8  ;;  %v7771_v59 = vld [vmem:[#allocation71_spill] sm:$0xff] }
 0x360   : > { %v2692_v61 = vrot.slane %v2674_v24, 3  ;;  %v2728_v45 = vrot.slane %v2710_v58, 4  ;;  %v2764_v9 = vrot.slane %v2746_v28, 5  ;;  %v2784_v18 = vrot.slane %v2710_v58, 6 }
 0x361   : > { %3227 = vrot.lane.b32.xlu1 %v7764_v7, %s3938_s12  ;;  %v2804_v60 = vrot.slane %v2674_v24, 7  ;;  %v6892_v52 = vadd.f32 %v3042_v3, %v6803_v27  ;;  %3199 = vrot.lane.b32.xlu0 %v7765_v53, %s3937_s26  ;;  %v6902_v25 = vadd.f32 %v3002_v41, %v6814_v6  ;;  %v3546_v10 = vsub.f32 %v2862_v31, %v7766_v22 }
 0x362   : > { %v2693_v30 = vsel %vm696_vm0, %v2691_v44, %v2692_v61  ;;  %v2729_v42 = vsel %vm733_vm1, %v2727_v36, %v2728_v45  ;;  %v2765_v54 = vsel %vm770_vm2, %v2763_v17, %v2764_v9  ;;  %v2785_v62 = vsel %vm791_vm3, %v2783_v5, %v2784_v18 }
 0x363   : > { %v2912_v56 = vpop.permute.xlu1 %2911  ;;  %v2703_v1 = vadd.f32 %v2693_v30, %v2667_v26  ;;  %v2805_v43 = vsel %vm812_vm4, %v2803_v29, %v2804_v60  ;;  %v3046_v51 = vpop.permute.xlu0 %3045  ;;  %v3582_v38 = vadd.f32 %v3546_v10, %v7770_v13  ;;  %v6920_v4 = vmul.f32 %v3585_v2, %v3577_v57  ;;  %v7772_v13 = vld [vmem:[#allocation15_spill] sm:$0xff] }
 0x364   : > { %v6905_v27 = vadd.f32 %v2912_v56, %v6879_v33  ;;  %v6909_v12 = vadd.f32 %v3046_v51, %v6834_v20  ;;  %v2652_v20 = vmul.f32 0.036000773, %v6827_v46  ;;  %v2640_v44 = vrot.slane %v2632_v48, 1 }
 0x365   : > { %3263 = vrot.lane.b32.xlu1 %v6738_v35, %s3939_s21  ;;  %v2739_v47 = vadd.f32 %v2729_v42, %v2703_v1  ;;  %3259 = vrot.lane.b32.xlu0 %v6719_v49, %s3939_s21  ;;  %v2675_v35 = vmul.f32 0.10936069, %v6827_v46  ;;  %v2827_v49 = vmul.f32 0.007598758, %v6874_v40  ;;  %v3586_v34 = vadd.f32 0.0009, %v3582_v38 }
 0x366   : > { %v2628_v57 = vmul.f32 0.0010283801, %v6827_v46  ;;  %v2711_v58 = vmul.f32 0.21300554, %v6827_v46  ;;  %v2847_v28 = vmul.f32 0.0010283801, %v6874_v40  ;;  %3794 = vrcp.f32 %v6920_v4 }
 0x367   : > { %v2996_v6 = vpop.permute.xlu1 %2995  ;;  %v2775_v23 = vadd.f32 %v2765_v54, %v2739_v47  ;;  %v2956_v39 = vpop.permute.xlu0 %2955  ;;  %v6937_v36 = vmul.f32 %v3586_v34, %v3578_v19  ;;  %v2819_v5 = vmul.f32 0.036000773, %v6874_v40  ;;  %v2694_v45 = vrot.slane %v2675_v35, 3 }
 0x368   : > { %v6925_v8 = vadd.f32 %v2996_v6, %v6843_v16  ;;  %v2974_v55 = vadd.f32 %v2956_v39, %v6851_v14  ;;  %v2747_v16 = vmul.f32 0.26601171, %v6827_v46  ;;  %v2660_v14 = vrot.slane %v2652_v20, 2  ;;  %v7774_v39 = vld [vmem:[#allocation60_spill] sm:$0xff] }
 0x369   : > { %3231 = vrot.lane.b32.xlu1 %v7771_v59, %s3938_s12  ;;  %v2795_v24 = vadd.f32 %v2785_v62, %v2775_v23  ;;  %3269 = vrot.lane.b32.xlu0 %v6745_v63, %s3939_s21  ;;  %v2648_v61 = vadd.f32 %v2640_v44, %v2628_v57  ;;  %v2835_v9 = vrot.slane %v2827_v49, 1  ;;  %v2730_v29 = vrot.slane %v2711_v58, 4  ;;  %v7773_v23 = vld [vmem:[#allocation32_spill] sm:$0xff] }
 0x36a   : > { %v2766_v40 = vrot.slane %v2747_v16, 5  ;;  %v2786_v60 = vrot.slane %v2711_v58, 6  ;;  %v2806_v1 = vrot.slane %v2675_v35, 7  ;;  %v7775_v44 = vsub.f32 %v7773_v23, %v7774_v39 }
 0x36b   : > { %v2608_v3 = vpop.permute.xlu1 %2607  ;;  %v2815_v17 = vadd.f32 %v2805_v43, %v2795_v24  ;;  %v3000_v41 = vpop.permute.xlu0 %2999  ;;  %v2668_v56 = vadd.f32 %v2660_v14, %v2648_v61  ;;  %3796 = vrcp.f32 %v6937_v36 }
 0x36c   : > { %v2624_v31 = vadd.f32 %v2608_v3, %v6854_v15  ;;  %v3020_v63 = vadd.f32 %v3000_v41, %v6857_v32  ;;  %v2855_v15 = vrot.slane %v2847_v28, 2 }
 0x36d   : > { %3271 = vrot.lane.b32.xlu1 %v6879_v33, %s3939_s21  ;;  %v2823_v46 = vadd.f32 %v2819_v5, %v2815_v17  ;;  %3267 = vrot.lane.b32.xlu0 %v6837_v0, %s3939_s21 }
 0x36e   : > { %v2676_v18 = vmul.f32 0.10936069, %v2624_v31  ;;  %v2712_v7 = vmul.f32 0.21300554, %v2624_v31  ;;  %v2748_v26 = vmul.f32 0.26601171, %v2624_v31 }
 0x36f   : > { %v3050_v53 = vpop.permute.xlu1 %3049  ;;  %v2843_v30 = vadd.f32 %v2835_v9, %v2823_v46  ;;  %v3006_v32 = vpop.permute.xlu0 %3005  ;;  %v2828_v28 = vmul.f32 0.007598758, %v2624_v31  ;;  %v2820_v17 = vmul.f32 0.036000773, %v2624_v31 }
 0x370   : > { %v2695_v42 = vrot.slane %v2676_v18, 3  ;;  %v2731_v54 = vrot.slane %v2712_v7, 4  ;;  %v2767_v62 = vrot.slane %v2748_v26, 5  ;;  %v2787_v33 = vrot.slane %v2712_v7, 6 }
 0x371   : > { %v2807_v43 = vrot.slane %v2676_v18, 7  ;;  %v2863_v51 = vadd.f32 %v2855_v15, %v2843_v30  ;;  %v3069_v6 = vadd.f32 %v3050_v53, %v6902_v25  ;;  %v3023_v19 = vadd.f32 %v3006_v32, %v6871_v50  ;;  %v7776_v25 = vld [vmem:[#allocation20_spill] sm:$0xff] }
 0x372   : > { %v2696_v48 = vsel %vm696_vm0, %v2694_v45, %v2695_v42  ;;  %v2732_v22 = vsel %vm733_vm1, %v2730_v29, %v2731_v54  ;;  %v2768_v0 = vsel %vm770_vm2, %v2766_v40, %v2767_v62  ;;  %v2788_v2 = vsel %vm791_vm3, %v2786_v60, %v2787_v33  ;;  %v7777_v15 = vld [vmem:[#allocation24_spill] sm:$0xff] }
 0x373   : > { %v2704_v10 = vadd.f32 %v2696_v48, %v2668_v56  ;;  %v2808_v47 = vsel %vm812_vm4, %v2806_v1, %v2807_v43  ;;  %v3094_v21 = vpop.permute.xlu1 %3093  ;;  %v3090_v37 = vpop.permute.xlu0 %3089  ;;  %v3547_v38 = vsub.f32 %v2863_v51, %v7772_v13  ;;  %v3579_v58 = vadd.f32 0.0001, %v7776_v25  ;;  %v7778_v54 = vld [vmem:[#allocation72_spill] sm:$0xff]  ;;  %v7781_v1 = vld [vmem:[#allocation10_spill] sm:$0xff] }
 0x374   : > { %v3115_v11 = vadd.f32 %v3094_v21, %v6909_v12  ;;  %v3113_v35 = vadd.f32 %v3090_v37, %v6892_v52  ;;  %v2848_v52 = vmul.f32 0.0010283801, %v2624_v31  ;;  %v2836_v9 = vrot.slane %v2828_v28, 1 }
 0x375   : > { %v2740_v20 = vadd.f32 %v2732_v22, %v2704_v10  ;;  %v3583_v49 = vadd.f32 %v3547_v38, %v7775_v44 }
 0x376   : > { %v2856_v18 = vrot.slane %v2848_v52, 2 }
 0x377   : > { %v2776_v59 = vadd.f32 %v2768_v0, %v2740_v20  ;;  %v3004_v34 = vpop.permute.xlu1 %3003  ;;  %v2960_v24 = vpop.permute.xlu0 %2959  ;;  %v3587_v16 = vadd.f32 0.0009, %v3583_v49 }
 0x378   : > { %v3022_v57 = vadd.f32 %v3004_v34, %v2974_v55  ;;  %v2976_v12 = vadd.f32 %v2960_v24, %v6905_v27 }
 0x379   : > { %v2796_v50 = vadd.f32 %v2788_v2, %v2776_v59  ;;  %v6961_v3 = vmul.f32 %v3587_v16, %v3579_v58 }
 0x37b   : > { %v2816_v14 = vadd.f32 %v2808_v47, %v2796_v50  ;;  %v3048_v5 = vpop.permute.xlu1 %3047  ;;  %v3044_v61 = vpop.permute.xlu0 %3043  ;;  %3798 = vrcp.f32 %v6961_v3 }
 0x37c   : > { %v3068_v41 = vadd.f32 %v3048_v5, %v3020_v63  ;;  %v3066_v55 = vadd.f32 %v3044_v61, %v6925_v8  ;;  %v7779_v63 = vld [vmem:[#allocation23_spill] sm:$0xff]  ;;  %v3580_v8 = vadd.f32 0.0001, %v7781_v1 }
 0x37d   : > { %v2824_v45 = vadd.f32 %v2820_v17, %v2816_v14  ;;  %v7780_v62 = vsub.f32 %v7778_v54, %v7779_v63  ;;  %v7783_v54 = vld [vmem:[#allocation14_spill] sm:$0xff] }
 0x37e   : > { %v6977_v63 = vmul.f32 2.0, %v7783_v54 }
 0x37f   : > { %v2844_v46 = vadd.f32 %v2836_v9, %v2824_v45  ;;  %v3098_v7 = vpop.permute.xlu1 %3097  ;;  %v3054_v29 = vpop.permute.xlu0 %3053 }
 0x380   : > { %v3117_v26 = vadd.f32 %v3098_v7, %v3069_v6  ;;  %v3071_v40 = vadd.f32 %v3054_v29, %v3023_v19 }
 0x381   : > { %v2864_v60 = vadd.f32 %v2856_v18, %v2844_v46 }
 0x383   : > { %v3126_v27 = vpop.permute.xlu1 %3125  ;;  %v3548_v53 = vsub.f32 %v2864_v60, %v7777_v15  ;;  %v3122_v42 = vpop.permute.xlu0 %3121 }
 0x384   : > { %v3147_v30 = vadd.f32 %v3126_v27, %v3115_v11  ;;  %v3145_v31 = vadd.f32 %v3122_v42, %v3113_v35 }
 0x385   : > { %v3584_v32 = vadd.f32 %v3548_v53, %v7780_v62  ;;  %v7782_v53 = vld [vmem:[#allocation34_spill] sm:$0xff] }
 0x386   : > { %v6973_v42 = vmul.f32 2.0, %v7782_v53 }
 0x387   : > { %v3052_v56 = vpop.permute.xlu1 %3051  ;;  %v3588_v33 = vadd.f32 0.0009, %v3584_v32  ;;  %v3008_v51 = vpop.permute.xlu0 %3007 }
 0x388   : > { %v3070_v43 = vadd.f32 %v3052_v56, %v3022_v57  ;;  %v3024_v48 = vadd.f32 %v3008_v51, %v2976_v12 }
 0x389   : > { %v6969_v22 = vmul.f32 %v3588_v33, %v3580_v8 }
 0x38b   : > { %v3096_v0 = vpop.permute.xlu1 %3095  ;;  %v3092_v2 = vpop.permute.xlu0 %3091  ;;  %3800 = vrcp.f32 %v6969_v22 }
 0x38c   : > { %v3116_v10 = vadd.f32 %v3096_v0, %v3068_v41  ;;  %v3114_v47 = vadd.f32 %v3092_v2, %v3066_v55 }
 0x38f   : > { %v3130_v6 = vpop.permute.xlu1 %3129  ;;  %v3102_v19 = vpop.permute.xlu0 %3101 }
 0x390   : > { %v3149_v21 = vadd.f32 %v3130_v6, %v3117_v26  ;;  %v3119_v11 = vadd.f32 %v3102_v19, %v3071_v40 }
 0x393   : > { %v3158_v37 = vpop.permute.xlu1 %3157  ;;  %v3154_v13 = vpop.permute.xlu0 %3153 }
 0x394   : > { %v3177_v38 = vadd.f32 %v3154_v13, %v3145_v31  ;;  %v3179_v41 = vadd.f32 %v3158_v37, %v3147_v30 }
 0x397   : > { %v3100_v20 = vpop.permute.xlu1 %3099  ;;  %v3056_v35 = vpop.permute.xlu0 %3055 }
 0x398   : > { %v3118_v30 = vadd.f32 %v3100_v20, %v3070_v43  ;;  %v3072_v31 = vadd.f32 %v3056_v35, %v3024_v48 }
 0x39b   : > { %v3128_v23 = vpop.permute.xlu1 %3127  ;;  %v3124_v39 = vpop.permute.xlu0 %3123 }
 0x39c   : > { %v3148_v62 = vadd.f32 %v3128_v23, %v3116_v10  ;;  %v3146_v32 = vadd.f32 %v3124_v39, %v3114_v47 }
 0x39f   : > { %v3162_v44 = vpop.permute.xlu1 %3161  ;;  %v3134_v49 = vpop.permute.xlu0 %3133 }
 0x3a0   : > { %v3181_v56 = vadd.f32 %v3162_v44, %v3149_v21  ;;  %v3151_v1 = vadd.f32 %v3134_v49, %v3119_v11 }
 0x3a3   : > { %v3190_v59 = vpop.permute.xlu1 %3189  ;;  %v3186_v34 = vpop.permute.xlu0 %3185 }
 0x3a4   : > { %v3211_v45 = vadd.f32 %v3190_v59, %v3179_v41  ;;  %v3209_v46 = vadd.f32 %v3186_v34, %v3177_v38 }
 0x3a7   : > { %v3132_v57 = vpop.permute.xlu1 %3131  ;;  %v3104_v24 = vpop.permute.xlu0 %3103 }
 0x3a8   : > { %v3150_v8 = vadd.f32 %v3132_v57, %v3118_v30  ;;  %v3120_v33 = vadd.f32 %v3104_v24, %v3072_v31 }
 0x3ab   : > { %v3160_v25 = vpop.permute.xlu1 %3159  ;;  %v3156_v58 = vpop.permute.xlu0 %3155 }
 0x3ac   : > { %v3180_v2 = vadd.f32 %v3160_v25, %v3148_v62  ;;  %v3178_v6 = vadd.f32 %v3156_v58, %v3146_v32  ;;  %v6989_v58 = vpop.eup %3794 }
 0x3af   : > { %v3194_v16 = vpop.permute.xlu1 %3193  ;;  %v3166_v50 = vpop.permute.xlu0 %3165 }
 0x3b0   : > { %v3213_v19 = vadd.f32 %v3194_v16, %v3181_v56  ;;  %v3183_v37 = vadd.f32 %v3166_v50, %v3151_v1 }
 0x3b3   : > { %v3222_v28 = vpop.permute.xlu1 %3221  ;;  %v3218_v12 = vpop.permute.xlu0 %3217 }
 0x3b4   : > { %v3243_v55 = vadd.f32 %v3222_v28, %v3211_v45  ;;  %v3241_v29 = vadd.f32 %v3218_v12, %v3209_v46 }
 0x3b7   : > { %v3164_v14 = vpop.permute.xlu1 %3163  ;;  %v3136_v17 = vpop.permute.xlu0 %3135 }
 0x3b8   : > { %v3182_v13 = vadd.f32 %v3164_v14, %v3150_v8  ;;  %v3152_v11 = vadd.f32 %v3136_v17, %v3120_v33  ;;  %v6992_v14 = vpop.eup %3796 }
 0x3bb   : > { %v3192_v52 = vpop.permute.xlu1 %3191  ;;  %v3188_v5 = vpop.permute.xlu0 %3187 }
 0x3bc   : > { %v3212_v23 = vadd.f32 %v3192_v52, %v3180_v2  ;;  %v3210_v39 = vadd.f32 %v3188_v5, %v3178_v6 }
 0x3bf   : > { %v3226_v61 = vpop.permute.xlu1 %3225  ;;  %v3198_v9 = vpop.permute.xlu0 %3197 }
 0x3c0   : > { %v3245_v10 = vadd.f32 %v3226_v61, %v3213_v19  ;;  %v3215_v16 = vadd.f32 %v3198_v9, %v3183_v37  ;;  %v7000_v61 = vpop.eup %3798 }
 0x3c3   : > { %v3262_v18 = vpop.permute.xlu1 %3261  ;;  %v3258_v26 = vpop.permute.xlu0 %3257 }
 0x3c4   : > { %v3283_v7 = vadd.f32 %v3262_v18, %v3243_v55  ;;  %v3281_v40 = vadd.f32 %v3258_v26, %v3241_v29 }
 0x3c6   : > { %v3294_v27 = vmul.f32 0.007598758, %v3283_v7  ;;  %v3293_v51 = vmul.f32 0.007598758, %v3281_v40  ;;  %v3314_v38 = vmul.f32 0.036000773, %v3283_v7 }
 0x3c7   : > { %v3196_v60 = vpop.permute.xlu1 %3195  ;;  %v3168_v15 = vpop.permute.xlu0 %3167  ;;  %v6981_v20 = vmul.f32 0.10936069, %v3283_v7  ;;  %v3290_v47 = vmul.f32 0.0010283801, %v3283_v7  ;;  %v6983_v21 = vmul.f32 0.21300554, %v3283_v7 }
 0x3c8   : > { %v3302_v43 = vrot.slane %v3294_v27, 1  ;;  %v6985_v35 = vmul.f32 0.26601171, %v3283_v7  ;;  %v3301_v44 = vrot.slane %v3293_v51, 1  ;;  %v3313_v34 = vmul.f32 0.036000773, %v3281_v40  ;;  %v7004_v7 = vpop.eup %3800 }
 0x3c9   : > { %v6987_v57 = vmul.f32 0.10936069, %v3281_v40  ;;  %v3322_v50 = vrot.slane %v3314_v38, 2  ;;  %v3352_v28 = vrot.slane %v6981_v20, 3  ;;  %v3289_v12 = vmul.f32 0.0010283801, %v3281_v40 }
 0x3ca   : > { %v3310_v59 = vadd.f32 %v3302_v43, %v3290_v47  ;;  %v3388_v17 = vrot.slane %v6983_v21, 4  ;;  %v3424_v52 = vrot.slane %v6985_v35, 5  ;;  %v6996_v5 = vmul.f32 0.21300554, %v3281_v40 }
 0x3cb   : > { %v3224_v0 = vpop.permute.xlu1 %3223  ;;  %v3220_v48 = vpop.permute.xlu0 %3219  ;;  %v6998_v41 = vmul.f32 0.26601171, %v3281_v40  ;;  %v3444_v45 = vrot.slane %v6983_v21, 6  ;;  %v3464_v9 = vrot.slane %v6981_v20, 7  ;;  %v3309_v55 = vadd.f32 %v3301_v44, %v3289_v12 }
 0x3cc   : > { %v3330_v26 = vadd.f32 %v3322_v50, %v3310_v59  ;;  %v3321_v29 = vrot.slane %v3313_v34, 2  ;;  %v3349_v27 = vrot.slane %v6987_v57, 3  ;;  %v3214_v30 = vadd.f32 %v3196_v60, %v3182_v13 }
 0x3cd   : > { %v3184_v62 = vadd.f32 %v3168_v15, %v3152_v11  ;;  %v3385_v1 = vrot.slane %v6996_v5, 4  ;;  %v3421_v8 = vrot.slane %v6998_v41, 5  ;;  %v3441_v33 = vrot.slane %v6996_v5, 6 }
 0x3ce   : > { %v3244_v51 = vadd.f32 %v3224_v0, %v3212_v23  ;;  %v3329_v2 = vadd.f32 %v3321_v29, %v3309_v55  ;;  %v3242_v6 = vadd.f32 %v3220_v48, %v3210_v39  ;;  %v3461_v15 = vrot.slane %v6987_v57, 7 }
 0x3cf   : > { %v3266_v49 = vpop.permute.xlu1 %3265  ;;  %v3230_v25 = vpop.permute.xlu0 %3229 }
 0x3d0   : > { %v3285_v24 = vadd.f32 %v3266_v49, %v3245_v10  ;;  %v3247_v13 = vadd.f32 %v3230_v25, %v3215_v16 }
 0x3d2   : > { %v3295_v46 = vmul.f32 0.007598758, %v3285_v24  ;;  %v3315_v40 = vmul.f32 0.036000773, %v3285_v24  ;;  %v7007_v32 = vmul.f32 0.10936069, %v3285_v24 }
 0x3d3   : > { %v3228_v18 = vpop.permute.xlu1 %3227  ;;  %v3200_v31 = vpop.permute.xlu0 %3199  ;;  %v7009_v56 = vmul.f32 0.21300554, %v3285_v24  ;;  %v7014_v43 = vmul.f32 0.26601171, %v3285_v24  ;;  %v3291_v37 = vmul.f32 0.0010283801, %v3285_v24 }
 0x3d4   : > { %v3303_v19 = vrot.slane %v3295_v46, 1  ;;  %v3323_v10 = vrot.slane %v3315_v40, 2  ;;  %v3355_v47 = vrot.slane %v7007_v32, 3  ;;  %v3246_v0 = vadd.f32 %v3228_v18, %v3214_v30 }
 0x3d5   : > { %v3391_v21 = vrot.slane %v7009_v56, 4  ;;  %v3427_v44 = vrot.slane %v7014_v43, 5  ;;  %v3447_v49 = vrot.slane %v7009_v56, 6  ;;  %v3467_v59 = vrot.slane %v7007_v32, 7 }
 0x3d6   : > { %v3311_v39 = vadd.f32 %v3303_v19, %v3291_v37  ;;  %v3216_v50 = vadd.f32 %v3200_v31, %v3184_v62  ;;  %v3597_v32 = vmul.f32 %v6989_v58, %v6920_v4  ;;  %v3558_v4 = vadd.f32 0.0001, %v6977_v63 }
 0x3d7   : > { %v3264_v60 = vpop.permute.xlu1 %3263  ;;  %v3260_v20 = vpop.permute.xlu0 %3259 }
 0x3d8   : > { %v3284_v38 = vadd.f32 %v3264_v60, %v3244_v51  ;;  %v7019_v35 = vadd.f32 %v3260_v20, %v3242_v6  ;;  %v7031_v31 = vadd.f32 %v3323_v10, %v3311_v39 }
 0x3da   : > { %v3336_v11 = vmul.f32 0.10936069, %v3284_v38  ;;  %v3372_v48 = vmul.f32 0.21300554, %v3284_v38  ;;  %v3408_v23 = vmul.f32 0.26601171, %v3284_v38 }
 0x3db   : > { %v3232_v16 = vpop.permute.xlu1 %3231  ;;  %v3482_v5 = vmul.f32 0.036000773, %v3284_v38  ;;  %v3334_v55 = vmul.f32 0.10936069, %v7019_v35  ;;  %v3270_v46 = vpop.permute.xlu0 %3269  ;;  %v3370_v60 = vmul.f32 0.21300554, %v7019_v35 }
 0x3dc   : > { %v3353_v34 = vrot.slane %v3336_v11, 3  ;;  %v3389_v57 = vrot.slane %v3372_v48, 4  ;;  %v3425_v24 = vrot.slane %v3408_v23, 5  ;;  %v3445_v25 = vrot.slane %v3372_v48, 6 }
 0x3dd   : > { %v3465_v12 = vrot.slane %v3336_v11, 7  ;;  %v3350_v19 = vrot.slane %v3334_v55, 3  ;;  %v7033_v62 = vmul.f32 0.007598758, %v3284_v38  ;;  %v3406_v37 = vmul.f32 0.26601171, %v7019_v35 }
 0x3de   : > { %v3354_v18 = vsel %vm696_vm0, %v3352_v28, %v3353_v34  ;;  %v3390_v29 = vsel %vm733_vm1, %v3388_v17, %v3389_v57  ;;  %v3426_v30 = vsel %vm770_vm2, %v3424_v52, %v3425_v24  ;;  %v3446_v40 = vsel %vm791_vm3, %v3444_v45, %v3445_v25 }
 0x3df   : > { %v3366_v51 = vadd.f32 %v3354_v18, %v3330_v26  ;;  %v3466_v6 = vsel %vm812_vm4, %v3464_v9, %v3465_v12  ;;  %v3462_v20 = vrot.slane %v3334_v55, 7  ;;  %v3351_v17 = vsel %vm696_vm0, %v3349_v27, %v3350_v19  ;;  %v3272_v23 = vpop.permute.xlu1 %3271  ;;  %v3268_v24 = vpop.permute.xlu0 %3267 }
 0x3e0   : > { %v3386_v11 = vrot.slane %v3370_v60, 4  ;;  %v3442_v52 = vrot.slane %v3370_v60, 6  ;;  %v7037_v48 = vmul.f32 0.0010283801, %v3284_v38  ;;  %v3365_v45 = vadd.f32 %v3351_v17, %v3329_v2 }
 0x3e1   : > { %v3402_v28 = vadd.f32 %v3390_v29, %v3366_v51  ;;  %v3422_v26 = vrot.slane %v3406_v37, 5  ;;  %v3463_v9 = vsel %vm812_vm4, %v3461_v15, %v3462_v20  ;;  %v3248_v57 = vadd.f32 %v3232_v16, %v3216_v50 }
 0x3e2   : > { %v3387_v10 = vsel %vm733_vm1, %v3385_v1, %v3386_v11  ;;  %v3443_v39 = vsel %vm791_vm3, %v3441_v33, %v3442_v52  ;;  %v3498_v25 = vrot.slane %v7033_v62, 1  ;;  %v3287_v38 = vadd.f32 %v3270_v46, %v3247_v13 }
 0x3e3   : > { %v3438_v34 = vadd.f32 %v3426_v30, %v3402_v28  ;;  %v3401_v12 = vadd.f32 %v3387_v10, %v3365_v45  ;;  %v3423_v27 = vsel %vm770_vm2, %v3421_v8, %v3422_v26  ;;  %v3481_v55 = vmul.f32 0.036000773, %v7019_v35 }
 0x3e4   : > { %v3489_v15 = vmul.f32 0.007598758, %v7019_v35  ;;  %v7048_v18 = vadd.f32 %v3272_v23, %v3248_v57  ;;  %v3296_v29 = vmul.f32 0.007598758, %v3287_v38  ;;  %v3316_v33 = vmul.f32 0.036000773, %v3287_v38 }
 0x3e5   : > { %v3458_v2 = vadd.f32 %v3446_v40, %v3438_v34  ;;  %v3437_v1 = vadd.f32 %v3423_v27, %v3401_v12  ;;  %v7050_v16 = vadd.f32 %v3268_v24, %v3246_v0  ;;  %v3339_v30 = vmul.f32 0.10936069, %v3287_v38 }
 0x3e6   : > { %v3375_v51 = vmul.f32 0.21300554, %v3287_v38  ;;  %v3411_v19 = vmul.f32 0.26601171, %v3287_v38  ;;  %v3292_v60 = vmul.f32 0.0010283801, %v3287_v38 }
 0x3e7   : > { %v3478_v50 = vadd.f32 %v3466_v6, %v3458_v2  ;;  %v3457_v41 = vadd.f32 %v3443_v39, %v3437_v1  ;;  %v3304_v8 = vrot.slane %v3296_v29, 1  ;;  %v3340_v13 = vmul.f32 0.10936069, %v7048_v18 }
 0x3e8   : > { %v3497_v40 = vrot.slane %v3489_v15, 1  ;;  %v3509_v37 = vmul.f32 0.0010283801, %v7019_v35  ;;  %v3324_v20 = vrot.slane %v3316_v33, 2  ;;  %v3358_v11 = vrot.slane %v3339_v30, 3 }
 0x3e9   : > { %v3486_v46 = vadd.f32 %v3482_v5, %v3478_v50  ;;  %v3477_v28 = vadd.f32 %v3463_v9, %v3457_v41  ;;  %v3312_v17 = vadd.f32 %v3304_v8, %v3292_v60  ;;  %v3394_v52 = vrot.slane %v3375_v51, 4 }
 0x3ea   : > { %v3430_v0 = vrot.slane %v3411_v19, 5  ;;  %v3359_v45 = vrot.slane %v3340_v13, 3  ;;  %v3376_v6 = vmul.f32 0.21300554, %v7048_v18  ;;  %v3412_v26 = vmul.f32 0.26601171, %v7048_v18 }
 0x3eb   : > { %v3485_v23 = vadd.f32 %v3481_v55, %v3477_v28  ;;  %v3332_v34 = vadd.f32 %v3324_v20, %v3312_v17  ;;  %v3450_v10 = vrot.slane %v3375_v51, 6  ;;  %v3338_v39 = vmul.f32 0.10936069, %v7050_v16 }
 0x3ec   : > { %v3360_v5 = vsel %vm696_vm0, %v3358_v11, %v3359_v45  ;;  %v3395_v57 = vrot.slane %v3376_v6, 4  ;;  %v3431_v35 = vrot.slane %v3412_v26, 5  ;;  %v3451_v24 = vrot.slane %v3376_v6, 6 }
 0x3ed   : > { %v3368_v9 = vadd.f32 %v3360_v5, %v3332_v34  ;;  %v3356_v12 = vrot.slane %v3338_v39, 3  ;;  %v3374_v27 = vmul.f32 0.21300554, %v7050_v16  ;;  %v3410_v38 = vmul.f32 0.26601171, %v7050_v16 }
 0x3ee   : > { %v3396_v2 = vsel %vm733_vm1, %v3394_v52, %v3395_v57  ;;  %v3432_v15 = vsel %vm770_vm2, %v3430_v0, %v3431_v35  ;;  %v3471_v55 = vrot.slane %v3340_v13, 7  ;;  %v3468_v1 = vrot.slane %v3338_v39, 7 }
 0x3ef   : > { %v3357_v29 = vsel %vm696_vm0, %v3355_v47, %v3356_v12  ;;  %v3392_v33 = vrot.slane %v3374_v27, 4  ;;  %v3428_v50 = vrot.slane %v3410_v38, 5  ;;  %v3448_v51 = vrot.slane %v3374_v27, 6  ;;  %v7784_v27 = vld [vmem:[#allocation38_spill] sm:$0xff] }
 0x3f0   : > { %v3470_v19 = vrot.slane %v3339_v30, 7  ;;  %v3367_v41 = vadd.f32 %v3357_v29, %v7031_v31  ;;  %v3404_v60 = vadd.f32 %v3396_v2, %v3368_v9  ;;  %v3452_v8 = vsel %vm791_vm3, %v3450_v10, %v3451_v24 }
 0x3f1   : > { %v3393_v20 = vsel %vm733_vm1, %v3391_v21, %v3392_v33  ;;  %v3429_v13 = vsel %vm770_vm2, %v3427_v44, %v3428_v50  ;;  %v3449_v47 = vsel %vm791_vm3, %v3447_v49, %v3448_v51  ;;  %v3469_v30 = vsel %vm812_vm4, %v3467_v59, %v3468_v1 }
 0x3f2   : > { %v3403_v31 = vadd.f32 %v3393_v20, %v3367_v41  ;;  %v3440_v28 = vadd.f32 %v3432_v15, %v3404_v60  ;;  %v3472_v17 = vsel %vm812_vm4, %v3470_v19, %v3471_v55  ;;  %v3557_v11 = vadd.f32 0.0001, %v6973_v42 }
 0x3f3   : > { %v3518_v21 = vrot.slane %v7037_v48, 2  ;;  %v3517_v52 = vrot.slane %v3509_v37, 2  ;;  %v3505_v43 = vadd.f32 %v3497_v40, %v3485_v23  ;;  %v3506_v44 = vadd.f32 %v3498_v25, %v3486_v46 }
 0x3f4   : > { %v3439_v56 = vadd.f32 %v3429_v13, %v3403_v31  ;;  %v3460_v0 = vadd.f32 %v3452_v8, %v3440_v28  ;;  %v3492_v49 = vmul.f32 0.007598758, %v7048_v18  ;;  %v3484_v59 = vmul.f32 0.036000773, %v7048_v18  ;;  %v7785_v8 = vld [vmem:[#allocation33_spill] sm:$0xff] }
 0x3f5   : > { %v3525_v45 = vadd.f32 %v3517_v52, %v3505_v43  ;;  %v3526_v6 = vadd.f32 %v3518_v21, %v3506_v44  ;;  %v3598_v42 = vmul.f32 %v6992_v14, %v6937_v36  ;;  %v3491_v48 = vmul.f32 0.007598758, %v7050_v16 }
 0x3f6   : > { %v3459_v40 = vadd.f32 %v3449_v47, %v3439_v56  ;;  %v3480_v37 = vadd.f32 %v3472_v17, %v3460_v0  ;;  %v3512_v62 = vmul.f32 0.0010283801, %v7048_v18  ;;  %v3483_v25 = vmul.f32 0.036000773, %v7050_v16 }
 0x3f7   : > { %v3549_v46 = vsub.f32 %v3525_v45, %v7782_v53  ;;  %v3550_v26 = vsub.f32 %v3526_v6, %v7783_v54  ;;  %v3500_v10 = vrot.slane %v3492_v49, 1  ;;  %v3511_v39 = vmul.f32 0.0010283801, %v7050_v16 }
 0x3f8   : > { %v3479_v23 = vadd.f32 %v3469_v30, %v3459_v40  ;;  %v3488_v34 = vadd.f32 %v3484_v59, %v3480_v37  ;;  %v3601_v57 = vsub.f32 2.0, %v3597_v32  ;;  %v3602_v35 = vsub.f32 2.0, %v3598_v42 }
 0x3f9   : > { %v3561_v36 = vmul.f32 2.0, %v3549_v46  ;;  %v3562_v5 = vmul.f32 2.0, %v3550_v26  ;;  %v3499_v24 = vrot.slane %v3491_v48, 1  ;;  %v3520_v12 = vrot.slane %v3512_v62, 2 }
 0x3fa   : > { %v3487_v9 = vadd.f32 %v3483_v25, %v3479_v23  ;;  %v3508_v18 = vadd.f32 %v3500_v10, %v3488_v34  ;;  %v3556_v38 = vmul.f32 2.0, %v7784_v27  ;;  %v3519_v15 = vrot.slane %v3511_v39, 2 }
 0x3fb   : > { %v3565_v53 = vadd.f32 0.0009, %v3561_v36  ;;  %v3566_v2 = vadd.f32 0.0009, %v3562_v5  ;;  %v3600_v55 = vmul.f32 %v7004_v7, %v6969_v22  ;;  %v3605_v29 = vmul.f32 %v6989_v58, %v3601_v57 }
 0x3fc   : > { %v3507_v54 = vadd.f32 %v3499_v24, %v3487_v9  ;;  %v3528_v63 = vadd.f32 %v3520_v12, %v3508_v18  ;;  %v3606_v33 = vmul.f32 %v6992_v14, %v3602_v35  ;;  %v3599_v19 = vmul.f32 %v7000_v61, %v6961_v3 }
 0x3fd   : > { %v3569_v1 = vmul.f32 %v3565_v53, %v3557_v11  ;;  %v3570_v16 = vmul.f32 %v3566_v2, %v3558_v4  ;;  %v3555_v13 = vmul.f32 2.0, %v7785_v8  ;;  %v3604_v47 = vsub.f32 2.0, %v3600_v55 }
 0x3fe   : > { %v3527_v50 = vadd.f32 %v3519_v15, %v3507_v54  ;;  %v3552_v51 = vsub.f32 %v3528_v63, %v7784_v27  ;;  %v3560_v30 = vadd.f32 0.0001, %v3556_v38  ;;  %v3603_v17 = vsub.f32 2.0, %v3599_v19 }
 0x3ff   : > { %v3609_v41 = vmul.f32 %v3605_v29, %v3569_v1  ;;  %v3610_v60 = vmul.f32 %v3606_v33, %v3570_v16  ;;  %v3559_v21 = vadd.f32 0.0001, %v3555_v13  ;;  %v3608_v43 = vmul.f32 %v7004_v7, %v3604_v47 }
 0x400   : > { %v3551_v20 = vsub.f32 %v3527_v50, %v7785_v8  ;;  %v3564_v22 = vmul.f32 2.0, %v3552_v51  ;;  %v3607_v56 = vmul.f32 %v7000_v61, %v3603_v17 }
 0x401   : > { %v3614_v58 = vsel %vm3613_vm5, %v3609_v41, 0.0  ;;  %v3615_v14 = vsel %vm3613_vm5, %v3610_v60, 0.0 }
 0x402   : > { %v3563_v31 = vmul.f32 2.0, %v3551_v20  ;;  %v3568_v28 = vadd.f32 0.0009, %v3564_v22  ;;  %v3616_v11 = vadd.f32 %v3615_v14, %v3614_v58 }
 0x404   : > { %v3567_v3 = vadd.f32 0.0009, %v3563_v31  ;;  %v3572_v52 = vmul.f32 %v3568_v28, %v3560_v30 }
 0x406   : > { %v3571_v44 = vmul.f32 %v3567_v3, %v3559_v21  ;;  %v3612_v0 = vmul.f32 %v3608_v43, %v3572_v52 }
 0x408   : > { %v3611_v49 = vmul.f32 %v3607_v56, %v3571_v44  ;;  %v3619_v45 = vsel %vm3613_vm5, %v3612_v0, 0.0 }
 0x40a   : > { %v3617_v32 = vsel %vm3613_vm5, %v3611_v49, 0.0 }
 0x40b   : > { %v3618_v59 = vadd.f32 %v3617_v32, %v3616_v11 }
 0x40d   : > { %v3620_v6 = vadd.f32 %v3619_v45, %v3618_v59 }
 0x40f   : > { %v3621_v42 = vsel %vm3613_vm5, %v3620_v6, 0.0 }
 0x410   : > { %3622 = vadd.xlane.f32.xlu0 %v3621_v42 }
 0x49d   : > { %v3623_v48 = vpop.xlane.xlu0 %3622 }
 0x49e   : > { %v3624_v40 = vrot.slane %v3623_v48, 4 }
 0x4a0   : > { %v3625_v37 = vadd.f32 %v3624_v40, %v3623_v48 }
 0x4a2   : > { %v3626_v7 = vrot.slane %v3625_v37, 2 }
 0x4a4   : > { %v3627_v62 = vadd.f32 %v3626_v7, %v3625_v37 }
 0x4a6   : > { %v3628_v25 = vrot.slane %v3627_v62, 1 }
 0x4a8   : > { %v3629_v61 = vadd.f32 %v3628_v25, %v3627_v62 }
 0x4aa   : > { %3736 = vpush %v3629_v61 }
 0x4db   : > { %s3737_s20 = spop %3736 }
 0x4dc   : > { %v3631_v46 = vstv %s3737_s20 }
 0x4dd   : > { %3633 = vst.msk [vmem:[%s203_s6] sm:$0x1] %vm3632_vm6, %v3631_v46 }
 0x4de PF: > { %p15_p11 = scmp.ge.s32.totalorder %s3977_s14, 4   ;;  %s7786_s9 = smov %s3916_s10 }
 0x4df   : > { %s7787_s10 = smov %s3920_s11  ;;  %s7788_s11 = smov %s3987_s17 }
 0x4e0   : > { %s7789_s12 = smov %s3977_s14  ;;  %17 = sbr.rel (!%p15_p11) target bundleno = 5 (0x5), region = 81 }
 0x4e7   :  { %3651 = vsyncpa [#allocation3], 1 }
 0x4e8   :  { %3653 = vsyncpa [#allocation3 + $0x1], 1 }
 0x4e9   :  { %3654 = vsyncpa [#allocation5], 1 }
 0x4ea   :  { %3656 = vsyncpa [#allocation5 + $0x1], 1 }

</bundles_post_ra>
